<compile_context>
chip_gen: v7x
topology: tpu7x:2x2x1
jax: 0.10.0
libtpu: 0.0.40
codegen_flags: <defaults>
</compile_context>

<pallas_src>
import functools

import jax
import jax.numpy as jnp
from jax.experimental import pallas as pl
from jax.experimental.pallas import tpu as pltpu

LANE = 128


def _round_up(x, m):
    return (x + m - 1) // m * m


def _pick_row_tile(H, W):
    """Largest divisor TH of H with TH*W <= 512 and (TH*W) % 8 == 0."""
    cap = max(2, 512 // max(W, 1))
    for th in range(min(H, cap), 1, -1):
        if H % th == 0 and (th * W) % 8 == 0:
            return th
    return H


# --------------------------------------------------------------------------
# Kernels
# --------------------------------------------------------------------------
def _conv3x3_kernel(xf_ref, w_ref, b_ref, y_ref, ps_ref, acc_ref, *, TH, W):
    """3x3 conv (pad=1) + bias over one row tile, plus BN partial statistics.

    xf_ref : (1, R, Cin)   flat per-image input: pixel rows on sublanes,
                           channels on lanes; real pixels at rows
                           [TH*W, TH*W + H*W), zero margin on both sides.
    w_ref  : (9, Cin, Cp)  tap-major weights (tap = ky*3 + kx), Cout padded.
    b_ref  : (1, Cp)       conv bias (padded).
    y_ref  : (1, TH*W, Cp) conv+bias output tile (pre-BN).
    ps_ref : (1, 1, 2, Cp) per-tile per-channel [sum, sum_of_squares].
    acc_ref: (TH*W, Cp)    VMEM f32 accumulator scratch.
    """
    j = pl.program_id(1)
    P = TH * W  # leading zero margin: one full tile of pixel rows.

    m = jax.lax.broadcasted_iota(jnp.int32, (TH * W, 1), 0)
    col = m % W
    mask_l = col != 0          # kx == 0: left neighbour of column 0 is padding
    mask_r = col != (W - 1)    # kx == 2: right neighbour of column W-1 is padding

    # Initialize the accumulator with the conv bias (BN stats include the bias).
    acc_ref[...] = jnp.broadcast_to(b_ref[0], acc_ref.shape)

    t0 = j * TH  # first output row of this tile
    for ky in range(3):
        row_base = P + (t0 + ky - 1) * W
        for kx in range(3):
            start = row_base + (kx - 1)
            if kx == 1 and W % 8 == 0:
                start = pl.multiple_of(start, 8)
            xs = xf_ref[0, pl.ds(start, TH * W), :]
            if kx == 0:
                xs = jnp.where(mask_l, xs, 0.0)
            elif kx == 2:
                xs = jnp.where(mask_r, xs, 0.0)
            acc_ref[...] += jnp.dot(xs, w_ref[ky * 3 + kx],
                                    preferred_element_type=jnp.float32)

    acc = acc_ref[...]
    y_ref[0] = acc.astype(y_ref.dtype)
    ps_ref[0, 0] = jnp.concatenate(
        [jnp.sum(acc, axis=0, keepdims=True),
         jnp.sum(acc * acc, axis=0, keepdims=True)], axis=0)


def _bnrelu_kernel(y_ref, s_ref, t_ref, a_ref, *, pad_tiles):
    """a = relu(y * scale + shift).

    With pad_tiles=True the grid has one extra leading / trailing row tile per
    image which is written with zeros, producing the zero-margined flat layout
    the next conv stage consumes directly.
    """
    if pad_tiles:
        j = pl.program_id(1)
        last = pl.num_programs(1) - 1

        @pl.when((j == 0) | (j == last))
        def _():
            a_ref[...] = jnp.zeros_like(a_ref)

        @pl.when((j != 0) & (j != last))
        def _():
            a_ref[0] = jnp.maximum(y_ref[0] * s_ref[0] + t_ref[0], 0.0)
    else:
        a_ref[0] = jnp.maximum(y_ref[0] * s_ref[0] + t_ref[0], 0.0)


# --------------------------------------------------------------------------
# Stage wrappers (pallas_call plumbing)
# --------------------------------------------------------------------------
def _conv_stage(xf, w9, b, *, H, W, TH):
    """Tiled conv3x3 + bias. Returns (y, partial_stats)."""
    N, R, Cin = xf.shape
    Cp = w9.shape[-1]
    J = H // TH
    vmem = (2 * R * Cin + 2 * 9 * Cin * Cp + 2 * Cp
            + 2 * TH * W * Cp + 4 * Cp + TH * W * Cp) * 4 + (16 << 20)
    vmem = min(int(vmem), 64 << 20)
    return pl.pallas_call(
        functools.partial(_conv3x3_kernel, TH=TH, W=W),
        out_shape=(jax.ShapeDtypeStruct((N, H * W, Cp), jnp.float32),
                   jax.ShapeDtypeStruct((N, J, 2, Cp), jnp.float32)),
        grid=(N, J),
        in_specs=[
            pl.BlockSpec((1, R, Cin), lambda n, j: (n, 0, 0)),
            pl.BlockSpec((9, Cin, Cp), lambda n, j: (0, 0, 0)),
            pl.BlockSpec((1, Cp), lambda n, j: (0, 0)),
        ],
        out_specs=[
            pl.BlockSpec((1, TH * W, Cp), lambda n, j: (n, j, 0)),
            pl.BlockSpec((1, 1, 2, Cp), lambda n, j: (n, j, 0, 0)),
        ],
        scratch_shapes=[pltpu.VMEM((TH * W, Cp), jnp.float32)],
        compiler_params=pltpu.CompilerParams(
            dimension_semantics=("parallel", "parallel"),
            vmem_limit_bytes=vmem),
    )(xf, w9, b)


def _bnrelu_stage(y, scale, shift, *, H, W, TH, pad_tiles):
    """Tiled y*scale + shift -> ReLU, optionally emitting the zero-margined
    flat layout (next stage's input) instead of the plain flat layout."""
    N, _, Cp = y.shape
    J = H // TH
    JT = J + 2 if pad_tiles else J
    vmem = (4 * TH * W * Cp + 4 * Cp) * 4 + (8 << 20)
    vmem = min(int(vmem), 64 << 20)
    if pad_tiles:
        in_idx = lambda n, j: (n, jnp.clip(j - 1, 0, J - 1), 0)
    else:
        in_idx = lambda n, j: (n, j, 0)
    return pl.pallas_call(
        functools.partial(_bnrelu_kernel, pad_tiles=pad_tiles),
        out_shape=jax.ShapeDtypeStruct((N, JT * TH * W, Cp), jnp.float32),
        grid=(N, JT),
        in_specs=[
            pl.BlockSpec((1, TH * W, Cp), in_idx),
            pl.BlockSpec((1, Cp), lambda n, j: (0, 0)),
            pl.BlockSpec((1, Cp), lambda n, j: (0, 0)),
        ],
        out_specs=pl.BlockSpec((1, TH * W, Cp), lambda n, j: (n, j, 0)),
        compiler_params=pltpu.CompilerParams(
            dimension_semantics=("parallel", "parallel"),
            vmem_limit_bytes=vmem),
    )(y, scale, shift)


def _fold_bn(ps, gamma, beta, count, Cp, eps):
    """Combine per-tile [sum, sum_sq] partials into the folded BN affine."""
    s = jnp.sum(ps[:, :, 0, :], axis=(0, 1))
    ss = jnp.sum(ps[:, :, 1, :], axis=(0, 1))
    mean = s / count
    var = jnp.maximum(ss / count - mean * mean, 0.0)
    gp = jnp.pad(gamma, (0, Cp - gamma.shape[0]))
    bp = jnp.pad(beta, (0, Cp - beta.shape[0]))
    scale = gp * jax.lax.rsqrt(var + eps)
    shift = bp - mean * scale
    return scale.reshape(1, Cp), shift.reshape(1, Cp)


# --------------------------------------------------------------------------
# DoubleConv forward
# --------------------------------------------------------------------------
def double_conv(x_nchw, params, eps=1e-5, row_tile=None):
    """Forward pass equivalent to DoubleConv.forward (PyTorch NCHW in/out)."""
    N, Cin, H, W = x_nchw.shape
    Cmid = params["w1"].shape[-1]
    Cout = params["w2"].shape[-1]
    Cp1 = _round_up(Cmid, LANE)
    Cp2 = _round_up(Cout, LANE)

    TH = row_tile if row_tile is not None else _pick_row_tile(H, W)
    if H % TH != 0 or TH < 2:
        TH = H
    assert H % TH == 0 and TH >= 2 and (TH * W) % 8 == 0
    count = float(N * H * W)

    # Layout glue (once, at the NCHW boundary): flat "pixel rows x channels"
    # layout with a full zero tile of margin on both sides (3x3 halo for stage 1).
    x_flat = jnp.transpose(x_nchw, (0, 2, 3, 1)).reshape(N, H * W, Cin)
    xf1 = jnp.pad(x_flat, ((0, 0), (TH * W, TH * W), (0, 0)))

    # Weights: HWIO (3,3,Ci,Co) -> tap-major (9, Ci, Co), channel-padded to 128.
    w1 = jnp.pad(params["w1"].reshape(9, Cin, Cmid),
                 ((0, 0), (0, 0), (0, Cp1 - Cmid)))
    b1 = jnp.pad(params["b1"], (0, Cp1 - Cmid)).reshape(1, Cp1)
    w2 = jnp.pad(params["w2"].reshape(9, Cmid, Cout),
                 ((0, 0), (0, Cp1 - Cmid), (0, Cp2 - Cout)))
    b2 = jnp.pad(params["b2"], (0, Cp2 - Cout)).reshape(1, Cp2)

    # Stage 1: conv -> (global batch stats) -> BN+ReLU written in stage-2 layout.
    y1, ps1 = _conv_stage(xf1, w1, b1, H=H, W=W, TH=TH)
    sc1, sh1 = _fold_bn(ps1, params["g1"], params["bt1"], count, Cp1, eps)
    a1 = _bnrelu_stage(y1, sc1, sh1, H=H, W=W, TH=TH, pad_tiles=True)

    # Stage 2 consumes a1 directly (already zero-margined, channel-padded).
    y2, ps2 = _conv_stage(a1, w2, b2, H=H, W=W, TH=TH)
    sc2, sh2 = _fold_bn(ps2, params["g2"], params["bt2"], count, Cp2, eps)
    a2 = _bnrelu_stage(y2, sc2, sh2, H=H, W=W, TH=TH, pad_tiles=False)

    out = a2[:, :, :Cout].reshape(N, H, W, Cout)
    return jnp.transpose(out, (0, 3, 1, 2))  # NHWC -> NCHW


# --------------------------------------------------------------------------
# Params + pure-JAX reference
# --------------------------------------------------------------------------
def init_params(key, in_channels, out_channels, mid_channels=None):
    if not mid_channels:
        mid_channels = out_channels
    k1, k2, k3, k4 = jax.random.split(key, 4)
    scale1 = 1.0 / (in_channels * 9) ** 0.5
    scale2 = 1.0 / (mid_channels * 9) ** 0.5
    return {
        # conv weights stored HWIO (3, 3, Cin, Cout)
        "w1": jax.random.uniform(k1, (3, 3, in_channels, mid_channels),
                                 jnp.float32, -scale1, scale1),
        "b1": jax.random.uniform(k2, (mid_channels,), jnp.float32,
                                 -scale1, scale1),
        "g1": jnp.ones((mid_channels,), jnp.float32),
        "bt1": jnp.zeros((mid_channels,), jnp.float32),
        "w2": jax.random.uniform(k3, (3, 3, mid_channels, out_channels),
                                 jnp.float32, -scale2, scale2),
        "b2": jax.random.uniform(k4, (out_channels,), jnp.float32,
                                 -scale2, scale2),
        "g2": jnp.ones((out_channels,), jnp.float32),
        "bt2": jnp.zeros((out_channels,), jnp.float32),
    }


def _ref_stage(x, w, b, g, bt, eps=1e-5):
    y = jax.lax.conv_general_dilated(
        x, w, (1, 1), "SAME",
        dimension_numbers=("NHWC", "HWIO", "NHWC")) + b
    mean = y.mean(axis=(0, 1, 2))
    var = ((y - mean) ** 2).mean(axis=(0, 1, 2))
    return jnp.maximum((y - mean) * jax.lax.rsqrt(var + eps) * g + bt, 0.0)


def _ref_double_conv(x_nchw, p, eps=1e-5):
    x = jnp.transpose(x_nchw, (0, 2, 3, 1))
    y = _ref_stage(x, p["w1"], p["b1"], p["g1"], p["bt1"], eps)
    y = _ref_stage(y, p["w2"], p["b2"], p["g2"], p["bt2"], eps)
    return jnp.transpose(y, (0, 3, 1, 2))


if __name__ == "__main__":
    key = jax.random.PRNGKey(0)
    kx, kp = jax.random.split(key)

    N, Cin, H, W = 2, 4, 16, 16
    Cout = 8
    x = jax.random.normal(kx, (N, Cin, H, W), jnp.float32)  # NCHW, as PyTorch
    params = init_params(kp, Cin, Cout)

    fwd = jax.jit(double_conv)
    out = jax.block_until_ready(fwd(x, params))
    ref = jax.block_until_ready(_ref_double_conv(x, params))

    assert out.shape == (N, Cout, H, W), out.shape
    assert jnp.allclose(out, ref, atol=1e-3, rtol=1e-3), (
        float(jnp.max(jnp.abs(out - ref)))
    )
    print("KERNEL_OK")
</pallas_src>

<mosaic_0001>
module attributes {stable_mosaic.version = 11 : i64} {
  func.func @_bnrelu_kernel(%arg0: i32, %arg1: i32, %arg2: memref<1x256x128xf32, #tpu.memory_space<vmem>>, %arg3: memref<1x128xf32, #tpu.memory_space<vmem>>, %arg4: memref<1x128xf32, #tpu.memory_space<vmem>>, %arg5: memref<1x256x128xf32, #tpu.memory_space<vmem>>) attributes {dimension_semantics = [#tpu.dimension_semantics<parallel>, #tpu.dimension_semantics<parallel>], iteration_bounds = array<i64: 2, 3>, scalar_prefetch = 0 : i64, scratch_operands = 0 : i64, tpu.core_type = #tpu.core_type<tc>, window_params = [{transform_indices = @transform_0, window_bounds = array<i64: 1, 256, 128>}, {pipeline_mode = #tpu.pipeline_mode<synchronous>, transform_indices = @transform_1, window_bounds = array<i64: 1, 128>}, {pipeline_mode = #tpu.pipeline_mode<synchronous>, transform_indices = @transform_2, window_bounds = array<i64: 1, 128>}, {transform_indices = @transform_3, window_bounds = array<i64: 1, 256, 128>}]} {
    %c0_i32 = arith.constant 0 : i32
    %0 = arith.cmpi eq, %arg1, %c0_i32 : i32
    %c2_i32 = arith.constant 2 : i32
    %1 = arith.cmpi eq, %arg1, %c2_i32 : i32
    %2 = arith.ori %0, %1 : i1
    %3 = arith.extui %2 : i1 to i32
    %c0_i32_0 = arith.constant 0 : i32
    %4 = arith.cmpi ne, %3, %c0_i32_0 : i32
    scf.if %4 {
      %cst = arith.constant 0.000000e+00 : f32
      %10 = vector.broadcast %cst : f32 to vector<1x256x128xf32>
      %c0 = arith.constant 0 : index
      %c0_4 = arith.constant 0 : index
      %c0_5 = arith.constant 0 : index
      %11 = vector.load %arg5[%c0, %c0_4, %c0_5] : memref<1x256x128xf32, #tpu.memory_space<vmem>>, vector<1x256x128xf32>
      tpu.vector_store %arg5[%c0, %c0_4, %c0_5], %10 {strides = array<i32>} : memref<1x256x128xf32, #tpu.memory_space<vmem>>, vector<1x256x128xf32>,
    } else {
    }
    %c0_i32_1 = arith.constant 0 : i32
    %5 = arith.cmpi ne, %arg1, %c0_i32_1 : i32
    %c2_i32_2 = arith.constant 2 : i32
    %6 = arith.cmpi ne, %arg1, %c2_i32_2 : i32
    %7 = arith.andi %5, %6 : i1
    %8 = arith.extui %7 : i1 to i32
    %c0_i32_3 = arith.constant 0 : i32
    %9 = arith.cmpi ne, %8, %c0_i32_3 : i32
    scf.if %9 {
      %c0 = arith.constant 0 : index
      %c0_4 = arith.constant 0 : index
      %c0_5 = arith.constant 0 : index
      %10 = vector.load %arg2[%c0, %c0_4, %c0_5] : memref<1x256x128xf32, #tpu.memory_space<vmem>>, vector<1x256x128xf32>
      %11 = vector.shape_cast %10 : vector<1x256x128xf32> to vector<256x128xf32>
      %c0_6 = arith.constant 0 : index
      %c0_7 = arith.constant 0 : index
      %12 = vector.load %arg3[%c0_6, %c0_7] : memref<1x128xf32, #tpu.memory_space<vmem>>, vector<1x128xf32>
      %13 = vector.shape_cast %12 : vector<1x128xf32> to vector<128xf32>
      %14 = vector.shape_cast %13 : vector<128xf32> to vector<1x128xf32>
      %15 = vector.broadcast %14 : vector<1x128xf32> to vector<256x128xf32>
      %16 = arith.mulf %11, %15 : vector<256x128xf32>
      %c0_8 = arith.constant 0 : index
      %c0_9 = arith.constant 0 : index
      %17 = vector.load %arg4[%c0_8, %c0_9] : memref<1x128xf32, #tpu.memory_space<vmem>>, vector<1x128xf32>
      %18 = vector.shape_cast %17 : vector<1x128xf32> to vector<128xf32>
      %19 = vector.shape_cast %18 : vector<128xf32> to vector<1x128xf32>
      %20 = vector.broadcast %19 : vector<1x128xf32> to vector<256x128xf32>
      %21 = arith.addf %16, %20 : vector<256x128xf32>
      %cst = arith.constant 0.000000e+00 : f32
      %22 = vector.broadcast %cst : f32 to vector<256x128xf32>
      %23 = arith.maximumf %21, %22 : vector<256x128xf32>
      %c0_10 = arith.constant 0 : index
      %c0_11 = arith.constant 0 : index
      %c0_12 = arith.constant 0 : index
      %24 = vector.load %arg5[%c0_10, %c0_11, %c0_12] : memref<1x256x128xf32, #tpu.memory_space<vmem>>, vector<1x256x128xf32>
      %25 = vector.shape_cast %24 : vector<1x256x128xf32> to vector<256x128xf32>
      %26 = vector.shape_cast %23 : vector<256x128xf32> to vector<1x256x128xf32>
      tpu.vector_store %arg5[%c0_10, %c0_11, %c0_12], %26 {strides = array<i32>} : memref<1x256x128xf32, #tpu.memory_space<vmem>>, vector<1x256x128xf32>,
    } else {
    }
    return
  }
  func.func @transform_0(%arg0: i32, %arg1: i32) -> (i32, i32, i32) {
    %c1_i32 = arith.constant 1 : i32
    %0 = arith.subi %arg1, %c1_i32 : i32
    %c0_i32 = arith.constant 0 : i32
    %c0_i32_0 = arith.constant 0 : i32
    %1 = arith.maxsi %c0_i32, %0 : i32
    %2 = arith.minsi %c0_i32_0, %1 : i32
    %c0_i32_1 = arith.constant 0 : i32
    %c0_i32_2 = arith.constant 0 : i32
    return %arg0, %2, %c0_i32_1 : i32, i32, i32
  }
  func.func @transform_1(%arg0: i32, %arg1: i32) -> (i32, i32) {
    %c0_i32 = arith.constant 0 : i32
    %c0_i32_0 = arith.constant 0 : i32
    %c0_i32_1 = arith.constant 0 : i32
    return %c0_i32, %c0_i32_0 : i32, i32
  }
  func.func @transform_2(%arg0: i32, %arg1: i32) -> (i32, i32) {
    %c0_i32 = arith.constant 0 : i32
    %c0_i32_0 = arith.constant 0 : i32
    %c0_i32_1 = arith.constant 0 : i32
    return %c0_i32, %c0_i32_0 : i32, i32
  }
  func.func @transform_3(%arg0: i32, %arg1: i32) -> (i32, i32, i32) {
    %c0_i32 = arith.constant 0 : i32
    %c0_i32_0 = arith.constant 0 : i32
    return %arg0, %arg1, %c0_i32 : i32, i32, i32
  }
}

module attributes {stable_mosaic.version = 11 : i64} {
  func.func @_conv3x3_kernel(%arg0: i32, %arg1: i32, %arg2: memref<1x768x4xf32, #tpu.memory_space<vmem>>, %arg3: memref<9x4x128xf32, #tpu.memory_space<vmem>>, %arg4: memref<1x128xf32, #tpu.memory_space<vmem>>, %arg5: memref<1x256x128xf32, #tpu.memory_space<vmem>>, %arg6: memref<1x1x2x128xf32, #tpu.memory_space<vmem>>, %arg7: memref<256x128xf32, #tpu.memory_space<vmem>>) attributes {dimension_semantics = [#tpu.dimension_semantics<parallel>, #tpu.dimension_semantics<parallel>], iteration_bounds = array<i64: 2, 1>, scalar_prefetch = 0 : i64, scratch_operands = 1 : i64, tpu.core_type = #tpu.core_type<tc>, window_params = [{transform_indices = @transform_0, window_bounds = array<i64: 1, 768, 4>}, {pipeline_mode = #tpu.pipeline_mode<synchronous>, transform_indices = @transform_1, window_bounds = array<i64: 9, 4, 128>}, {pipeline_mode = #tpu.pipeline_mode<synchronous>, transform_indices = @transform_2, window_bounds = array<i64: 1, 128>}, {transform_indices = @transform_3, window_bounds = array<i64: 1, 256, 128>}, {transform_indices = @transform_4, window_bounds = array<i64: 1, 1, 2, 128>}]} {
    %0 = tpu.iota {dimensions = array<i32: 0>} : vector<256x1xi32>
    %c16_i32 = arith.constant 16 : i32
    %c0_i32 = arith.constant 0 : i32
    %1 = arith.cmpi eq, %c16_i32, %c0_i32 : i32
    %c1_i32 = arith.constant 1 : i32
    %2 = arith.select %1, %c1_i32, %c16_i32 : i32
    %3 = vector.broadcast %2 : i32 to vector<256x1xi32>
    %4 = arith.remsi %0, %3 : vector<256x1xi32>
    %c0_i32_0 = arith.constant 0 : i32
    %5 = vector.broadcast %c0_i32_0 : i32 to vector<256x1xi32>
    %6 = arith.cmpi ne, %4, %5 : vector<256x1xi32>
    %c0_i32_1 = arith.constant 0 : i32
    %7 = vector.broadcast %c0_i32_1 : i32 to vector<256x1xi32>
    %8 = arith.cmpi slt, %4, %7 : vector<256x1xi32>
    %c0_i32_2 = arith.constant 0 : i32
    %9 = arith.cmpi slt, %2, %c0_i32_2 : i32
    %10 = vector.broadcast %9 : i1 to vector<256x1xi1>
    %11 = vector.broadcast %10 : vector<256x1xi1> to vector<256x1xi1>
    %12 = arith.xori %8, %11 : vector<256x1xi1>
    %13 = arith.andi %12, %6 : vector<256x1xi1>
    %14 = vector.broadcast %2 : i32 to vector<256x1xi32>
    %15 = arith.addi %4, %14 : vector<256x1xi32>
    %16 = arith.select %13, %15, %4 : vector<256x1xi1>, vector<256x1xi32>
    %c0_i32_3 = arith.constant 0 : i32
    %17 = vector.broadcast %c0_i32_3 : i32 to vector<256x1xi32>
    %18 = arith.cmpi ne, %16, %17 : vector<256x1xi32>
    %c15_i32 = arith.constant 15 : i32
    %19 = vector.broadcast %c15_i32 : i32 to vector<256x1xi32>
    %20 = arith.cmpi ne, %16, %19 : vector<256x1xi32>
    %c0 = arith.constant 0 : index
    %c0_4 = arith.constant 0 : index
    %21 = vector.load %arg4[%c0, %c0_4] : memref<1x128xf32, #tpu.memory_space<vmem>>, vector<1x128xf32>
    %22 = vector.shape_cast %21 : vector<1x128xf32> to vector<128xf32>
    %23 = vector.shape_cast %22 : vector<128xf32> to vector<1x128xf32>
    %24 = vector.broadcast %23 : vector<1x128xf32> to vector<256x128xf32>
    %c0_5 = arith.constant 0 : index
    %c0_6 = arith.constant 0 : index
    %25 = vector.load %arg7[%c0_5, %c0_6] : memref<256x128xf32, #tpu.memory_space<vmem>>, vector<256x128xf32>
    tpu.vector_store %arg7[%c0_5, %c0_6], %24 {strides = array<i32>} : memref<256x128xf32, #tpu.memory_space<vmem>>, vector<256x128xf32>,
    %c16_i32_7 = arith.constant 16 : i32
    %26 = arith.muli %arg1, %c16_i32_7 : i32
    %c0_i32_8 = arith.constant 0 : i32
    %27 = arith.addi %26, %c0_i32_8 : i32
    %c1_i32_9 = arith.constant 1 : i32
    %28 = arith.subi %27, %c1_i32_9 : i32
    %c16_i32_10 = arith.constant 16 : i32
    %29 = arith.muli %28, %c16_i32_10 : i32
    %c256_i32 = arith.constant 256 : i32
    %30 = arith.addi %c256_i32, %29 : i32
    %c-1_i32 = arith.constant -1 : i32
    %31 = arith.addi %30, %c-1_i32 : i32
    %c0_11 = arith.constant 0 : index
    %32 = arith.index_cast %31 : i32 to index
    %c0_12 = arith.constant 0 : index
    %33 = vector.load %arg2[%c0_11, %32, %c0_12] : memref<1x768x4xf32, #tpu.memory_space<vmem>>, vector<1x256x4xf32>
    %34 = vector.shape_cast %33 : vector<1x256x4xf32> to vector<256x4xf32>
    %cst = arith.constant 0.000000e+00 : f32
    %35 = vector.shape_cast %18 : vector<256x1xi1> to vector<256x1xi1>
    %36 = vector.broadcast %35 : vector<256x1xi1> to vector<256x4xi1>
    %37 = vector.broadcast %cst : f32 to vector<256x4xf32>
    %38 = arith.select %36, %34, %37 : vector<256x4xi1>, vector<256x4xf32>
    %c0_13 = arith.constant 0 : index
    %c0_14 = arith.constant 0 : index
    %39 = vector.load %arg7[%c0_13, %c0_14] : memref<256x128xf32, #tpu.memory_space<vmem>>, vector<256x128xf32>
    %c0_15 = arith.constant 0 : index
    %c0_16 = arith.constant 0 : index
    %c0_17 = arith.constant 0 : index
    %40 = vector.load %arg3[%c0_15, %c0_16, %c0_17] : memref<9x4x128xf32, #tpu.memory_space<vmem>>, vector<1x4x128xf32>
    %41 = vector.shape_cast %40 : vector<1x4x128xf32> to vector<4x128xf32>
    %cst_18 = arith.constant dense<0.000000e+00> : vector<256x128xf32>
    %42 = tpu.matmul %38, %41, %cst_18 {dimension_numbers = #tpu.dot_dimension_numbers<[1], [0], [0], [1], [0, 0, 1, 1], [], []>} : vector<256x4xf32>, vector<4x128xf32>, vector<256x128xf32> -> vector<256x128xf32>
    %43 = arith.addf %39, %42 : vector<256x128xf32>
    %c0_19 = arith.constant 0 : index
    %c0_20 = arith.constant 0 : index
    %44 = vector.load %arg7[%c0_19, %c0_20] : memref<256x128xf32, #tpu.memory_space<vmem>>, vector<256x128xf32>
    tpu.vector_store %arg7[%c0_19, %c0_20], %43 {strides = array<i32>} : memref<256x128xf32, #tpu.memory_space<vmem>>, vector<256x128xf32>,
    %c0_i32_21 = arith.constant 0 : i32
    %45 = arith.addi %30, %c0_i32_21 : i32
    %46 = tpu.assume_multiple %45, 8 : i32
    %c0_22 = arith.constant 0 : index
    %47 = arith.index_cast %46 : i32 to index
    %c0_23 = arith.constant 0 : index
    %48 = vector.load %arg2[%c0_22, %47, %c0_23] : memref<1x768x4xf32, #tpu.memory_space<vmem>>, vector<1x256x4xf32>
    %49 = vector.shape_cast %48 : vector<1x256x4xf32> to vector<256x4xf32>
    %c0_24 = arith.constant 0 : index
    %c0_25 = arith.constant 0 : index
    %50 = vector.load %arg7[%c0_24, %c0_25] : memref<256x128xf32, #tpu.memory_space<vmem>>, vector<256x128xf32>
    %c1 = arith.constant 1 : index
    %c0_26 = arith.constant 0 : index
    %c0_27 = arith.constant 0 : index
    %51 = vector.load %arg3[%c1, %c0_26, %c0_27] : memref<9x4x128xf32, #tpu.memory_space<vmem>>, vector<1x4x128xf32>
    %52 = vector.shape_cast %51 : vector<1x4x128xf32> to vector<4x128xf32>
    %cst_28 = arith.constant dense<0.000000e+00> : vector<256x128xf32>
    %53 = tpu.matmul %49, %52, %cst_28 {dimension_numbers = #tpu.dot_dimension_numbers<[1], [0], [0], [1], [0, 0, 1, 1], [], []>} : vector<256x4xf32>, vector<4x128xf32>, vector<256x128xf32> -> vector<256x128xf32>
    %54 = arith.addf %50, %53 : vector<256x128xf32>
    %c0_29 = arith.constant 0 : index
    %c0_30 = arith.constant 0 : index
    %55 = vector.load %arg7[%c0_29, %c0_30] : memref<256x128xf32, #tpu.memory_space<vmem>>, vector<256x128xf32>
    tpu.vector_store %arg7[%c0_29, %c0_30], %54 {strides = array<i32>} : memref<256x128xf32, #tpu.memory_space<vmem>>, vector<256x128xf32>,
    %c1_i32_31 = arith.constant 1 : i32
    %56 = arith.addi %30, %c1_i32_31 : i32
    %c0_32 = arith.constant 0 : index
    %57 = arith.index_cast %56 : i32 to index
    %c0_33 = arith.constant 0 : index
    %58 = vector.load %arg2[%c0_32, %57, %c0_33] : memref<1x768x4xf32, #tpu.memory_space<vmem>>, vector<1x256x4xf32>
    %59 = vector.shape_cast %58 : vector<1x256x4xf32> to vector<256x4xf32>
    %cst_34 = arith.constant 0.000000e+00 : f32
    %60 = vector.shape_cast %20 : vector<256x1xi1> to vector<256x1xi1>
    %61 = vector.broadcast %60 : vector<256x1xi1> to vector<256x4xi1>
    %62 = vector.broadcast %cst_34 : f32 to vector<256x4xf32>
    %63 = arith.select %61, %59, %62 : vector<256x4xi1>, vector<256x4xf32>
    %c0_35 = arith.constant 0 : index
    %c0_36 = arith.constant 0 : index
    %64 = vector.load %arg7[%c0_35, %c0_36] : memref<256x128xf32, #tpu.memory_space<vmem>>, vector<256x128xf32>
    %c2 = arith.constant 2 : index
    %c0_37 = arith.constant 0 : index
    %c0_38 = arith.constant 0 : index
    %65 = vector.load %arg3[%c2, %c0_37, %c0_38] : memref<9x4x128xf32, #tpu.memory_space<vmem>>, vector<1x4x128xf32>
    %66 = vector.shape_cast %65 : vector<1x4x128xf32> to vector<4x128xf32>
    %cst_39 = arith.constant dense<0.000000e+00> : vector<256x128xf32>
    %67 = tpu.matmul %63, %66, %cst_39 {dimension_numbers = #tpu.dot_dimension_numbers<[1], [0], [0], [1], [0, 0, 1, 1], [], []>} : vector<256x4xf32>, vector<4x128xf32>, vector<256x128xf32> -> vector<256x128xf32>
    %68 = arith.addf %64, %67 : vector<256x128xf32>
    %c0_40 = arith.constant 0 : index
    %c0_41 = arith.constant 0 : index
    %69 = vector.load %arg7[%c0_40, %c0_41] : memref<256x128xf32, #tpu.memory_space<vmem>>, vector<256x128xf32>
    tpu.vector_store %arg7[%c0_40, %c0_41], %68 {strides = array<i32>} : memref<256x128xf32, #tpu.memory_space<vmem>>, vector<256x128xf32>,
    %c1_i32_42 = arith.constant 1 : i32
    %70 = arith.addi %26, %c1_i32_42 : i32
    %c1_i32_43 = arith.constant 1 : i32
    %71 = arith.subi %70, %c1_i32_43 : i32
    %c16_i32_44 = arith.constant 16 : i32
    %72 = arith.muli %71, %c16_i32_44 : i32
    %c256_i32_45 = arith.constant 256 : i32
    %73 = arith.addi %c256_i32_45, %72 : i32
    %c-1_i32_46 = arith.constant -1 : i32
    %74 = arith.addi %73, %c-1_i32_46 : i32
    %c0_47 = arith.constant 0 : index
    %75 = arith.index_cast %74 : i32 to index
    %c0_48 = arith.constant 0 : index
    %76 = vector.load %arg2[%c0_47, %75, %c0_48] : memref<1x768x4xf32, #tpu.memory_space<vmem>>, vector<1x256x4xf32>
    %77 = vector.shape_cast %76 : vector<1x256x4xf32> to vector<256x4xf32>
    %cst_49 = arith.constant 0.000000e+00 : f32
    %78 = vector.shape_cast %18 : vector<256x1xi1> to vector<256x1xi1>
    %79 = vector.broadcast %78 : vector<256x1xi1> to vector<256x4xi1>
    %80 = vector.broadcast %cst_49 : f32 to vector<256x4xf32>
    %81 = arith.select %79, %77, %80 : vector<256x4xi1>, vector<256x4xf32>
    %c0_50 = arith.constant 0 : index
    %c0_51 = arith.constant 0 : index
    %82 = vector.load %arg7[%c0_50, %c0_51] : memref<256x128xf32, #tpu.memory_space<vmem>>, vector<256x128xf32>
    %c3 = arith.constant 3 : index
    %c0_52 = arith.constant 0 : index
    %c0_53 = arith.constant 0 : index
    %83 = vector.load %arg3[%c3, %c0_52, %c0_53] : memref<9x4x128xf32, #tpu.memory_space<vmem>>, vector<1x4x128xf32>
    %84 = vector.shape_cast %83 : vector<1x4x128xf32> to vector<4x128xf32>
    %cst_54 = arith.constant dense<0.000000e+00> : vector<256x128xf32>
    %85 = tpu.matmul %81, %84, %cst_54 {dimension_numbers = #tpu.dot_dimension_numbers<[1], [0], [0], [1], [0, 0, 1, 1], [], []>} : vector<256x4xf32>, vector<4x128xf32>, vector<256x128xf32> -> vector<256x128xf32>
    %86 = arith.addf %82, %85 : vector<256x128xf32>
    %c0_55 = arith.constant 0 : index
    %c0_56 = arith.constant 0 : index
    %87 = vector.load %arg7[%c0_55, %c0_56] : memref<256x128xf32, #tpu.memory_space<vmem>>, vector<256x128xf32>
    tpu.vector_store %arg7[%c0_55, %c0_56], %86 {strides = array<i32>} : memref<256x128xf32, #tpu.memory_space<vmem>>, vector<256x128xf32>,
    %c0_i32_57 = arith.constant 0 : i32
    %88 = arith.addi %73, %c0_i32_57 : i32
    %89 = tpu.assume_multiple %88, 8 : i32
    %c0_58 = arith.constant 0 : index
    %90 = arith.index_cast %89 : i32 to index
    %c0_59 = arith.constant 0 : index
    %91 = vector.load %arg2[%c0_58, %90, %c0_59] : memref<1x768x4xf32, #tpu.memory_space<vmem>>, vector<1x256x4xf32>
    %92 = vector.shape_cast %91 : vector<1x256x4xf32> to vector<256x4xf32>
    %c0_60 = arith.constant 0 : index
    %c0_61 = arith.constant 0 : index
    %93 = vector.load %arg7[%c0_60, %c0_61] : memref<256x128xf32, #tpu.memory_space<vmem>>, vector<256x128xf32>
    %c4 = arith.constant 4 : index
    %c0_62 = arith.constant 0 : index
    %c0_63 = arith.constant 0 : index
    %94 = vector.load %arg3[%c4, %c0_62, %c0_63] : memref<9x4x128xf32, #tpu.memory_space<vmem>>, vector<1x4x128xf32>
    %95 = vector.shape_cast %94 : vector<1x4x128xf32> to vector<4x128xf32>
    %cst_64 = arith.constant dense<0.000000e+00> : vector<256x128xf32>
    %96 = tpu.matmul %92, %95, %cst_64 {dimension_numbers = #tpu.dot_dimension_numbers<[1], [0], [0], [1], [0, 0, 1, 1], [], []>} : vector<256x4xf32>, vector<4x128xf32>, vector<256x128xf32> -> vector<256x128xf32>
    %97 = arith.addf %93, %96 : vector<256x128xf32>
    %c0_65 = arith.constant 0 : index
    %c0_66 = arith.constant 0 : index
    %98 = vector.load %arg7[%c0_65, %c0_66] : memref<256x128xf32, #tpu.memory_space<vmem>>, vector<256x128xf32>
    tpu.vector_store %arg7[%c0_65, %c0_66], %97 {strides = array<i32>} : memref<256x128xf32, #tpu.memory_space<vmem>>, vector<256x128xf32>,
    %c1_i32_67 = arith.constant 1 : i32
    %99 = arith.addi %73, %c1_i32_67 : i32
    %c0_68 = arith.constant 0 : index
    %100 = arith.index_cast %99 : i32 to index
    %c0_69 = arith.constant 0 : index
    %101 = vector.load %arg2[%c0_68, %100, %c0_69] : memref<1x768x4xf32, #tpu.memory_space<vmem>>, vector<1x256x4xf32>
    %102 = vector.shape_cast %101 : vector<1x256x4xf32> to vector<256x4xf32>
    %cst_70 = arith.constant 0.000000e+00 : f32
    %103 = vector.shape_cast %20 : vector<256x1xi1> to vector<256x1xi1>
    %104 = vector.broadcast %103 : vector<256x1xi1> to vector<256x4xi1>
    %105 = vector.broadcast %cst_70 : f32 to vector<256x4xf32>
    %106 = arith.select %104, %102, %105 : vector<256x4xi1>, vector<256x4xf32>
    %c0_71 = arith.constant 0 : index
    %c0_72 = arith.constant 0 : index
    %107 = vector.load %arg7[%c0_71, %c0_72] : memref<256x128xf32, #tpu.memory_space<vmem>>, vector<256x128xf32>
    %c5 = arith.constant 5 : index
    %c0_73 = arith.constant 0 : index
    %c0_74 = arith.constant 0 : index
    %108 = vector.load %arg3[%c5, %c0_73, %c0_74] : memref<9x4x128xf32, #tpu.memory_space<vmem>>, vector<1x4x128xf32>
    %109 = vector.shape_cast %108 : vector<1x4x128xf32> to vector<4x128xf32>
    %cst_75 = arith.constant dense<0.000000e+00> : vector<256x128xf32>
    %110 = tpu.matmul %106, %109, %cst_75 {dimension_numbers = #tpu.dot_dimension_numbers<[1], [0], [0], [1], [0, 0, 1, 1], [], []>} : vector<256x4xf32>, vector<4x128xf32>, vector<256x128xf32> -> vector<256x128xf32>
    %111 = arith.addf %107, %110 : vector<256x128xf32>
    %c0_76 = arith.constant 0 : index
    %c0_77 = arith.constant 0 : index
    %112 = vector.load %arg7[%c0_76, %c0_77] : memref<256x128xf32, #tpu.memory_space<vmem>>, vector<256x128xf32>
    tpu.vector_store %arg7[%c0_76, %c0_77], %111 {strides = array<i32>} : memref<256x128xf32, #tpu.memory_space<vmem>>, vector<256x128xf32>,
    %c2_i32 = arith.constant 2 : i32
    %113 = arith.addi %26, %c2_i32 : i32
    %c1_i32_78 = arith.constant 1 : i32
    %114 = arith.subi %113, %c1_i32_78 : i32
    %c16_i32_79 = arith.constant 16 : i32
    %115 = arith.muli %114, %c16_i32_79 : i32
    %c256_i32_80 = arith.constant 256 : i32
    %116 = arith.addi %c256_i32_80, %115 : i32
    %c-1_i32_81 = arith.constant -1 : i32
    %117 = arith.addi %116, %c-1_i32_81 : i32
    %c0_82 = arith.constant 0 : index
    %118 = arith.index_cast %117 : i32 to index
    %c0_83 = arith.constant 0 : index
    %119 = vector.load %arg2[%c0_82, %118, %c0_83] : memref<1x768x4xf32, #tpu.memory_space<vmem>>, vector<1x256x4xf32>
    %120 = vector.shape_cast %119 : vector<1x256x4xf32> to vector<256x4xf32>
    %cst_84 = arith.constant 0.000000e+00 : f32
    %121 = vector.shape_cast %18 : vector<256x1xi1> to vector<256x1xi1>
    %122 = vector.broadcast %121 : vector<256x1xi1> to vector<256x4xi1>
    %123 = vector.broadcast %cst_84 : f32 to vector<256x4xf32>
    %124 = arith.select %122, %120, %123 : vector<256x4xi1>, vector<256x4xf32>
    %c0_85 = arith.constant 0 : index
    %c0_86 = arith.constant 0 : index
    %125 = vector.load %arg7[%c0_85, %c0_86] : memref<256x128xf32, #tpu.memory_space<vmem>>, vector<256x128xf32>
    %c6 = arith.constant 6 : index
    %c0_87 = arith.constant 0 : index
    %c0_88 = arith.constant 0 : index
    %126 = vector.load %arg3[%c6, %c0_87, %c0_88] : memref<9x4x128xf32, #tpu.memory_space<vmem>>, vector<1x4x128xf32>
    %127 = vector.shape_cast %126 : vector<1x4x128xf32> to vector<4x128xf32>
    %cst_89 = arith.constant dense<0.000000e+00> : vector<256x128xf32>
    %128 = tpu.matmul %124, %127, %cst_89 {dimension_numbers = #tpu.dot_dimension_numbers<[1], [0], [0], [1], [0, 0, 1, 1], [], []>} : vector<256x4xf32>, vector<4x128xf32>, vector<256x128xf32> -> vector<256x128xf32>
    %129 = arith.addf %125, %128 : vector<256x128xf32>
    %c0_90 = arith.constant 0 : index
    %c0_91 = arith.constant 0 : index
    %130 = vector.load %arg7[%c0_90, %c0_91] : memref<256x128xf32, #tpu.memory_space<vmem>>, vector<256x128xf32>
    tpu.vector_store %arg7[%c0_90, %c0_91], %129 {strides = array<i32>} : memref<256x128xf32, #tpu.memory_space<vmem>>, vector<256x128xf32>,
    %c0_i32_92 = arith.constant 0 : i32
    %131 = arith.addi %116, %c0_i32_92 : i32
    %132 = tpu.assume_multiple %131, 8 : i32
    %c0_93 = arith.constant 0 : index
    %133 = arith.index_cast %132 : i32 to index
    %c0_94 = arith.constant 0 : index
    %134 = vector.load %arg2[%c0_93, %133, %c0_94] : memref<1x768x4xf32, #tpu.memory_space<vmem>>, vector<1x256x4xf32>
    %135 = vector.shape_cast %134 : vector<1x256x4xf32> to vector<256x4xf32>
    %c0_95 = arith.constant 0 : index
    %c0_96 = arith.constant 0 : index
    %136 = vector.load %arg7[%c0_95, %c0_96] : memref<256x128xf32, #tpu.memory_space<vmem>>, vector<256x128xf32>
    %c7 = arith.constant 7 : index
    %c0_97 = arith.constant 0 : index
    %c0_98 = arith.constant 0 : index
    %137 = vector.load %arg3[%c7, %c0_97, %c0_98] : memref<9x4x128xf32, #tpu.memory_space<vmem>>, vector<1x4x128xf32>
    %138 = vector.shape_cast %137 : vector<1x4x128xf32> to vector<4x128xf32>
    %cst_99 = arith.constant dense<0.000000e+00> : vector<256x128xf32>
    %139 = tpu.matmul %135, %138, %cst_99 {dimension_numbers = #tpu.dot_dimension_numbers<[1], [0], [0], [1], [0, 0, 1, 1], [], []>} : vector<256x4xf32>, vector<4x128xf32>, vector<256x128xf32> -> vector<256x128xf32>
    %140 = arith.addf %136, %139 : vector<256x128xf32>
    %c0_100 = arith.constant 0 : index
    %c0_101 = arith.constant 0 : index
    %141 = vector.load %arg7[%c0_100, %c0_101] : memref<256x128xf32, #tpu.memory_space<vmem>>, vector<256x128xf32>
    tpu.vector_store %arg7[%c0_100, %c0_101], %140 {strides = array<i32>} : memref<256x128xf32, #tpu.memory_space<vmem>>, vector<256x128xf32>,
    %c1_i32_102 = arith.constant 1 : i32
    %142 = arith.addi %116, %c1_i32_102 : i32
    %c0_103 = arith.constant 0 : index
    %143 = arith.index_cast %142 : i32 to index
    %c0_104 = arith.constant 0 : index
    %144 = vector.load %arg2[%c0_103, %143, %c0_104] : memref<1x768x4xf32, #tpu.memory_space<vmem>>, vector<1x256x4xf32>
    %145 = vector.shape_cast %144 : vector<1x256x4xf32> to vector<256x4xf32>
    %cst_105 = arith.constant 0.000000e+00 : f32
    %146 = vector.shape_cast %20 : vector<256x1xi1> to vector<256x1xi1>
    %147 = vector.broadcast %146 : vector<256x1xi1> to vector<256x4xi1>
    %148 = vector.broadcast %cst_105 : f32 to vector<256x4xf32>
    %149 = arith.select %147, %145, %148 : vector<256x4xi1>, vector<256x4xf32>
    %c0_106 = arith.constant 0 : index
    %c0_107 = arith.constant 0 : index
    %150 = vector.load %arg7[%c0_106, %c0_107] : memref<256x128xf32, #tpu.memory_space<vmem>>, vector<256x128xf32>
    %c8 = arith.constant 8 : index
    %c0_108 = arith.constant 0 : index
    %c0_109 = arith.constant 0 : index
    %151 = vector.load %arg3[%c8, %c0_108, %c0_109] : memref<9x4x128xf32, #tpu.memory_space<vmem>>, vector<1x4x128xf32>
    %152 = vector.shape_cast %151 : vector<1x4x128xf32> to vector<4x128xf32>
    %cst_110 = arith.constant dense<0.000000e+00> : vector<256x128xf32>
    %153 = tpu.matmul %149, %152, %cst_110 {dimension_numbers = #tpu.dot_dimension_numbers<[1], [0], [0], [1], [0, 0, 1, 1], [], []>} : vector<256x4xf32>, vector<4x128xf32>, vector<256x128xf32> -> vector<256x128xf32>
    %154 = arith.addf %150, %153 : vector<256x128xf32>
    %c0_111 = arith.constant 0 : index
    %c0_112 = arith.constant 0 : index
    %155 = vector.load %arg7[%c0_111, %c0_112] : memref<256x128xf32, #tpu.memory_space<vmem>>, vector<256x128xf32>
    tpu.vector_store %arg7[%c0_111, %c0_112], %154 {strides = array<i32>} : memref<256x128xf32, #tpu.memory_space<vmem>>, vector<256x128xf32>,
    %c0_113 = arith.constant 0 : index
    %c0_114 = arith.constant 0 : index
    %156 = vector.load %arg7[%c0_113, %c0_114] : memref<256x128xf32, #tpu.memory_space<vmem>>, vector<256x128xf32>
    %c0_115 = arith.constant 0 : index
    %c0_116 = arith.constant 0 : index
    %c0_117 = arith.constant 0 : index
    %157 = vector.load %arg5[%c0_115, %c0_116, %c0_117] : memref<1x256x128xf32, #tpu.memory_space<vmem>>, vector<1x256x128xf32>
    %158 = vector.shape_cast %157 : vector<1x256x128xf32> to vector<256x128xf32>
    %159 = vector.shape_cast %156 : vector<256x128xf32> to vector<1x256x128xf32>
    tpu.vector_store %arg5[%c0_115, %c0_116, %c0_117], %159 {strides = array<i32>} : memref<1x256x128xf32, #tpu.memory_space<vmem>>, vector<1x256x128xf32>,
    %cst_118 = arith.constant dense<0.000000e+00> : vector<128xf32>
    %160 = vector.multi_reduction <add>, %156, %cst_118 [0] : vector<256x128xf32> to vector<128xf32>
    %161 = vector.shape_cast %160 : vector<128xf32> to vector<1x128xf32>
    %162 = arith.mulf %156, %156 : vector<256x128xf32>
    %cst_119 = arith.constant dense<0.000000e+00> : vector<128xf32>
    %163 = vector.multi_reduction <add>, %162, %cst_119 [0] : vector<256x128xf32> to vector<128xf32>
    %164 = vector.shape_cast %163 : vector<128xf32> to vector<1x128xf32>
    %165 = tpu.concatenate %161, %164 in 0 : vector<1x128xf32>, vector<1x128xf32> -> vector<2x128xf32>
    %c0_120 = arith.constant 0 : index
    %c0_121 = arith.constant 0 : index
    %c0_122 = arith.constant 0 : index
    %c0_123 = arith.constant 0 : index
    %166 = vector.load %arg6[%c0_120, %c0_121, %c0_122, %c0_123] : memref<1x1x2x128xf32, #tpu.memory_space<vmem>>, vector<1x1x2x128xf32>
    %167 = vector.shape_cast %166 : vector<1x1x2x128xf32> to vector<2x128xf32>
    %168 = vector.shape_cast %165 : vector<2x128xf32> to vector<1x1x2x128xf32>
    tpu.vector_store %arg6[%c0_120, %c0_121, %c0_122, %c0_123], %168 {strides = array<i32>} : memref<1x1x2x128xf32, #tpu.memory_space<vmem>>, vector<1x1x2x128xf32>,
    return
  }
  func.func @transform_0(%arg0: i32, %arg1: i32) -> (i32, i32, i32) {
    %c0_i32 = arith.constant 0 : i32
    %c0_i32_0 = arith.constant 0 : i32
    %c0_i32_1 = arith.constant 0 : i32
    return %arg0, %c0_i32, %c0_i32_0 : i32, i32, i32
  }
  func.func @transform_1(%arg0: i32, %arg1: i32) -> (i32, i32, i32) {
    %c0_i32 = arith.constant 0 : i32
    %c0_i32_0 = arith.constant 0 : i32
    %c0_i32_1 = arith.constant 0 : i32
    %c0_i32_2 = arith.constant 0 : i32
    return %c0_i32, %c0_i32_0, %c0_i32_1 : i32, i32, i32
  }
  func.func @transform_2(%arg0: i32, %arg1: i32) -> (i32, i32) {
    %c0_i32 = arith.constant 0 : i32
    %c0_i32_0 = arith.constant 0 : i32
    %c0_i32_1 = arith.constant 0 : i32
    return %c0_i32, %c0_i32_0 : i32, i32
  }
  func.func @transform_3(%arg0: i32, %arg1: i32) -> (i32, i32, i32) {
    %c0_i32 = arith.constant 0 : i32
    %c0_i32_0 = arith.constant 0 : i32
    return %arg0, %arg1, %c0_i32 : i32, i32, i32
  }
  func.func @transform_4(%arg0: i32, %arg1: i32) -> (i32, i32, i32, i32) {
    %c0_i32 = arith.constant 0 : i32
    %c0_i32_0 = arith.constant 0 : i32
    %c0_i32_1 = arith.constant 0 : i32
    return %arg0, %arg1, %c0_i32, %c0_i32_0 : i32, i32, i32, i32
  }
}

module attributes {stable_mosaic.version = 11 : i64} {
  func.func @_conv3x3_kernel(%arg0: i32, %arg1: i32, %arg2: memref<1x768x128xf32, #tpu.memory_space<vmem>>, %arg3: memref<9x128x128xf32, #tpu.memory_space<vmem>>, %arg4: memref<1x128xf32, #tpu.memory_space<vmem>>, %arg5: memref<1x256x128xf32, #tpu.memory_space<vmem>>, %arg6: memref<1x1x2x128xf32, #tpu.memory_space<vmem>>, %arg7: memref<256x128xf32, #tpu.memory_space<vmem>>) attributes {dimension_semantics = [#tpu.dimension_semantics<parallel>, #tpu.dimension_semantics<parallel>], iteration_bounds = array<i64: 2, 1>, scalar_prefetch = 0 : i64, scratch_operands = 1 : i64, tpu.core_type = #tpu.core_type<tc>, window_params = [{transform_indices = @transform_0, window_bounds = array<i64: 1, 768, 128>}, {pipeline_mode = #tpu.pipeline_mode<synchronous>, transform_indices = @transform_1, window_bounds = array<i64: 9, 128, 128>}, {pipeline_mode = #tpu.pipeline_mode<synchronous>, transform_indices = @transform_2, window_bounds = array<i64: 1, 128>}, {transform_indices = @transform_3, window_bounds = array<i64: 1, 256, 128>}, {transform_indices = @transform_4, window_bounds = array<i64: 1, 1, 2, 128>}]} {
    %0 = tpu.iota {dimensions = array<i32: 0>} : vector<256x1xi32>
    %c16_i32 = arith.constant 16 : i32
    %c0_i32 = arith.constant 0 : i32
    %1 = arith.cmpi eq, %c16_i32, %c0_i32 : i32
    %c1_i32 = arith.constant 1 : i32
    %2 = arith.select %1, %c1_i32, %c16_i32 : i32
    %3 = vector.broadcast %2 : i32 to vector<256x1xi32>
    %4 = arith.remsi %0, %3 : vector<256x1xi32>
    %c0_i32_0 = arith.constant 0 : i32
    %5 = vector.broadcast %c0_i32_0 : i32 to vector<256x1xi32>
    %6 = arith.cmpi ne, %4, %5 : vector<256x1xi32>
    %c0_i32_1 = arith.constant 0 : i32
    %7 = vector.broadcast %c0_i32_1 : i32 to vector<256x1xi32>
    %8 = arith.cmpi slt, %4, %7 : vector<256x1xi32>
    %c0_i32_2 = arith.constant 0 : i32
    %9 = arith.cmpi slt, %2, %c0_i32_2 : i32
    %10 = vector.broadcast %9 : i1 to vector<256x1xi1>
    %11 = vector.broadcast %10 : vector<256x1xi1> to vector<256x1xi1>
    %12 = arith.xori %8, %11 : vector<256x1xi1>
    %13 = arith.andi %12, %6 : vector<256x1xi1>
    %14 = vector.broadcast %2 : i32 to vector<256x1xi32>
    %15 = arith.addi %4, %14 : vector<256x1xi32>
    %16 = arith.select %13, %15, %4 : vector<256x1xi1>, vector<256x1xi32>
    %c0_i32_3 = arith.constant 0 : i32
    %17 = vector.broadcast %c0_i32_3 : i32 to vector<256x1xi32>
    %18 = arith.cmpi ne, %16, %17 : vector<256x1xi32>
    %c15_i32 = arith.constant 15 : i32
    %19 = vector.broadcast %c15_i32 : i32 to vector<256x1xi32>
    %20 = arith.cmpi ne, %16, %19 : vector<256x1xi32>
    %c0 = arith.constant 0 : index
    %c0_4 = arith.constant 0 : index
    %21 = vector.load %arg4[%c0, %c0_4] : memref<1x128xf32, #tpu.memory_space<vmem>>, vector<1x128xf32>
    %22 = vector.shape_cast %21 : vector<1x128xf32> to vector<128xf32>
    %23 = vector.shape_cast %22 : vector<128xf32> to vector<1x128xf32>
    %24 = vector.broadcast %23 : vector<1x128xf32> to vector<256x128xf32>
    %c0_5 = arith.constant 0 : index
    %c0_6 = arith.constant 0 : index
    %25 = vector.load %arg7[%c0_5, %c0_6] : memref<256x128xf32, #tpu.memory_space<vmem>>, vector<256x128xf32>
    tpu.vector_store %arg7[%c0_5, %c0_6], %24 {strides = array<i32>} : memref<256x128xf32, #tpu.memory_space<vmem>>, vector<256x128xf32>,
    %c16_i32_7 = arith.constant 16 : i32
    %26 = arith.muli %arg1, %c16_i32_7 : i32
    %c0_i32_8 = arith.constant 0 : i32
    %27 = arith.addi %26, %c0_i32_8 : i32
    %c1_i32_9 = arith.constant 1 : i32
    %28 = arith.subi %27, %c1_i32_9 : i32
    %c16_i32_10 = arith.constant 16 : i32
    %29 = arith.muli %28, %c16_i32_10 : i32
    %c256_i32 = arith.constant 256 : i32
    %30 = arith.addi %c256_i32, %29 : i32
    %c-1_i32 = arith.constant -1 : i32
    %31 = arith.addi %30, %c-1_i32 : i32
    %c0_11 = arith.constant 0 : index
    %32 = arith.index_cast %31 : i32 to index
    %c0_12 = arith.constant 0 : index
    %33 = vector.load %arg2[%c0_11, %32, %c0_12] : memref<1x768x128xf32, #tpu.memory_space<vmem>>, vector<1x256x128xf32>
    %34 = vector.shape_cast %33 : vector<1x256x128xf32> to vector<256x128xf32>
    %cst = arith.constant 0.000000e+00 : f32
    %35 = vector.shape_cast %18 : vector<256x1xi1> to vector<256x1xi1>
    %36 = vector.broadcast %35 : vector<256x1xi1> to vector<256x128xi1>
    %37 = vector.broadcast %cst : f32 to vector<256x128xf32>
    %38 = arith.select %36, %34, %37 : vector<256x128xi1>, vector<256x128xf32>
    %c0_13 = arith.constant 0 : index
    %c0_14 = arith.constant 0 : index
    %39 = vector.load %arg7[%c0_13, %c0_14] : memref<256x128xf32, #tpu.memory_space<vmem>>, vector<256x128xf32>
    %c0_15 = arith.constant 0 : index
    %c0_16 = arith.constant 0 : index
    %c0_17 = arith.constant 0 : index
    %40 = vector.load %arg3[%c0_15, %c0_16, %c0_17] : memref<9x128x128xf32, #tpu.memory_space<vmem>>, vector<1x128x128xf32>
    %41 = vector.shape_cast %40 : vector<1x128x128xf32> to vector<128x128xf32>
    %cst_18 = arith.constant dense<0.000000e+00> : vector<256x128xf32>
    %42 = tpu.matmul %38, %41, %cst_18 {dimension_numbers = #tpu.dot_dimension_numbers<[1], [0], [0], [1], [0, 0, 1, 1], [], []>} : vector<256x128xf32>, vector<128x128xf32>, vector<256x128xf32> -> vector<256x128xf32>
    %43 = arith.addf %39, %42 : vector<256x128xf32>
    %c0_19 = arith.constant 0 : index
    %c0_20 = arith.constant 0 : index
    %44 = vector.load %arg7[%c0_19, %c0_20] : memref<256x128xf32, #tpu.memory_space<vmem>>, vector<256x128xf32>
    tpu.vector_store %arg7[%c0_19, %c0_20], %43 {strides = array<i32>} : memref<256x128xf32, #tpu.memory_space<vmem>>, vector<256x128xf32>,
    %c0_i32_21 = arith.constant 0 : i32
    %45 = arith.addi %30, %c0_i32_21 : i32
    %46 = tpu.assume_multiple %45, 8 : i32
    %c0_22 = arith.constant 0 : index
    %47 = arith.index_cast %46 : i32 to index
    %c0_23 = arith.constant 0 : index
    %48 = vector.load %arg2[%c0_22, %47, %c0_23] : memref<1x768x128xf32, #tpu.memory_space<vmem>>, vector<1x256x128xf32>
    %49 = vector.shape_cast %48 : vector<1x256x128xf32> to vector<256x128xf32>
    %c0_24 = arith.constant 0 : index
    %c0_25 = arith.constant 0 : index
    %50 = vector.load %arg7[%c0_24, %c0_25] : memref<256x128xf32, #tpu.memory_space<vmem>>, vector<256x128xf32>
    %c1 = arith.constant 1 : index
    %c0_26 = arith.constant 0 : index
    %c0_27 = arith.constant 0 : index
    %51 = vector.load %arg3[%c1, %c0_26, %c0_27] : memref<9x128x128xf32, #tpu.memory_space<vmem>>, vector<1x128x128xf32>
    %52 = vector.shape_cast %51 : vector<1x128x128xf32> to vector<128x128xf32>
    %cst_28 = arith.constant dense<0.000000e+00> : vector<256x128xf32>
    %53 = tpu.matmul %49, %52, %cst_28 {dimension_numbers = #tpu.dot_dimension_numbers<[1], [0], [0], [1], [0, 0, 1, 1], [], []>} : vector<256x128xf32>, vector<128x128xf32>, vector<256x128xf32> -> vector<256x128xf32>
    %54 = arith.addf %50, %53 : vector<256x128xf32>
    %c0_29 = arith.constant 0 : index
    %c0_30 = arith.constant 0 : index
    %55 = vector.load %arg7[%c0_29, %c0_30] : memref<256x128xf32, #tpu.memory_space<vmem>>, vector<256x128xf32>
    tpu.vector_store %arg7[%c0_29, %c0_30], %54 {strides = array<i32>} : memref<256x128xf32, #tpu.memory_space<vmem>>, vector<256x128xf32>,
    %c1_i32_31 = arith.constant 1 : i32
    %56 = arith.addi %30, %c1_i32_31 : i32
    %c0_32 = arith.constant 0 : index
    %57 = arith.index_cast %56 : i32 to index
    %c0_33 = arith.constant 0 : index
    %58 = vector.load %arg2[%c0_32, %57, %c0_33] : memref<1x768x128xf32, #tpu.memory_space<vmem>>, vector<1x256x128xf32>
    %59 = vector.shape_cast %58 : vector<1x256x128xf32> to vector<256x128xf32>
    %cst_34 = arith.constant 0.000000e+00 : f32
    %60 = vector.shape_cast %20 : vector<256x1xi1> to vector<256x1xi1>
    %61 = vector.broadcast %60 : vector<256x1xi1> to vector<256x128xi1>
    %62 = vector.broadcast %cst_34 : f32 to vector<256x128xf32>
    %63 = arith.select %61, %59, %62 : vector<256x128xi1>, vector<256x128xf32>
    %c0_35 = arith.constant 0 : index
    %c0_36 = arith.constant 0 : index
    %64 = vector.load %arg7[%c0_35, %c0_36] : memref<256x128xf32, #tpu.memory_space<vmem>>, vector<256x128xf32>
    %c2 = arith.constant 2 : index
    %c0_37 = arith.constant 0 : index
    %c0_38 = arith.constant 0 : index
    %65 = vector.load %arg3[%c2, %c0_37, %c0_38] : memref<9x128x128xf32, #tpu.memory_space<vmem>>, vector<1x128x128xf32>
    %66 = vector.shape_cast %65 : vector<1x128x128xf32> to vector<128x128xf32>
    %cst_39 = arith.constant dense<0.000000e+00> : vector<256x128xf32>
    %67 = tpu.matmul %63, %66, %cst_39 {dimension_numbers = #tpu.dot_dimension_numbers<[1], [0], [0], [1], [0, 0, 1, 1], [], []>} : vector<256x128xf32>, vector<128x128xf32>, vector<256x128xf32> -> vector<256x128xf32>
    %68 = arith.addf %64, %67 : vector<256x128xf32>
    %c0_40 = arith.constant 0 : index
    %c0_41 = arith.constant 0 : index
    %69 = vector.load %arg7[%c0_40, %c0_41] : memref<256x128xf32, #tpu.memory_space<vmem>>, vector<256x128xf32>
    tpu.vector_store %arg7[%c0_40, %c0_41], %68 {strides = array<i32>} : memref<256x128xf32, #tpu.memory_space<vmem>>, vector<256x128xf32>,
    %c1_i32_42 = arith.constant 1 : i32
    %70 = arith.addi %26, %c1_i32_42 : i32
    %c1_i32_43 = arith.constant 1 : i32
    %71 = arith.subi %70, %c1_i32_43 : i32
    %c16_i32_44 = arith.constant 16 : i32
    %72 = arith.muli %71, %c16_i32_44 : i32
    %c256_i32_45 = arith.constant 256 : i32
    %73 = arith.addi %c256_i32_45, %72 : i32
    %c-1_i32_46 = arith.constant -1 : i32
    %74 = arith.addi %73, %c-1_i32_46 : i32
    %c0_47 = arith.constant 0 : index
    %75 = arith.index_cast %74 : i32 to index
    %c0_48 = arith.constant 0 : index
    %76 = vector.load %arg2[%c0_47, %75, %c0_48] : memref<1x768x128xf32, #tpu.memory_space<vmem>>, vector<1x256x128xf32>
    %77 = vector.shape_cast %76 : vector<1x256x128xf32> to vector<256x128xf32>
    %cst_49 = arith.constant 0.000000e+00 : f32
    %78 = vector.shape_cast %18 : vector<256x1xi1> to vector<256x1xi1>
    %79 = vector.broadcast %78 : vector<256x1xi1> to vector<256x128xi1>
    %80 = vector.broadcast %cst_49 : f32 to vector<256x128xf32>
    %81 = arith.select %79, %77, %80 : vector<256x128xi1>, vector<256x128xf32>
    %c0_50 = arith.constant 0 : index
    %c0_51 = arith.constant 0 : index
    %82 = vector.load %arg7[%c0_50, %c0_51] : memref<256x128xf32, #tpu.memory_space<vmem>>, vector<256x128xf32>
    %c3 = arith.constant 3 : index
    %c0_52 = arith.constant 0 : index
    %c0_53 = arith.constant 0 : index
    %83 = vector.load %arg3[%c3, %c0_52, %c0_53] : memref<9x128x128xf32, #tpu.memory_space<vmem>>, vector<1x128x128xf32>
    %84 = vector.shape_cast %83 : vector<1x128x128xf32> to vector<128x128xf32>
    %cst_54 = arith.constant dense<0.000000e+00> : vector<256x128xf32>
    %85 = tpu.matmul %81, %84, %cst_54 {dimension_numbers = #tpu.dot_dimension_numbers<[1], [0], [0], [1], [0, 0, 1, 1], [], []>} : vector<256x128xf32>, vector<128x128xf32>, vector<256x128xf32> -> vector<256x128xf32>
    %86 = arith.addf %82, %85 : vector<256x128xf32>
    %c0_55 = arith.constant 0 : index
    %c0_56 = arith.constant 0 : index
    %87 = vector.load %arg7[%c0_55, %c0_56] : memref<256x128xf32, #tpu.memory_space<vmem>>, vector<256x128xf32>
    tpu.vector_store %arg7[%c0_55, %c0_56], %86 {strides = array<i32>} : memref<256x128xf32, #tpu.memory_space<vmem>>, vector<256x128xf32>,
    %c0_i32_57 = arith.constant 0 : i32
    %88 = arith.addi %73, %c0_i32_57 : i32
    %89 = tpu.assume_multiple %88, 8 : i32
    %c0_58 = arith.constant 0 : index
    %90 = arith.index_cast %89 : i32 to index
    %c0_59 = arith.constant 0 : index
    %91 = vector.load %arg2[%c0_58, %90, %c0_59] : memref<1x768x128xf32, #tpu.memory_space<vmem>>, vector<1x256x128xf32>
    %92 = vector.shape_cast %91 : vector<1x256x128xf32> to vector<256x128xf32>
    %c0_60 = arith.constant 0 : index
    %c0_61 = arith.constant 0 : index
    %93 = vector.load %arg7[%c0_60, %c0_61] : memref<256x128xf32, #tpu.memory_space<vmem>>, vector<256x128xf32>
    %c4 = arith.constant 4 : index
    %c0_62 = arith.constant 0 : index
    %c0_63 = arith.constant 0 : index
    %94 = vector.load %arg3[%c4, %c0_62, %c0_63] : memref<9x128x128xf32, #tpu.memory_space<vmem>>, vector<1x128x128xf32>
    %95 = vector.shape_cast %94 : vector<1x128x128xf32> to vector<128x128xf32>
    %cst_64 = arith.constant dense<0.000000e+00> : vector<256x128xf32>
    %96 = tpu.matmul %92, %95, %cst_64 {dimension_numbers = #tpu.dot_dimension_numbers<[1], [0], [0], [1], [0, 0, 1, 1], [], []>} : vector<256x128xf32>, vector<128x128xf32>, vector<256x128xf32> -> vector<256x128xf32>
    %97 = arith.addf %93, %96 : vector<256x128xf32>
    %c0_65 = arith.constant 0 : index
    %c0_66 = arith.constant 0 : index
    %98 = vector.load %arg7[%c0_65, %c0_66] : memref<256x128xf32, #tpu.memory_space<vmem>>, vector<256x128xf32>
    tpu.vector_store %arg7[%c0_65, %c0_66], %97 {strides = array<i32>} : memref<256x128xf32, #tpu.memory_space<vmem>>, vector<256x128xf32>,
    %c1_i32_67 = arith.constant 1 : i32
    %99 = arith.addi %73, %c1_i32_67 : i32
    %c0_68 = arith.constant 0 : index
    %100 = arith.index_cast %99 : i32 to index
    %c0_69 = arith.constant 0 : index
    %101 = vector.load %arg2[%c0_68, %100, %c0_69] : memref<1x768x128xf32, #tpu.memory_space<vmem>>, vector<1x256x128xf32>
    %102 = vector.shape_cast %101 : vector<1x256x128xf32> to vector<256x128xf32>
    %cst_70 = arith.constant 0.000000e+00 : f32
    %103 = vector.shape_cast %20 : vector<256x1xi1> to vector<256x1xi1>
    %104 = vector.broadcast %103 : vector<256x1xi1> to vector<256x128xi1>
    %105 = vector.broadcast %cst_70 : f32 to vector<256x128xf32>
    %106 = arith.select %104, %102, %105 : vector<256x128xi1>, vector<256x128xf32>
    %c0_71 = arith.constant 0 : index
    %c0_72 = arith.constant 0 : index
    %107 = vector.load %arg7[%c0_71, %c0_72] : memref<256x128xf32, #tpu.memory_space<vmem>>, vector<256x128xf32>
    %c5 = arith.constant 5 : index
    %c0_73 = arith.constant 0 : index
    %c0_74 = arith.constant 0 : index
    %108 = vector.load %arg3[%c5, %c0_73, %c0_74] : memref<9x128x128xf32, #tpu.memory_space<vmem>>, vector<1x128x128xf32>
    %109 = vector.shape_cast %108 : vector<1x128x128xf32> to vector<128x128xf32>
    %cst_75 = arith.constant dense<0.000000e+00> : vector<256x128xf32>
    %110 = tpu.matmul %106, %109, %cst_75 {dimension_numbers = #tpu.dot_dimension_numbers<[1], [0], [0], [1], [0, 0, 1, 1], [], []>} : vector<256x128xf32>, vector<128x128xf32>, vector<256x128xf32> -> vector<256x128xf32>
    %111 = arith.addf %107, %110 : vector<256x128xf32>
    %c0_76 = arith.constant 0 : index
    %c0_77 = arith.constant 0 : index
    %112 = vector.load %arg7[%c0_76, %c0_77] : memref<256x128xf32, #tpu.memory_space<vmem>>, vector<256x128xf32>
    tpu.vector_store %arg7[%c0_76, %c0_77], %111 {strides = array<i32>} : memref<256x128xf32, #tpu.memory_space<vmem>>, vector<256x128xf32>,
    %c2_i32 = arith.constant 2 : i32
    %113 = arith.addi %26, %c2_i32 : i32
    %c1_i32_78 = arith.constant 1 : i32
    %114 = arith.subi %113, %c1_i32_78 : i32
    %c16_i32_79 = arith.constant 16 : i32
    %115 = arith.muli %114, %c16_i32_79 : i32
    %c256_i32_80 = arith.constant 256 : i32
    %116 = arith.addi %c256_i32_80, %115 : i32
    %c-1_i32_81 = arith.constant -1 : i32
    %117 = arith.addi %116, %c-1_i32_81 : i32
    %c0_82 = arith.constant 0 : index
    %118 = arith.index_cast %117 : i32 to index
    %c0_83 = arith.constant 0 : index
    %119 = vector.load %arg2[%c0_82, %118, %c0_83] : memref<1x768x128xf32, #tpu.memory_space<vmem>>, vector<1x256x128xf32>
    %120 = vector.shape_cast %119 : vector<1x256x128xf32> to vector<256x128xf32>
    %cst_84 = arith.constant 0.000000e+00 : f32
    %121 = vector.shape_cast %18 : vector<256x1xi1> to vector<256x1xi1>
    %122 = vector.broadcast %121 : vector<256x1xi1> to vector<256x128xi1>
    %123 = vector.broadcast %cst_84 : f32 to vector<256x128xf32>
    %124 = arith.select %122, %120, %123 : vector<256x128xi1>, vector<256x128xf32>
    %c0_85 = arith.constant 0 : index
    %c0_86 = arith.constant 0 : index
    %125 = vector.load %arg7[%c0_85, %c0_86] : memref<256x128xf32, #tpu.memory_space<vmem>>, vector<256x128xf32>
    %c6 = arith.constant 6 : index
    %c0_87 = arith.constant 0 : index
    %c0_88 = arith.constant 0 : index
    %126 = vector.load %arg3[%c6, %c0_87, %c0_88] : memref<9x128x128xf32, #tpu.memory_space<vmem>>, vector<1x128x128xf32>
    %127 = vector.shape_cast %126 : vector<1x128x128xf32> to vector<128x128xf32>
    %cst_89 = arith.constant dense<0.000000e+00> : vector<256x128xf32>
    %128 = tpu.matmul %124, %127, %cst_89 {dimension_numbers = #tpu.dot_dimension_numbers<[1], [0], [0], [1], [0, 0, 1, 1], [], []>} : vector<256x128xf32>, vector<128x128xf32>, vector<256x128xf32> -> vector<256x128xf32>
    %129 = arith.addf %125, %128 : vector<256x128xf32>
    %c0_90 = arith.constant 0 : index
    %c0_91 = arith.constant 0 : index
    %130 = vector.load %arg7[%c0_90, %c0_91] : memref<256x128xf32, #tpu.memory_space<vmem>>, vector<256x128xf32>
    tpu.vector_store %arg7[%c0_90, %c0_91], %129 {strides = array<i32>} : memref<256x128xf32, #tpu.memory_space<vmem>>, vector<256x128xf32>,
    %c0_i32_92 = arith.constant 0 : i32
    %131 = arith.addi %116, %c0_i32_92 : i32
    %132 = tpu.assume_multiple %131, 8 : i32
    %c0_93 = arith.constant 0 : index
    %133 = arith.index_cast %132 : i32 to index
    %c0_94 = arith.constant 0 : index
    %134 = vector.load %arg2[%c0_93, %133, %c0_94] : memref<1x768x128xf32, #tpu.memory_space<vmem>>, vector<1x256x128xf32>
    %135 = vector.shape_cast %134 : vector<1x256x128xf32> to vector<256x128xf32>
    %c0_95 = arith.constant 0 : index
    %c0_96 = arith.constant 0 : index
    %136 = vector.load %arg7[%c0_95, %c0_96] : memref<256x128xf32, #tpu.memory_space<vmem>>, vector<256x128xf32>
    %c7 = arith.constant 7 : index
    %c0_97 = arith.constant 0 : index
    %c0_98 = arith.constant 0 : index
    %137 = vector.load %arg3[%c7, %c0_97, %c0_98] : memref<9x128x128xf32, #tpu.memory_space<vmem>>, vector<1x128x128xf32>
    %138 = vector.shape_cast %137 : vector<1x128x128xf32> to vector<128x128xf32>
    %cst_99 = arith.constant dense<0.000000e+00> : vector<256x128xf32>
    %139 = tpu.matmul %135, %138, %cst_99 {dimension_numbers = #tpu.dot_dimension_numbers<[1], [0], [0], [1], [0, 0, 1, 1], [], []>} : vector<256x128xf32>, vector<128x128xf32>, vector<256x128xf32> -> vector<256x128xf32>
    %140 = arith.addf %136, %139 : vector<256x128xf32>
    %c0_100 = arith.constant 0 : index
    %c0_101 = arith.constant 0 : index
    %141 = vector.load %arg7[%c0_100, %c0_101] : memref<256x128xf32, #tpu.memory_space<vmem>>, vector<256x128xf32>
    tpu.vector_store %arg7[%c0_100, %c0_101], %140 {strides = array<i32>} : memref<256x128xf32, #tpu.memory_space<vmem>>, vector<256x128xf32>,
    %c1_i32_102 = arith.constant 1 : i32
    %142 = arith.addi %116, %c1_i32_102 : i32
    %c0_103 = arith.constant 0 : index
    %143 = arith.index_cast %142 : i32 to index
    %c0_104 = arith.constant 0 : index
    %144 = vector.load %arg2[%c0_103, %143, %c0_104] : memref<1x768x128xf32, #tpu.memory_space<vmem>>, vector<1x256x128xf32>
    %145 = vector.shape_cast %144 : vector<1x256x128xf32> to vector<256x128xf32>
    %cst_105 = arith.constant 0.000000e+00 : f32
    %146 = vector.shape_cast %20 : vector<256x1xi1> to vector<256x1xi1>
    %147 = vector.broadcast %146 : vector<256x1xi1> to vector<256x128xi1>
    %148 = vector.broadcast %cst_105 : f32 to vector<256x128xf32>
    %149 = arith.select %147, %145, %148 : vector<256x128xi1>, vector<256x128xf32>
    %c0_106 = arith.constant 0 : index
    %c0_107 = arith.constant 0 : index
    %150 = vector.load %arg7[%c0_106, %c0_107] : memref<256x128xf32, #tpu.memory_space<vmem>>, vector<256x128xf32>
    %c8 = arith.constant 8 : index
    %c0_108 = arith.constant 0 : index
    %c0_109 = arith.constant 0 : index
    %151 = vector.load %arg3[%c8, %c0_108, %c0_109] : memref<9x128x128xf32, #tpu.memory_space<vmem>>, vector<1x128x128xf32>
    %152 = vector.shape_cast %151 : vector<1x128x128xf32> to vector<128x128xf32>
    %cst_110 = arith.constant dense<0.000000e+00> : vector<256x128xf32>
    %153 = tpu.matmul %149, %152, %cst_110 {dimension_numbers = #tpu.dot_dimension_numbers<[1], [0], [0], [1], [0, 0, 1, 1], [], []>} : vector<256x128xf32>, vector<128x128xf32>, vector<256x128xf32> -> vector<256x128xf32>
    %154 = arith.addf %150, %153 : vector<256x128xf32>
    %c0_111 = arith.constant 0 : index
    %c0_112 = arith.constant 0 : index
    %155 = vector.load %arg7[%c0_111, %c0_112] : memref<256x128xf32, #tpu.memory_space<vmem>>, vector<256x128xf32>
    tpu.vector_store %arg7[%c0_111, %c0_112], %154 {strides = array<i32>} : memref<256x128xf32, #tpu.memory_space<vmem>>, vector<256x128xf32>,
    %c0_113 = arith.constant 0 : index
    %c0_114 = arith.constant 0 : index
    %156 = vector.load %arg7[%c0_113, %c0_114] : memref<256x128xf32, #tpu.memory_space<vmem>>, vector<256x128xf32>
    %c0_115 = arith.constant 0 : index
    %c0_116 = arith.constant 0 : index
    %c0_117 = arith.constant 0 : index
    %157 = vector.load %arg5[%c0_115, %c0_116, %c0_117] : memref<1x256x128xf32, #tpu.memory_space<vmem>>, vector<1x256x128xf32>
    %158 = vector.shape_cast %157 : vector<1x256x128xf32> to vector<256x128xf32>
    %159 = vector.shape_cast %156 : vector<256x128xf32> to vector<1x256x128xf32>
    tpu.vector_store %arg5[%c0_115, %c0_116, %c0_117], %159 {strides = array<i32>} : memref<1x256x128xf32, #tpu.memory_space<vmem>>, vector<1x256x128xf32>,
    %cst_118 = arith.constant dense<0.000000e+00> : vector<128xf32>
    %160 = vector.multi_reduction <add>, %156, %cst_118 [0] : vector<256x128xf32> to vector<128xf32>
    %161 = vector.shape_cast %160 : vector<128xf32> to vector<1x128xf32>
    %162 = arith.mulf %156, %156 : vector<256x128xf32>
    %cst_119 = arith.constant dense<0.000000e+00> : vector<128xf32>
    %163 = vector.multi_reduction <add>, %162, %cst_119 [0] : vector<256x128xf32> to vector<128xf32>
    %164 = vector.shape_cast %163 : vector<128xf32> to vector<1x128xf32>
    %165 = tpu.concatenate %161, %164 in 0 : vector<1x128xf32>, vector<1x128xf32> -> vector<2x128xf32>
    %c0_120 = arith.constant 0 : index
    %c0_121 = arith.constant 0 : index
    %c0_122 = arith.constant 0 : index
    %c0_123 = arith.constant 0 : index
    %166 = vector.load %arg6[%c0_120, %c0_121, %c0_122, %c0_123] : memref<1x1x2x128xf32, #tpu.memory_space<vmem>>, vector<1x1x2x128xf32>
    %167 = vector.shape_cast %166 : vector<1x1x2x128xf32> to vector<2x128xf32>
    %168 = vector.shape_cast %165 : vector<2x128xf32> to vector<1x1x2x128xf32>
    tpu.vector_store %arg6[%c0_120, %c0_121, %c0_122, %c0_123], %168 {strides = array<i32>} : memref<1x1x2x128xf32, #tpu.memory_space<vmem>>, vector<1x1x2x128xf32>,
    return
  }
  func.func @transform_0(%arg0: i32, %arg1: i32) -> (i32, i32, i32) {
    %c0_i32 = arith.constant 0 : i32
    %c0_i32_0 = arith.constant 0 : i32
    %c0_i32_1 = arith.constant 0 : i32
    return %arg0, %c0_i32, %c0_i32_0 : i32, i32, i32
  }
  func.func @transform_1(%arg0: i32, %arg1: i32) -> (i32, i32, i32) {
    %c0_i32 = arith.constant 0 : i32
    %c0_i32_0 = arith.constant 0 : i32
    %c0_i32_1 = arith.constant 0 : i32
    %c0_i32_2 = arith.constant 0 : i32
    return %c0_i32, %c0_i32_0, %c0_i32_1 : i32, i32, i32
  }
  func.func @transform_2(%arg0: i32, %arg1: i32) -> (i32, i32) {
    %c0_i32 = arith.constant 0 : i32
    %c0_i32_0 = arith.constant 0 : i32
    %c0_i32_1 = arith.constant 0 : i32
    return %c0_i32, %c0_i32_0 : i32, i32
  }
  func.func @transform_3(%arg0: i32, %arg1: i32) -> (i32, i32, i32) {
    %c0_i32 = arith.constant 0 : i32
    %c0_i32_0 = arith.constant 0 : i32
    return %arg0, %arg1, %c0_i32 : i32, i32, i32
  }
  func.func @transform_4(%arg0: i32, %arg1: i32) -> (i32, i32, i32, i32) {
    %c0_i32 = arith.constant 0 : i32
    %c0_i32_0 = arith.constant 0 : i32
    %c0_i32_1 = arith.constant 0 : i32
    return %arg0, %arg1, %c0_i32, %c0_i32_0 : i32, i32, i32, i32
  }
}

module attributes {stable_mosaic.version = 11 : i64} {
  func.func @_bnrelu_kernel(%arg0: i32, %arg1: i32, %arg2: memref<1x256x128xf32, #tpu.memory_space<vmem>>, %arg3: memref<1x128xf32, #tpu.memory_space<vmem>>, %arg4: memref<1x128xf32, #tpu.memory_space<vmem>>, %arg5: memref<1x256x128xf32, #tpu.memory_space<vmem>>) attributes {dimension_semantics = [#tpu.dimension_semantics<parallel>, #tpu.dimension_semantics<parallel>], iteration_bounds = array<i64: 2, 1>, scalar_prefetch = 0 : i64, scratch_operands = 0 : i64, tpu.core_type = #tpu.core_type<tc>, window_params = [{transform_indices = @transform_0, window_bounds = array<i64: 1, 256, 128>}, {pipeline_mode = #tpu.pipeline_mode<synchronous>, transform_indices = @transform_1, window_bounds = array<i64: 1, 128>}, {pipeline_mode = #tpu.pipeline_mode<synchronous>, transform_indices = @transform_2, window_bounds = array<i64: 1, 128>}, {transform_indices = @transform_3, window_bounds = array<i64: 1, 256, 128>}]} {
    %c0 = arith.constant 0 : index
    %c0_0 = arith.constant 0 : index
    %c0_1 = arith.constant 0 : index
    %0 = vector.load %arg2[%c0, %c0_0, %c0_1] : memref<1x256x128xf32, #tpu.memory_space<vmem>>, vector<1x256x128xf32>
    %1 = vector.shape_cast %0 : vector<1x256x128xf32> to vector<256x128xf32>
    %c0_2 = arith.constant 0 : index
    %c0_3 = arith.constant 0 : index
    %2 = vector.load %arg3[%c0_2, %c0_3] : memref<1x128xf32, #tpu.memory_space<vmem>>, vector<1x128xf32>
    %3 = vector.shape_cast %2 : vector<1x128xf32> to vector<128xf32>
    %4 = vector.shape_cast %3 : vector<128xf32> to vector<1x128xf32>
    %5 = vector.broadcast %4 : vector<1x128xf32> to vector<256x128xf32>
    %6 = arith.mulf %1, %5 : vector<256x128xf32>
    %c0_4 = arith.constant 0 : index
    %c0_5 = arith.constant 0 : index
    %7 = vector.load %arg4[%c0_4, %c0_5] : memref<1x128xf32, #tpu.memory_space<vmem>>, vector<1x128xf32>
    %8 = vector.shape_cast %7 : vector<1x128xf32> to vector<128xf32>
    %9 = vector.shape_cast %8 : vector<128xf32> to vector<1x128xf32>
    %10 = vector.broadcast %9 : vector<1x128xf32> to vector<256x128xf32>
    %11 = arith.addf %6, %10 : vector<256x128xf32>
    %cst = arith.constant 0.000000e+00 : f32
    %12 = vector.broadcast %cst : f32 to vector<256x128xf32>
    %13 = arith.maximumf %11, %12 : vector<256x128xf32>
    %c0_6 = arith.constant 0 : index
    %c0_7 = arith.constant 0 : index
    %c0_8 = arith.constant 0 : index
    %14 = vector.load %arg5[%c0_6, %c0_7, %c0_8] : memref<1x256x128xf32, #tpu.memory_space<vmem>>, vector<1x256x128xf32>
    %15 = vector.shape_cast %14 : vector<1x256x128xf32> to vector<256x128xf32>
    %16 = vector.shape_cast %13 : vector<256x128xf32> to vector<1x256x128xf32>
    tpu.vector_store %arg5[%c0_6, %c0_7, %c0_8], %16 {strides = array<i32>} : memref<1x256x128xf32, #tpu.memory_space<vmem>>, vector<1x256x128xf32>,
    return
  }
  func.func @transform_0(%arg0: i32, %arg1: i32) -> (i32, i32, i32) {
    %c0_i32 = arith.constant 0 : i32
    %c0_i32_0 = arith.constant 0 : i32
    return %arg0, %arg1, %c0_i32 : i32, i32, i32
  }
  func.func @transform_1(%arg0: i32, %arg1: i32) -> (i32, i32) {
    %c0_i32 = arith.constant 0 : i32
    %c0_i32_0 = arith.constant 0 : i32
    %c0_i32_1 = arith.constant 0 : i32
    return %c0_i32, %c0_i32_0 : i32, i32
  }
  func.func @transform_2(%arg0: i32, %arg1: i32) -> (i32, i32) {
    %c0_i32 = arith.constant 0 : i32
    %c0_i32_0 = arith.constant 0 : i32
    %c0_i32_1 = arith.constant 0 : i32
    return %c0_i32, %c0_i32_0 : i32, i32
  }
  func.func @transform_3(%arg0: i32, %arg1: i32) -> (i32, i32, i32) {
    %c0_i32 = arith.constant 0 : i32
    %c0_i32_0 = arith.constant 0 : i32
    return %arg0, %arg1, %c0_i32 : i32, i32, i32
  }
}

</mosaic_0001>

<bundles_post_ra>
// kernel: double_conv.5
= control target key start
LH: loop header
LB: loop body
LE: loop exit
PB: predicated region body
PF: predicated region fallthrough
CT: control target
= control target key end

     0   :  { %s689_s12 = smov 0   ;;  %s691_s13 = smov 0   ;;  %s921_s0 = inlined_call_operand.vmem [shape: f32[2,256,128], index: 0, kind: input, shape index: {}]   ;;  %s922_s1 = inlined_call_operand.vmem [shape: f32[1,128], index: 1, kind: input, shape index: {}]   ;;  %s923_s2 = inlined_call_operand.vmem [shape: f32[1,128], index: 2, kind: input, shape index: {}]   ;;  %s924_s3 = inlined_call_operand.vmem [shape: f32[2,768,128], index: 3, kind: output, shape index: {}]  }
   0x1   :  { %s693_s14 = smov 0   ;;  %s695_s15 = smov 0  }
   0x2   :  { %s697_s16 = smov 0  }
   0x3 LB: > { %s22_s17 = sadd.s32 1, %s658_s14  ;;  %s25_s18 = sadd.s32 1, %s662_s15  ;;  %s666_s16 = sphi %s697_s16, %s13_s16   ;;  %s662_s15 = sphi %s695_s15, %s928_s15   ;;  %s658_s14 = sphi %s693_s14, %s927_s14   ;;  %s654_s13 = sphi %s691_s13, %s926_s13   ;;  %s650_s12 = sphi %s689_s12, %s925_s12  }
   0x4   : > { %p23_p0 = scmp.ge.s32.totalorder %s22_s17, 3  ;;  %p569_p1 = scmp.ge.s32.totalorder %s666_s16, 1 }
   0x5   : > { %p178_p2 = scmp.lt.s32.totalorder %s666_s16, 7 }
   0x6   : > { %s930_s17 = smov (%p23_p0, %s22_s17), 0  ;;  %s932_s18 = smov (!%p23_p0, %s25_s18), %s662_s15 }
   0x7   : > { %p179_p3 = pnand %p569_p1, %p178_p2  ;;  %p27_p4 = scmp.ge.s32.totalorder %s932_s18, 2 }
   0x8   : > { %p221_p5 = scmp.lt.s32.totalorder (!%p179_p3), %s654_s13, 1  ;;  %s579_s19 = sshll.u32 (!%p179_p3), %s650_s12, 5 }
   0x9   : > { %s934_s18 = smov (%p27_p4, %s932_s18), 0  ;;  %182 = sbr.rel (%p179_p3) target bundleno = 72 (0x48), region = 32 }
   0xa   : > { %p238_p6 = scmp.lt.s32.totalorder (!%p179_p3), %s579_s19, 95  ;;  %p245_p7 = scmp.eq.s32.totalorder (!%p179_p3), %s650_s12, 0 }
   0xb   : > { %p246_p8 = scmp.eq.s32.totalorder (!%p179_p3), %s650_s12, 2 }
   0xd   : > { %p247_p9 = por (!%p179_p3), %p246_p8, %p245_p7 }
  0x10   : > { %s936_s13 = smov (!%p221_p5, %s654_s13), 1  ;;  %s938_s19 = smov (!%p238_p6, %s579_s19), 95 }
  0x11   : > { %s585_s20 = sshll.u32 %s936_s13, 8  ;;  %s586_s21 = smul.u32 96, %s936_s13  ;;  %v668_v0 = vmov (%p247_p9), 0.0  }
  0x12   : > { %s726_s24 = scalar_lea.vmem %s921_s0, %s585_s20  ;;  %250 = sbr.rel (!%p247_p9) target bundleno = 38 (0x26), region = 36 }
  0x13   : > { %s241_s25 = sadd.s32 %s586_s21, %s938_s19 }
  0x14   : > { %s580_s26 = sshll.u32 %s241_s25, 3 }
  0x15   : > { %s732_s29 = scalar_lea.vmem %s924_s3, %s580_s26 }
  0x16   : > { %251 = vst [vmem:[%s732_s29] sm:$0xff] (%p247_p9), %v668_v0  ;;  %252 = vst [vmem:[%s732_s29 + $0x8] sm:$0xff] (%p247_p9), %v668_v0 }
  0x17   : > { %253 = vst [vmem:[%s732_s29 + $0x10] sm:$0xff] (%p247_p9), %v668_v0  ;;  %254 = vst [vmem:[%s732_s29 + $0x18] sm:$0xff] (%p247_p9), %v668_v0 }
  0x18   : > { %255 = vst [vmem:[%s732_s29 + $0x20] sm:$0xff] (%p247_p9), %v668_v0  ;;  %256 = vst [vmem:[%s732_s29 + $0x28] sm:$0xff] (%p247_p9), %v668_v0 }
  0x19   : > { %257 = vst [vmem:[%s732_s29 + $0x30] sm:$0xff] %v668_v0  ;;  %258 = vst [vmem:[%s732_s29 + $0x38] sm:$0xff] %v668_v0 }
  0x1a   : > { %259 = vst [vmem:[%s732_s29 + $0x40] sm:$0xff] %v668_v0  ;;  %260 = vst [vmem:[%s732_s29 + $0x48] sm:$0xff] %v668_v0 }
  0x1b   : > { %261 = vst [vmem:[%s732_s29 + $0x50] sm:$0xff] %v668_v0  ;;  %262 = vst [vmem:[%s732_s29 + $0x58] sm:$0xff] %v668_v0 }
  0x1c   : > { %263 = vst [vmem:[%s732_s29 + $0x60] sm:$0xff] %v668_v0  ;;  %264 = vst [vmem:[%s732_s29 + $0x68] sm:$0xff] %v668_v0 }
  0x1d   : > { %265 = vst [vmem:[%s732_s29 + $0x70] sm:$0xff] %v668_v0  ;;  %266 = vst [vmem:[%s732_s29 + $0x78] sm:$0xff] %v668_v0 }
  0x1e   : > { %267 = vst [vmem:[%s732_s29 + $0x80] sm:$0xff] %v668_v0  ;;  %268 = vst [vmem:[%s732_s29 + $0x88] sm:$0xff] %v668_v0 }
  0x1f   : > { %269 = vst [vmem:[%s732_s29 + $0x90] sm:$0xff] %v668_v0  ;;  %270 = vst [vmem:[%s732_s29 + $0x98] sm:$0xff] %v668_v0 }
  0x20   : > { %271 = vst [vmem:[%s732_s29 + $0xa0] sm:$0xff] %v668_v0  ;;  %272 = vst [vmem:[%s732_s29 + $0xa8] sm:$0xff] %v668_v0 }
  0x21   : > { %273 = vst [vmem:[%s732_s29 + $0xb0] sm:$0xff] %v668_v0  ;;  %274 = vst [vmem:[%s732_s29 + $0xb8] sm:$0xff] %v668_v0 }
  0x22   : > { %275 = vst [vmem:[%s732_s29 + $0xc0] sm:$0xff] %v668_v0  ;;  %276 = vst [vmem:[%s732_s29 + $0xc8] sm:$0xff] %v668_v0 }
  0x23   : > { %277 = vst [vmem:[%s732_s29 + $0xd0] sm:$0xff] %v668_v0  ;;  %278 = vst [vmem:[%s732_s29 + $0xd8] sm:$0xff] %v668_v0 }
  0x24   : > { %279 = vst [vmem:[%s732_s29 + $0xe0] sm:$0xff] %v668_v0  ;;  %280 = vst [vmem:[%s732_s29 + $0xe8] sm:$0xff] %v668_v0 }
  0x25   : > { %281 = vst [vmem:[%s732_s29 + $0xf0] sm:$0xff] %v668_v0  ;;  %282 = vst [vmem:[%s732_s29 + $0xf8] sm:$0xff] %v668_v0 }
  0x26 PF: > { %p283_p10 = scmp.ne.s32.totalorder %s650_s12, 0  ;;  %p284_p11 = scmp.ne.s32.totalorder %s650_s12, 2 }
  0x28   : > { %p285_p12 = pnand %p284_p11, %p283_p10 }
  0x29   : > { %v289_v1 = vld [vmem:[%s726_s24] sm:$0xff] (!%p285_p12)  ;;  %v290_v5 = vld [vmem:[%s726_s24 + $0x8] sm:$0xff] (!%p285_p12)  ;;  %v291_v6 = vld [vmem:[%s726_s24 + $0x10] sm:$0xff] (!%p285_p12) }
  0x2a   : > { %288 = sbr.rel (%p285_p12) target bundleno = 72 (0x48), region = 40  ;;  %v772_v2 = vld [vmem:[%s922_s1] ss:$0 sm:$0xff] (!%p285_p12)  ;;  %v292_v7 = vld [vmem:[%s726_s24 + $0x18] sm:$0xff] (!%p285_p12)  ;;  %v294_v12 = vld [vmem:[%s726_s24 + $0x28] sm:$0xff] (!%p285_p12) }
  0x2b   : > { %v777_v3 = vld [vmem:[%s923_s2] ss:$0 sm:$0xff] (!%p285_p12)  ;;  %v328_v4 = vmul.f32 (!%p285_p12), %v772_v2, %v289_v1  ;;  %v329_v8 = vmul.f32 (!%p285_p12), %v772_v2, %v290_v5  ;;  %v330_v9 = vmul.f32 (!%p285_p12), %v772_v2, %v291_v6  ;;  %v331_v10 = vmul.f32 (!%p285_p12), %v772_v2, %v292_v7  ;;  %v295_v13 = vld [vmem:[%s726_s24 + $0x30] sm:$0xff] (!%p285_p12)  ;;  %v296_v18 = vld [vmem:[%s726_s24 + $0x38] sm:$0xff] (!%p285_p12) }
  0x2c   : > { %v293_v11 = vld [vmem:[%s726_s24 + $0x20] sm:$0xff] (!%p285_p12)  ;;  %v333_v16 = vmul.f32 (!%p285_p12), %v772_v2, %v294_v12  ;;  %v334_v17 = vmul.f32 (!%p285_p12), %v772_v2, %v295_v13  ;;  %v335_v22 = vmul.f32 (!%p285_p12), %v772_v2, %v296_v18  ;;  %v298_v28 = vld [vmem:[%s726_s24 + $0x48] sm:$0xff] (!%p285_p12)  ;;  %v299_v29 = vld [vmem:[%s726_s24 + $0x50] sm:$0xff] (!%p285_p12) }
  0x2d   : > { %v367_v14 = vadd.f32 (!%p285_p12), %v777_v3, %v328_v4  ;;  %v332_v15 = vmul.f32 (!%p285_p12), %v772_v2, %v293_v11  ;;  %v368_v19 = vadd.f32 (!%p285_p12), %v777_v3, %v329_v8  ;;  %v369_v20 = vadd.f32 (!%p285_p12), %v777_v3, %v330_v9  ;;  %v297_v23 = vld [vmem:[%s726_s24 + $0x40] sm:$0xff] (!%p285_p12)  ;;  %v300_v30 = vld [vmem:[%s726_s24 + $0x58] sm:$0xff] (!%p285_p12)  ;;  %v302_v36 = vld [vmem:[%s726_s24 + $0x68] sm:$0xff] (!%p285_p12) }
  0x2e   : > { %v370_v21 = vadd.f32 (!%p285_p12), %v777_v3, %v331_v10  ;;  %v372_v26 = vadd.f32 (!%p285_p12), %v777_v3, %v333_v16  ;;  %v373_v27 = vadd.f32 (!%p285_p12), %v777_v3, %v334_v17  ;;  %v374_v34 = vadd.f32 (!%p285_p12), %v777_v3, %v335_v22  ;;  %v301_v35 = vld [vmem:[%s726_s24 + $0x60] sm:$0xff] (!%p285_p12)  ;;  %v303_v37 = vld [vmem:[%s726_s24 + $0x70] sm:$0xff] (!%p285_p12)  ;;  %v304_v42 = vld [vmem:[%s726_s24 + $0x78] sm:$0xff] (!%p285_p12) }
  0x2f   : > { %v399_v24 = vmax.f32 (!%p285_p12), %v367_v14, 0.0  ;;  %v371_v25 = vadd.f32 (!%p285_p12), %v777_v3, %v332_v15  ;;  %v400_v31 = vmax.f32 (!%p285_p12), %v368_v19, 0.0  ;;  %v401_v32 = vmax.f32 (!%p285_p12), %v369_v20, 0.0  ;;  %v305_v55 = vld [vmem:[%s726_s24 + $0x80] sm:$0xff] (!%p285_p12)  ;;  %v306_v60 = vld [vmem:[%s726_s24 + $0x88] sm:$0xff] (!%p285_p12)  ;;  %v307_v61 = vld [vmem:[%s726_s24 + $0x90] sm:$0xff] (!%p285_p12) }
  0x30   : > { %v402_v33 = vmax.f32 (!%p285_p12), %v370_v21, 0.0  ;;  %v404_v39 = vmax.f32 (!%p285_p12), %v372_v26, 0.0  ;;  %v405_v40 = vmax.f32 (!%p285_p12), %v373_v27, 0.0  ;;  %v336_v41 = vmul.f32 (!%p285_p12), %v772_v2, %v297_v23  ;;  %v308_v62 = vld [vmem:[%s726_s24 + $0x98] sm:$0xff] (!%p285_p12)  ;;  %v309_v5 = vld [vmem:[%s726_s24 + $0xa0] sm:$0xff] (!%p285_p12)  ;;  %v310_v6 = vld [vmem:[%s726_s24 + $0xa8] sm:$0xff] (!%p285_p12) }
  0x31   : > { %431 = vst [vmem:[%s732_s29] sm:$0xff] %v399_v24  ;;  %v403_v38 = vmax.f32 %v371_v25, 0.0  ;;  %432 = vst [vmem:[%s732_s29 + $0x8] sm:$0xff] %v400_v31  ;;  %v406_v43 = vmax.f32 %v374_v34, 0.0  ;;  %v337_v44 = vmul.f32 %v772_v2, %v298_v28  ;;  %v338_v45 = vmul.f32 %v772_v2, %v299_v29  ;;  %v311_v7 = vld [vmem:[%s726_s24 + $0xb0] sm:$0xff]  ;;  %v312_v12 = vld [vmem:[%s726_s24 + $0xb8] sm:$0xff] }
  0x32   : > { %433 = vst [vmem:[%s732_s29 + $0x10] sm:$0xff] %v401_v32  ;;  %434 = vst [vmem:[%s732_s29 + $0x18] sm:$0xff] %v402_v33  ;;  %v339_v46 = vmul.f32 %v772_v2, %v300_v30  ;;  %v375_v47 = vadd.f32 %v777_v3, %v336_v41  ;;  %v340_v48 = vmul.f32 %v772_v2, %v301_v35  ;;  %v313_v25 = vld [vmem:[%s726_s24 + $0xc0] sm:$0xff]  ;;  %v314_v30 = vld [vmem:[%s726_s24 + $0xc8] sm:$0xff] }
  0x33   : > { %435 = vst [vmem:[%s732_s29 + $0x20] sm:$0xff] %v403_v38  ;;  %436 = vst [vmem:[%s732_s29 + $0x28] sm:$0xff] %v404_v39  ;;  %v341_v49 = vmul.f32 %v772_v2, %v302_v36  ;;  %v342_v50 = vmul.f32 %v772_v2, %v303_v37  ;;  %v376_v51 = vadd.f32 %v777_v3, %v337_v44  ;;  %v315_v31 = vld [vmem:[%s726_s24 + $0xd0] sm:$0xff]  ;;  %v316_v32 = vld [vmem:[%s726_s24 + $0xd8] sm:$0xff] }
  0x34   : > { %437 = vst [vmem:[%s732_s29 + $0x30] sm:$0xff] %v405_v40  ;;  %438 = vst [vmem:[%s732_s29 + $0x38] sm:$0xff] %v406_v43  ;;  %v377_v52 = vadd.f32 %v777_v3, %v338_v45  ;;  %v378_v53 = vadd.f32 %v777_v3, %v339_v46  ;;  %v343_v54 = vmul.f32 %v772_v2, %v304_v42  ;;  %v407_v56 = vmax.f32 %v375_v47, 0.0  ;;  %v317_v37 = vld [vmem:[%s726_s24 + $0xe0] sm:$0xff]  ;;  %v318_v38 = vld [vmem:[%s726_s24 + $0xe8] sm:$0xff] }
  0x35   : > { %v379_v57 = vadd.f32 %v777_v3, %v340_v48  ;;  %v380_v58 = vadd.f32 %v777_v3, %v341_v49  ;;  %v381_v59 = vadd.f32 %v777_v3, %v342_v50  ;;  %v408_v63 = vmax.f32 %v376_v51, 0.0  ;;  %v319_v39 = vld [vmem:[%s726_s24 + $0xf0] sm:$0xff]  ;;  %v320_v44 = vld [vmem:[%s726_s24 + $0xf8] sm:$0xff] }
  0x36   : > { %v409_v0 = vmax.f32 %v377_v52, 0.0  ;;  %v410_v1 = vmax.f32 %v378_v53, 0.0  ;;  %v382_v4 = vadd.f32 %v777_v3, %v343_v54  ;;  %439 = vst [vmem:[%s732_s29 + $0x40] sm:$0xff] %v407_v56  ;;  %v344_v11 = vmul.f32 %v772_v2, %v305_v55 }
  0x37   : > { %v411_v8 = vmax.f32 %v379_v57, 0.0  ;;  %v412_v9 = vmax.f32 %v380_v58, 0.0  ;;  %v413_v10 = vmax.f32 %v381_v59, 0.0  ;;  %440 = vst [vmem:[%s732_s29 + $0x48] sm:$0xff] %v408_v63  ;;  %v345_v14 = vmul.f32 %v772_v2, %v306_v60 }
  0x38   : > { %441 = vst [vmem:[%s732_s29 + $0x50] sm:$0xff] %v409_v0  ;;  %442 = vst [vmem:[%s732_s29 + $0x58] sm:$0xff] %v410_v1  ;;  %v414_v13 = vmax.f32 %v382_v4, 0.0  ;;  %v346_v15 = vmul.f32 %v772_v2, %v307_v61  ;;  %v347_v16 = vmul.f32 %v772_v2, %v308_v62  ;;  %v383_v17 = vadd.f32 %v777_v3, %v344_v11 }
  0x39   : > { %443 = vst [vmem:[%s732_s29 + $0x60] sm:$0xff] %v411_v8  ;;  %444 = vst [vmem:[%s732_s29 + $0x68] sm:$0xff] %v412_v9  ;;  %v348_v18 = vmul.f32 %v772_v2, %v309_v5  ;;  %v349_v19 = vmul.f32 %v772_v2, %v310_v6  ;;  %v350_v20 = vmul.f32 %v772_v2, %v311_v7 }
  0x3a   : > { %445 = vst [vmem:[%s732_s29 + $0x70] sm:$0xff] %v413_v10  ;;  %446 = vst [vmem:[%s732_s29 + $0x78] sm:$0xff] %v414_v13  ;;  %v384_v21 = vadd.f32 %v777_v3, %v345_v14  ;;  %v385_v22 = vadd.f32 %v777_v3, %v346_v15  ;;  %v386_v23 = vadd.f32 %v777_v3, %v347_v16  ;;  %v415_v26 = vmax.f32 %v383_v17, 0.0 }
  0x3b   : > { %v351_v24 = vmul.f32 %v772_v2, %v312_v12  ;;  %v387_v27 = vadd.f32 %v777_v3, %v348_v18  ;;  %v388_v28 = vadd.f32 %v777_v3, %v349_v19  ;;  %v389_v29 = vadd.f32 %v777_v3, %v350_v20 }
  0x3c   : > { %v416_v33 = vmax.f32 %v384_v21, 0.0  ;;  %v417_v34 = vmax.f32 %v385_v22, 0.0  ;;  %v418_v35 = vmax.f32 %v386_v23, 0.0  ;;  %447 = vst [vmem:[%s732_s29 + $0x80] sm:$0xff] %v415_v26  ;;  %v352_v43 = vmul.f32 %v772_v2, %v313_v25 }
  0x3d   : > { %v390_v36 = vadd.f32 %v777_v3, %v351_v24  ;;  %v419_v40 = vmax.f32 %v387_v27, 0.0  ;;  %v420_v41 = vmax.f32 %v388_v28, 0.0  ;;  %v421_v42 = vmax.f32 %v389_v29, 0.0 }
  0x3e   : > { %448 = vst [vmem:[%s732_s29 + $0x88] sm:$0xff] %v416_v33  ;;  %449 = vst [vmem:[%s732_s29 + $0x90] sm:$0xff] %v417_v34  ;;  %v353_v46 = vmul.f32 %v772_v2, %v314_v30  ;;  %v354_v47 = vmul.f32 %v772_v2, %v315_v31  ;;  %v355_v48 = vmul.f32 %v772_v2, %v316_v32 }
  0x3f   : > { %450 = vst [vmem:[%s732_s29 + $0x98] sm:$0xff] %v418_v35  ;;  %v422_v45 = vmax.f32 %v390_v36, 0.0  ;;  %451 = vst [vmem:[%s732_s29 + $0xa0] sm:$0xff] %v419_v40  ;;  %v391_v49 = vadd.f32 %v777_v3, %v352_v43  ;;  %v356_v50 = vmul.f32 %v772_v2, %v317_v37  ;;  %v357_v51 = vmul.f32 %v772_v2, %v318_v38 }
  0x40   : > { %452 = vst [vmem:[%s732_s29 + $0xa8] sm:$0xff] %v420_v41  ;;  %453 = vst [vmem:[%s732_s29 + $0xb0] sm:$0xff] %v421_v42  ;;  %v358_v52 = vmul.f32 %v772_v2, %v319_v39  ;;  %v392_v53 = vadd.f32 %v777_v3, %v353_v46  ;;  %v393_v54 = vadd.f32 %v777_v3, %v354_v47 }
  0x41   : > { %454 = vst [vmem:[%s732_s29 + $0xb8] sm:$0xff] %v422_v45  ;;  %v394_v55 = vadd.f32 %v777_v3, %v355_v48  ;;  %v359_v56 = vmul.f32 %v772_v2, %v320_v44  ;;  %v423_v57 = vmax.f32 %v391_v49, 0.0  ;;  %v395_v58 = vadd.f32 %v777_v3, %v356_v50 }
  0x42   : > { %v396_v59 = vadd.f32 %v777_v3, %v357_v51  ;;  %v397_v60 = vadd.f32 %v777_v3, %v358_v52  ;;  %v424_v61 = vmax.f32 %v392_v53, 0.0  ;;  %v425_v62 = vmax.f32 %v393_v54, 0.0 }
  0x43   : > { %v426_v63 = vmax.f32 %v394_v55, 0.0  ;;  %v398_v0 = vadd.f32 %v777_v3, %v359_v56  ;;  %455 = vst [vmem:[%s732_s29 + $0xc0] sm:$0xff] %v423_v57  ;;  %v427_v1 = vmax.f32 %v395_v58, 0.0 }
  0x44   : > { %v428_v4 = vmax.f32 %v396_v59, 0.0  ;;  %v429_v2 = vmax.f32 %v397_v60, 0.0  ;;  %456 = vst [vmem:[%s732_s29 + $0xc8] sm:$0xff] %v424_v61  ;;  %457 = vst [vmem:[%s732_s29 + $0xd0] sm:$0xff] %v425_v62 }
  0x45   : > { %458 = vst [vmem:[%s732_s29 + $0xd8] sm:$0xff] %v426_v63  ;;  %v430_v5 = vmax.f32 %v398_v0, 0.0  ;;  %459 = vst [vmem:[%s732_s29 + $0xe0] sm:$0xff] %v427_v1 }
  0x46   : > { %460 = vst [vmem:[%s732_s29 + $0xe8] sm:$0xff] %v428_v4  ;;  %461 = vst [vmem:[%s732_s29 + $0xf0] sm:$0xff] %v429_v2 }
  0x47   : > { %462 = vst [vmem:[%s732_s29 + $0xf8] sm:$0xff] %v430_v5 }
  0x48 PF: > { %s13_s16 = sadd.s32 1, %s666_s16   ;;  %s925_s12 = smov %s658_s14 }
  0x49   : > { %p10_p13 = scmp.ge.s32.totalorder %s13_s16, 8   ;;  %s926_s13 = smov %s662_s15 }
  0x4a   : > { %s927_s14 = smov %s930_s17  ;;  %s928_s15 = smov %s934_s18 }
  0x4b   :  { %12 = sbr.rel (!%p10_p13) target bundleno = 3 (0x3), region = 70 }

// kernel: double_conv.7
= control target key start
LH: loop header
LB: loop body
LE: loop exit
PB: predicated region body
PF: predicated region fallthrough
CT: control target
= control target key end

     0   :  { %s554_s12 = smov 0   ;;  %s556_s13 = smov 0   ;;  %s729_s0 = inlined_call_operand.vmem [shape: f32[2,256,128], index: 0, kind: input, shape index: {}]   ;;  %s730_s1 = inlined_call_operand.vmem [shape: f32[1,128], index: 1, kind: input, shape index: {}]   ;;  %s731_s2 = inlined_call_operand.vmem [shape: f32[1,128], index: 2, kind: input, shape index: {}]   ;;  %s732_s3 = inlined_call_operand.vmem [shape: f32[2,256,128], index: 3, kind: output, shape index: {}]  }
   0x1   :  { %s558_s14 = smov 0  }
   0x2 LB: > { %s25_s15 = sadd.s32 1, %s528_s13  ;;  %p475_p0 = scmp.ge.s32.totalorder %s532_s14, 1  ;;  %s532_s14 = sphi %s558_s14, %s13_s14   ;;  %s528_s13 = sphi %s556_s13, %s734_s13   ;;  %s524_s12 = sphi %s554_s12, %s733_s12  }
   0x3   : > { %p27_p1 = scmp.ge.s32.totalorder %s25_s15, 2  ;;  %p158_p2 = scmp.lt.s32.totalorder %s532_s14, 3 }
   0x5   : > { %s736_s15 = smov (%p27_p1, %s25_s15), 0  ;;  %p159_p3 = pnand %p475_p0, %p158_p2 }
   0x6   : > { %p191_p4 = scmp.lt.s32.totalorder (!%p159_p3), %s524_s12, 1  ;;  %v575_v0 = vld [vmem:[%s730_s1] ss:$0 sm:$0xff] (!%p159_p3) }
   0x7   : > { %162 = sbr.rel (%p159_p3) target bundleno = 47 (0x2f), region = 32  ;;  %v585_v1 = vld [vmem:[%s731_s2] ss:$0 sm:$0xff] (!%p159_p3) }
   0xe   : > { %s738_s12 = smov (!%p191_p4, %s524_s12), 1 }
   0xf   : > { %s484_s16 = sshll.u32 %s738_s12, 8 }
  0x10   : > { %s580_s21 = scalar_lea.vmem %s729_s0, %s484_s16  ;;  %s608_s26 = scalar_lea.vmem %s732_s3, %s484_s16 }
  0x11   : > { %v210_v2 = vld [vmem:[%s580_s21] sm:$0xff]  ;;  %v211_v3 = vld [vmem:[%s580_s21 + $0x8] sm:$0xff]  ;;  %v212_v4 = vld [vmem:[%s580_s21 + $0x10] sm:$0xff] }
  0x12   : > { %v249_v5 = vmul.f32 %v575_v0, %v210_v2  ;;  %v250_v6 = vmul.f32 %v575_v0, %v211_v3  ;;  %v251_v7 = vmul.f32 %v575_v0, %v212_v4  ;;  %v213_v8 = vld [vmem:[%s580_s21 + $0x18] sm:$0xff]  ;;  %v214_v9 = vld [vmem:[%s580_s21 + $0x20] sm:$0xff]  ;;  %v215_v10 = vld [vmem:[%s580_s21 + $0x28] sm:$0xff] }
  0x13   : > { %v252_v11 = vmul.f32 %v575_v0, %v213_v8  ;;  %v253_v12 = vmul.f32 %v575_v0, %v214_v9  ;;  %v254_v13 = vmul.f32 %v575_v0, %v215_v10  ;;  %v216_v14 = vld [vmem:[%s580_s21 + $0x30] sm:$0xff]  ;;  %v217_v15 = vld [vmem:[%s580_s21 + $0x38] sm:$0xff]  ;;  %v218_v24 = vld [vmem:[%s580_s21 + $0x40] sm:$0xff] }
  0x14   : > { %v288_v16 = vadd.f32 %v585_v1, %v249_v5  ;;  %v289_v17 = vadd.f32 %v585_v1, %v250_v6  ;;  %v290_v18 = vadd.f32 %v585_v1, %v251_v7  ;;  %v255_v19 = vmul.f32 %v575_v0, %v216_v14  ;;  %v219_v25 = vld [vmem:[%s580_s21 + $0x48] sm:$0xff]  ;;  %v220_v26 = vld [vmem:[%s580_s21 + $0x50] sm:$0xff]  ;;  %v221_v31 = vld [vmem:[%s580_s21 + $0x58] sm:$0xff] }
  0x15   : > { %v291_v20 = vadd.f32 %v585_v1, %v252_v11  ;;  %v292_v21 = vadd.f32 %v585_v1, %v253_v12  ;;  %v293_v22 = vadd.f32 %v585_v1, %v254_v13  ;;  %v256_v23 = vmul.f32 %v575_v0, %v217_v15  ;;  %v222_v32 = vld [vmem:[%s580_s21 + $0x60] sm:$0xff]  ;;  %v223_v33 = vld [vmem:[%s580_s21 + $0x68] sm:$0xff]  ;;  %v224_v38 = vld [vmem:[%s580_s21 + $0x70] sm:$0xff] }
  0x16   : > { %v320_v27 = vmax.f32 %v288_v16, 0.0  ;;  %v321_v28 = vmax.f32 %v289_v17, 0.0  ;;  %v322_v29 = vmax.f32 %v290_v18, 0.0  ;;  %v294_v30 = vadd.f32 %v585_v1, %v255_v19  ;;  %v225_v43 = vld [vmem:[%s580_s21 + $0x78] sm:$0xff]  ;;  %v226_v56 = vld [vmem:[%s580_s21 + $0x80] sm:$0xff]  ;;  %v227_v57 = vld [vmem:[%s580_s21 + $0x88] sm:$0xff] }
  0x17   : > { %v323_v34 = vmax.f32 %v291_v20, 0.0  ;;  %v324_v35 = vmax.f32 %v292_v21, 0.0  ;;  %v325_v36 = vmax.f32 %v293_v22, 0.0  ;;  %v295_v37 = vadd.f32 %v585_v1, %v256_v23  ;;  %v228_v58 = vld [vmem:[%s580_s21 + $0x90] sm:$0xff]  ;;  %v229_v63 = vld [vmem:[%s580_s21 + $0x98] sm:$0xff]  ;;  %v230_v2 = vld [vmem:[%s580_s21 + $0xa0] sm:$0xff] }
  0x18   : > { %352 = vst [vmem:[%s608_s26] sm:$0xff] %v320_v27  ;;  %353 = vst [vmem:[%s608_s26 + $0x8] sm:$0xff] %v321_v28  ;;  %v326_v39 = vmax.f32 %v294_v30, 0.0  ;;  %v257_v40 = vmul.f32 %v575_v0, %v218_v24  ;;  %v258_v41 = vmul.f32 %v575_v0, %v219_v25  ;;  %v259_v42 = vmul.f32 %v575_v0, %v220_v26  ;;  %v231_v3 = vld [vmem:[%s580_s21 + $0xa8] sm:$0xff]  ;;  %v232_v8 = vld [vmem:[%s580_s21 + $0xb0] sm:$0xff] }
  0x19   : > { %354 = vst [vmem:[%s608_s26 + $0x10] sm:$0xff] %v322_v29  ;;  %355 = vst [vmem:[%s608_s26 + $0x18] sm:$0xff] %v323_v34  ;;  %v327_v44 = vmax.f32 %v295_v37, 0.0  ;;  %v260_v45 = vmul.f32 %v575_v0, %v221_v31  ;;  %v261_v46 = vmul.f32 %v575_v0, %v222_v32  ;;  %v262_v47 = vmul.f32 %v575_v0, %v223_v33  ;;  %v233_v13 = vld [vmem:[%s580_s21 + $0xb8] sm:$0xff]  ;;  %v234_v26 = vld [vmem:[%s580_s21 + $0xc0] sm:$0xff] }
  0x1a   : > { %356 = vst [vmem:[%s608_s26 + $0x20] sm:$0xff] %v324_v35  ;;  %357 = vst [vmem:[%s608_s26 + $0x28] sm:$0xff] %v325_v36  ;;  %v296_v48 = vadd.f32 %v585_v1, %v257_v40  ;;  %v297_v49 = vadd.f32 %v585_v1, %v258_v41  ;;  %v298_v50 = vadd.f32 %v585_v1, %v259_v42  ;;  %v235_v27 = vld [vmem:[%s580_s21 + $0xc8] sm:$0xff]  ;;  %v236_v28 = vld [vmem:[%s580_s21 + $0xd0] sm:$0xff] }
  0x1b   : > { %358 = vst [vmem:[%s608_s26 + $0x30] sm:$0xff] %v326_v39  ;;  %v263_v51 = vmul.f32 %v575_v0, %v224_v38  ;;  %359 = vst [vmem:[%s608_s26 + $0x38] sm:$0xff] %v327_v44  ;;  %v299_v52 = vadd.f32 %v585_v1, %v260_v45  ;;  %v300_v53 = vadd.f32 %v585_v1, %v261_v46  ;;  %v237_v33 = vld [vmem:[%s580_s21 + $0xd8] sm:$0xff]  ;;  %v238_v34 = vld [vmem:[%s580_s21 + $0xe0] sm:$0xff] }
  0x1c   : > { %v301_v54 = vadd.f32 %v585_v1, %v262_v47  ;;  %v264_v55 = vmul.f32 %v575_v0, %v225_v43  ;;  %v328_v59 = vmax.f32 %v296_v48, 0.0  ;;  %v329_v60 = vmax.f32 %v297_v49, 0.0  ;;  %v239_v35 = vld [vmem:[%s580_s21 + $0xe8] sm:$0xff]  ;;  %v240_v40 = vld [vmem:[%s580_s21 + $0xf0] sm:$0xff]  ;;  %v241_v45 = vld [vmem:[%s580_s21 + $0xf8] sm:$0xff] }
  0x1d   : > { %v330_v61 = vmax.f32 %v298_v50, 0.0  ;;  %v302_v62 = vadd.f32 %v585_v1, %v263_v51  ;;  %v331_v4 = vmax.f32 %v299_v52, 0.0  ;;  %v332_v5 = vmax.f32 %v300_v53, 0.0 }
  0x1e   : > { %v333_v6 = vmax.f32 %v301_v54, 0.0  ;;  %v303_v7 = vadd.f32 %v585_v1, %v264_v55  ;;  %360 = vst [vmem:[%s608_s26 + $0x40] sm:$0xff] %v328_v59  ;;  %361 = vst [vmem:[%s608_s26 + $0x48] sm:$0xff] %v329_v60  ;;  %v265_v10 = vmul.f32 %v575_v0, %v226_v56  ;;  %v266_v11 = vmul.f32 %v575_v0, %v227_v57 }
  0x1f   : > { %362 = vst [vmem:[%s608_s26 + $0x50] sm:$0xff] %v330_v61  ;;  %v334_v9 = vmax.f32 %v302_v62, 0.0  ;;  %v267_v12 = vmul.f32 %v575_v0, %v228_v58  ;;  %363 = vst [vmem:[%s608_s26 + $0x58] sm:$0xff] %v331_v4  ;;  %v268_v15 = vmul.f32 %v575_v0, %v229_v63  ;;  %v269_v16 = vmul.f32 %v575_v0, %v230_v2 }
  0x20   : > { %364 = vst [vmem:[%s608_s26 + $0x60] sm:$0xff] %v332_v5  ;;  %365 = vst [vmem:[%s608_s26 + $0x68] sm:$0xff] %v333_v6  ;;  %v335_v14 = vmax.f32 %v303_v7, 0.0  ;;  %v270_v17 = vmul.f32 %v575_v0, %v231_v3  ;;  %v304_v18 = vadd.f32 %v585_v1, %v265_v10  ;;  %v305_v19 = vadd.f32 %v585_v1, %v266_v11 }
  0x21   : > { %366 = vst [vmem:[%s608_s26 + $0x70] sm:$0xff] %v334_v9  ;;  %v306_v20 = vadd.f32 %v585_v1, %v267_v12  ;;  %v271_v21 = vmul.f32 %v575_v0, %v232_v8  ;;  %v307_v22 = vadd.f32 %v585_v1, %v268_v15  ;;  %v308_v23 = vadd.f32 %v585_v1, %v269_v16 }
  0x22   : > { %367 = vst [vmem:[%s608_s26 + $0x78] sm:$0xff] %v335_v14  ;;  %v309_v24 = vadd.f32 %v585_v1, %v270_v17  ;;  %v272_v25 = vmul.f32 %v575_v0, %v233_v13  ;;  %v336_v29 = vmax.f32 %v304_v18, 0.0  ;;  %v337_v30 = vmax.f32 %v305_v19, 0.0 }
  0x23   : > { %v338_v31 = vmax.f32 %v306_v20, 0.0  ;;  %v310_v32 = vadd.f32 %v585_v1, %v271_v21  ;;  %v339_v36 = vmax.f32 %v307_v22, 0.0  ;;  %v340_v37 = vmax.f32 %v308_v23, 0.0 }
  0x24   : > { %v341_v38 = vmax.f32 %v309_v24, 0.0  ;;  %v311_v39 = vadd.f32 %v585_v1, %v272_v25  ;;  %368 = vst [vmem:[%s608_s26 + $0x80] sm:$0xff] %v336_v29  ;;  %369 = vst [vmem:[%s608_s26 + $0x88] sm:$0xff] %v337_v30  ;;  %v273_v42 = vmul.f32 %v575_v0, %v234_v26  ;;  %v274_v43 = vmul.f32 %v575_v0, %v235_v27 }
  0x25   : > { %370 = vst [vmem:[%s608_s26 + $0x90] sm:$0xff] %v338_v31  ;;  %v342_v41 = vmax.f32 %v310_v32, 0.0  ;;  %v275_v44 = vmul.f32 %v575_v0, %v236_v28  ;;  %371 = vst [vmem:[%s608_s26 + $0x98] sm:$0xff] %v339_v36  ;;  %v276_v47 = vmul.f32 %v575_v0, %v237_v33  ;;  %v277_v48 = vmul.f32 %v575_v0, %v238_v34 }
  0x26   : > { %372 = vst [vmem:[%s608_s26 + $0xa0] sm:$0xff] %v340_v37  ;;  %373 = vst [vmem:[%s608_s26 + $0xa8] sm:$0xff] %v341_v38  ;;  %v343_v46 = vmax.f32 %v311_v39, 0.0  ;;  %v278_v49 = vmul.f32 %v575_v0, %v239_v35  ;;  %v312_v50 = vadd.f32 %v585_v1, %v273_v42  ;;  %v313_v51 = vadd.f32 %v585_v1, %v274_v43 }
  0x27   : > { %374 = vst [vmem:[%s608_s26 + $0xb0] sm:$0xff] %v342_v41  ;;  %v314_v52 = vadd.f32 %v585_v1, %v275_v44  ;;  %v279_v53 = vmul.f32 %v575_v0, %v240_v40  ;;  %v315_v54 = vadd.f32 %v585_v1, %v276_v47  ;;  %v316_v55 = vadd.f32 %v585_v1, %v277_v48 }
  0x28   : > { %375 = vst [vmem:[%s608_s26 + $0xb8] sm:$0xff] %v343_v46  ;;  %v317_v56 = vadd.f32 %v585_v1, %v278_v49  ;;  %v280_v57 = vmul.f32 %v575_v0, %v241_v45  ;;  %v344_v58 = vmax.f32 %v312_v50, 0.0  ;;  %v345_v59 = vmax.f32 %v313_v51, 0.0 }
  0x29   : > { %v346_v60 = vmax.f32 %v314_v52, 0.0  ;;  %v318_v61 = vadd.f32 %v585_v1, %v279_v53  ;;  %v347_v62 = vmax.f32 %v315_v54, 0.0  ;;  %v348_v63 = vmax.f32 %v316_v55, 0.0 }
  0x2a   : > { %v349_v2 = vmax.f32 %v317_v56, 0.0  ;;  %v319_v3 = vadd.f32 %v585_v1, %v280_v57  ;;  %376 = vst [vmem:[%s608_s26 + $0xc0] sm:$0xff] %v344_v58  ;;  %377 = vst [vmem:[%s608_s26 + $0xc8] sm:$0xff] %v345_v59 }
  0x2b   : > { %378 = vst [vmem:[%s608_s26 + $0xd0] sm:$0xff] %v346_v60  ;;  %v350_v4 = vmax.f32 %v318_v61, 0.0  ;;  %379 = vst [vmem:[%s608_s26 + $0xd8] sm:$0xff] %v347_v62 }
  0x2c   : > { %380 = vst [vmem:[%s608_s26 + $0xe0] sm:$0xff] %v348_v63  ;;  %381 = vst [vmem:[%s608_s26 + $0xe8] sm:$0xff] %v349_v2  ;;  %v351_v0 = vmax.f32 %v319_v3, 0.0 }
  0x2d   : > { %382 = vst [vmem:[%s608_s26 + $0xf0] sm:$0xff] %v350_v4 }
  0x2e   : > { %383 = vst [vmem:[%s608_s26 + $0xf8] sm:$0xff] %v351_v0 }
  0x2f PF: > { %s13_s14 = sadd.s32 1, %s532_s14   ;;  %s733_s12 = smov %s528_s13 }
  0x30   : > { %p10_p5 = scmp.ge.s32.totalorder %s13_s14, 4   ;;  %s734_s13 = smov %s736_s15 }
  0x32   :  { %12 = sbr.rel (!%p10_p5) target bundleno = 2 (0x2), region = 62 }

// kernel: double_conv.6
= control target key start
LH: loop header
LB: loop body
LE: loop exit
PB: predicated region body
PF: predicated region fallthrough
CT: control target
= control target key end

     0   :  { %s7104_s15 = smov 0   ;;  %s7106_s16 = smov 0   ;;  %s8650_s0 = inlined_call_operand.vmem [shape: f32[2,768,128], index: 0, kind: input, shape index: {}]   ;;  %s8651_s1 = inlined_call_operand.vmem [shape: f32[9,128,128], index: 1, kind: input, shape index: {}]   ;;  %s8652_s2 = inlined_call_operand.vmem [shape: f32[1,128], index: 2, kind: input, shape index: {}]   ;;  %s8653_s3 = inlined_call_operand.vmem [shape: f32[2,256,128], index: 3, kind: output, shape index: {0}]   ;;  %s8654_s4 = inlined_call_operand.vmem [shape: f32[2,1,2,128], index: 4, kind: output, shape index: {1}]  }
   0x1   :  { %s7108_s17 = smov 0  }
   0x2 LB: > { %s27_s18 = sadd.s32 1, %s7073_s16  ;;  %p4765_p0 = scmp.ge.s32.totalorder %s7077_s17, 1  ;;  %s7077_s17 = sphi %s7108_s17, %s15_s17   ;;  %s7073_s16 = sphi %s7106_s16, %s8967_s16   ;;  %s7069_s15 = sphi %s7104_s15, %s8966_s15  }
   0x3   : > { %p29_p1 = scmp.ge.s32.totalorder %s27_s18, 2  ;;  %p181_p2 = scmp.lt.s32.totalorder %s7077_s17, 3 }
   0x5   : > { %s8969_s18 = smov (%p29_p1, %s27_s18), 0  ;;  %p182_p3 = pnand %p4765_p0, %p181_p2 }
   0x7   : > { %185 = sbr.rel (%p182_p3) target bundleno = 570 (0x23a), region = 32 }
   0xe   : > { %v926_v0 = vld [vmem:[%s8651_s1] sm:$0xff]  ;;  %v927_v1 = vld [vmem:[%s8651_s1 + $0x8] sm:$0xff]  ;;  %p218_p4 = scmp.lt.s32.totalorder %s7069_s15, 1  ;;  %v240_v3 = vlaneseq  ;;  %v928_v6 = vld [vmem:[%s8651_s1 + $0x10] sm:$0xff] }
   0xf   : > { %v5027_v2 = vld [vmem:[%s8651_s1 + $0x200] sm:$0xff]  ;;  %v6438_v4 = vpack.c.bf16 %v927_v1, %v926_v0  ;;  %v5028_v5 = vld [vmem:[%s8651_s1 + $0x208] sm:$0xff]  ;;  %v929_v7 = vld [vmem:[%s8651_s1 + $0x18] sm:$0xff] }
  0x10   : > { %v7140_v8 = vpack.c.bf16 %v5028_v5, %v5027_v2  ;;  %v6442_v9 = vpack.c.bf16 %v929_v7, %v928_v6  ;;  %v5029_v10 = vld [vmem:[%s8651_s1 + $0x210] sm:$0xff]  ;;  %v5030_v11 = vld [vmem:[%s8651_s1 + $0x218] sm:$0xff]  ;;  %v930_v12 = vld [vmem:[%s8651_s1 + $0x20] sm:$0xff]  ;;  %s8971_s15 = smov (!%p218_p4, %s7069_s15), 1  ;;  %v7153_v13 = vshrl.u32 %v240_v3, 7 }
  0x11   : > { %6439 = vmatprep.subr.bf16.mxu1 %v6438_v4  ;;  %v7155_v14 = vpack.c.bf16 %v5030_v11, %v5029_v10  ;;  %v931_v15 = vld [vmem:[%s8651_s1 + $0x28] sm:$0xff]  ;;  %v5031_v16 = vld [vmem:[%s8651_s1 + $0x220] sm:$0xff]  ;;  %s7030_s21 = smul.u32 768, %s8971_s15  ;;  %v932_v21 = vld [vmem:[%s8651_s1 + $0x30] sm:$0xff]  ;;  %s5285_s12 = sshll.u32 %s8971_s15, 8 }
  0x12   : > { %8763 = vst [vmem:[#allocation3_spill] sm:$0xff] %v7140_v8  ;;  %v5032_v17 = vld [vmem:[%s8651_s1 + $0x228] sm:$0xff]  ;;  %6567 = vmatprep.subr.bf16.mxu0 %v7140_v8  ;;  %6441 = vmatpush3.bf16.msra.mxu1 %v6438_v4  ;;  %v277_v18 = vand.u32 15, %v7153_v13  ;;  %v6446_v19 = vpack.c.bf16 %v931_v15, %v930_v12  ;;  %v933_v22 = vld [vmem:[%s8651_s1 + $0x38] sm:$0xff]  ;;  %v5033_v23 = vld [vmem:[%s8651_s1 + $0x230] sm:$0xff]  ;;  %v243_v56 = vadd.s32 16, %v7153_v13  ;;  %s8567_s19 = scalar_lea.vmem %s8653_s3, %s5285_s12 }
  0x13   : > { %8764 = vst [vmem:[#allocation4_spill] sm:$0xff] %v7155_v14  ;;  %6569 = vmatpush3.bf16.msra.mxu0 %v7140_v8  ;;  %6443 = vmatprep.subr.bf16.mxu1 %v6442_v9  ;;  %v7171_v20 = vpack.c.bf16 %v5032_v17, %v5031_v16  ;;  %v5034_v24 = vld [vmem:[%s8651_s1 + $0x238] sm:$0xff]  ;;  %s7188_s6 = scalar_lea.vmem %s8650_s0, %s7030_s21  ;;  %v6450_v26 = vpack.c.bf16 %v933_v22, %v932_v21  ;;  %v934_v28 = vld [vmem:[%s8651_s1 + $0x40] sm:$0xff]  ;;  %v935_v29 = vld [vmem:[%s8651_s1 + $0x48] sm:$0xff]  ;;  %v245_v60 = vadd.s32 32, %v7153_v13  ;;  %v247_v6 = vadd.s32 48, %v7153_v13 }
  0x14   : > { %6571 = vmatprep.subr.bf16.mxu0 %v7155_v14  ;;  %vm7190_vm0 = vcmp.ne.s32.totalorder %v277_v18, 0  ;;  %v7196_v27 = vpack.c.bf16 %v5034_v24, %v5033_v23  ;;  %v4771_v30 = vld [vmem:[%s7188_s6 + $0xef] sm:$0xff]  ;;  %v5035_v31 = vld [vmem:[%s8651_s1 + $0x240] sm:$0xff]  ;;  %v6454_v34 = vpack.c.bf16 %v935_v29, %v934_v28  ;;  %v937_v37 = vld [vmem:[%s8651_s1 + $0x58] sm:$0xff]  ;;  %v291_v62 = vand.u32 15, %v243_v56  ;;  %s4769_s20 = sshll.u32 %s8971_s15, 1 }
  0x15   : > { %8765 = vst [vmem:[#allocation5_spill] sm:$0xff] %v7171_v20  ;;  %v5036_v32 = vld [vmem:[%s8651_s1 + $0x248] sm:$0xff]  ;;  %5750 = vmatprep.mubr.msk.f32.mxu1 %vm7190_vm0, %v4771_v30  ;;  %v7214_v33 = vld [vmem:[%s7188_s6 + $0x100] sm:$0xff]  ;;  %v936_v36 = vld [vmem:[%s8651_s1 + $0x50] sm:$0xff]  ;;  %v305_v5 = vand.u32 15, %v245_v60  ;;  %v319_v24 = vand.u32 15, %v247_v6  ;;  %s239_s23 = scalar_lea.vmem %s8654_s4, %s4769_s20 }
  0x16   : > { %6445 = vmatpush3.bf16.msra.mxu1 %v6442_v9  ;;  %8768 = vst [vmem:[#allocation6_spill] sm:$0xff] %v7196_v27  ;;  %6070 = vmatprep.mubr.f32.mxu0 %v7214_v33  ;;  %v7219_v35 = vpack.c.bf16 %v5036_v32, %v5035_v31  ;;  %v5037_v38 = vld [vmem:[%s8651_s1 + $0x250] sm:$0xff]  ;;  %v5038_v39 = vld [vmem:[%s8651_s1 + $0x258] sm:$0xff]  ;;  %v6458_v40 = vpack.c.bf16 %v937_v37, %v936_v36  ;;  %v938_v42 = vld [vmem:[%s8651_s1 + $0x60] sm:$0xff]  ;;  %vm7303_vm1 = vcmp.ne.s32.totalorder %v291_v62, 0 }
  0x17   : > { %6573 = vmatpush3.bf16.msra.mxu0 %v7155_v14  ;;  %6447 = vmatprep.subr.bf16.mxu1 %v6446_v19  ;;  %v7235_v41 = vpack.c.bf16 %v5038_v39, %v5037_v38  ;;  %v939_v43 = vld [vmem:[%s8651_s1 + $0x68] sm:$0xff]  ;;  %v5039_v44 = vld [vmem:[%s8651_s1 + $0x260] sm:$0xff]  ;;  %v940_v48 = vld [vmem:[%s8651_s1 + $0x70] sm:$0xff]  ;;  %vm7330_vm2 = vcmp.ne.s32.totalorder %v305_v5, 0  ;;  %vm7365_vm3 = vcmp.ne.s32.totalorder %v319_v24, 0  ;;  %v265_v14 = vadd.s32 192, %v7153_v13 }
  0x18   : > { %6575 = vmatprep.subr.bf16.mxu0 %v7171_v20  ;;  %8769 = vst [vmem:[#allocation7_spill] sm:$0xff] %v7219_v35  ;;  %v5040_v45 = vld [vmem:[%s8651_s1 + $0x268] sm:$0xff]  ;;  %v6462_v46 = vpack.c.bf16 %v939_v43, %v938_v42  ;;  %v941_v49 = vld [vmem:[%s8651_s1 + $0x78] sm:$0xff]  ;;  %v5041_v50 = vld [vmem:[%s8651_s1 + $0x270] sm:$0xff]  ;;  %v251_v43 = vadd.s32 80, %v7153_v13 }
  0x19   : > { %8770 = vst [vmem:[#allocation8_spill] sm:$0xff] %v7235_v41  ;;  %v7251_v47 = vpack.c.bf16 %v5040_v45, %v5039_v44  ;;  %v5042_v51 = vld [vmem:[%s8651_s1 + $0x278] sm:$0xff]  ;;  %v6466_v52 = vpack.c.bf16 %v941_v49, %v940_v48  ;;  %v4851_v54 = vld [vmem:[%s8651_s1 + $0x80] sm:$0xff]  ;;  %v4852_v55 = vld [vmem:[%s8651_s1 + $0x88] sm:$0xff] }
  0x1a   : > { %6449 = vmatpush3.bf16.msra.mxu1 %v6446_v19  ;;  %v7267_v53 = vpack.c.bf16 %v5042_v51, %v5041_v50  ;;  %v5075_v57 = vld [vmem:[%s8651_s1 + $0x280] sm:$0xff]  ;;  %v5076_v58 = vld [vmem:[%s8651_s1 + $0x288] sm:$0xff]  ;;  %v6470_v59 = vpack.c.bf16 %v4852_v55, %v4851_v54  ;;  %v5077_v63 = vld [vmem:[%s8651_s1 + $0x290] sm:$0xff] }
  0x1b   : > { %6577 = vmatpush3.bf16.msra.mxu0 %v7171_v20  ;;  %6451 = vmatprep.subr.bf16.mxu1 %v6450_v26  ;;  %8771 = vst [vmem:[#allocation9_spill] sm:$0xff] %v7251_v47  ;;  %v6598_v61 = vpack.c.bf16 %v5076_v58, %v5075_v57  ;;  %v5078_v0 = vld [vmem:[%s8651_s1 + $0x298] sm:$0xff]  ;;  %v4853_v2 = vld [vmem:[%s8651_s1 + $0x90] sm:$0xff]  ;;  %v7300_v4 = vld [vmem:[%s7188_s6 + $0x108] sm:$0xff]  ;;  %v347_v57 = vand.u32 15, %v251_v43  ;;  %v253_v58 = vadd.s32 96, %v7153_v13 }
  0x1c   : > { %6579 = vmatprep.subr.bf16.mxu0 %v7196_v27  ;;  %8772 = vst [vmem:[#allocation10_spill] sm:$0xff] %v7267_v53  ;;  %v4772_v1 = vld [vmem:[%s7188_s6 + $0xf7] sm:$0xff]  ;;  %v4773_v9 = vld [vmem:[%s7188_s6 + $0xff] sm:$0xff]  ;;  %v6602_v10 = vpack.c.bf16 %v5078_v0, %v5077_v63  ;;  %v5080_v16 = vld [vmem:[%s8651_s1 + $0x2a8] sm:$0xff] }
  0x1d   : > { %v4854_v3 = vld [vmem:[%s8651_s1 + $0x98] sm:$0xff]  ;;  %v7309_v11 = vld [vmem:[%s7188_s6 + $0x110] sm:$0xff]  ;;  %v5079_v15 = vld [vmem:[%s8651_s1 + $0x2a0] sm:$0xff]  ;;  %vm7435_vm5 = vcmp.ne.s32.totalorder %v347_v57, 0 }
  0x1e   : > { %6453 = vmatpush3.bf16.msra.mxu1 %v6450_v26  ;;  %v6474_v12 = vpack.c.bf16 %v4854_v3, %v4853_v2  ;;  %v4774_v17 = vld [vmem:[%s7188_s6 + $0x107] sm:$0xff]  ;;  %v7328_v21 = vld [vmem:[%s7188_s6 + $0x118] sm:$0xff]  ;;  %v7335_v23 = vld [vmem:[%s7188_s6 + $0x10f] sm:$0xff]  ;;  %v249_v26 = vadd.s32 64, %v7153_v13  ;;  %v6606_v29 = vpack.c.bf16 %v5080_v16, %v5079_v15 }
  0x1f   : > { %6581 = vmatpush3.bf16.msra.mxu0 %v7196_v27  ;;  %6455 = vmatprep.subr.bf16.mxu1 %v6454_v34  ;;  %v4855_v18 = vld [vmem:[%s8651_s1 + $0xa0] sm:$0xff]  ;;  %v4856_v19 = vld [vmem:[%s8651_s1 + $0xa8] sm:$0xff]  ;;  %v5081_v30 = vld [vmem:[%s8651_s1 + $0x2b0] sm:$0xff] }
  0x20   : > { %6583 = vmatprep.subr.bf16.mxu0 %v7219_v35  ;;  %v7340_v28 = vld [vmem:[%s7188_s6 + $0x120] sm:$0xff]  ;;  %v5082_v31 = vld [vmem:[%s8651_s1 + $0x2b8] sm:$0xff]  ;;  %v6478_v32 = vpack.c.bf16 %v4856_v19, %v4855_v18  ;;  %v4857_v36 = vld [vmem:[%s8651_s1 + $0xb0] sm:$0xff]  ;;  %v333_v42 = vand.u32 15, %v249_v26 }
  0x21   : > { %v4858_v37 = vld [vmem:[%s8651_s1 + $0xb8] sm:$0xff]  ;;  %v7363_v38 = vld [vmem:[%s7188_s6 + $0x128] sm:$0xff]  ;;  %v7374_v44 = vld [vmem:[%s7188_s6 + $0x130] sm:$0xff]  ;;  %v6610_v45 = vpack.c.bf16 %v5082_v31, %v5081_v30 }
  0x22   : > { %6457 = vmatpush3.bf16.msra.mxu1 %v6454_v34  ;;  %v7353_v34 = vld [vmem:[%s7188_s6 + $0x117] sm:$0xff]  ;;  %v5084_v48 = vld [vmem:[%s8651_s1 + $0x2c8] sm:$0xff]  ;;  %v6482_v49 = vpack.c.bf16 %v4858_v37, %v4857_v36  ;;  %v4859_v51 = vld [vmem:[%s8651_s1 + $0xc0] sm:$0xff]  ;;  %vm7400_vm4 = vcmp.ne.s32.totalorder %v333_v42, 0  ;;  %v257_v36 = vadd.s32 128, %v7153_v13 }
  0x23   : > { %6585 = vmatpush3.bf16.msra.mxu0 %v7219_v35  ;;  %6459 = vmatprep.subr.bf16.mxu1 %v6458_v40  ;;  %v7388_v50 = vld [vmem:[%s7188_s6 + $0x127] sm:$0xff]  ;;  %v7398_v54 = vld [vmem:[%s7188_s6 + $0x138] sm:$0xff]  ;;  %v7405_v56 = vld [vmem:[%s7188_s6 + $0x12f] sm:$0xff]  ;;  %v8801_v35 = vmov 0 }
  0x24   : > { %6587 = vmatprep.subr.bf16.mxu0 %v7235_v41  ;;  %v5086_v62 = vld [vmem:[%s8651_s1 + $0x2d8] sm:$0xff]  ;;  %v7433_v3 = vld [vmem:[%s7188_s6 + $0x148] sm:$0xff]  ;;  %v5087_v16 = vld [vmem:[%s8651_s1 + $0x2e0] sm:$0xff] }
  0x25   : > { %v7423_v0 = vld [vmem:[%s7188_s6 + $0x137] sm:$0xff]  ;;  %v7440_v6 = vld [vmem:[%s7188_s6 + $0x13f] sm:$0xff]  ;;  %v7458_v19 = vld [vmem:[%s7188_s6 + $0x147] sm:$0xff] }
  0x26   : > { %6461 = vmatpush3.bf16.msra.mxu1 %v6458_v40  ;;  %v7370_v40 = vld [vmem:[%s7188_s6 + $0x11f] sm:$0xff]  ;;  %v4864_v26 = vld [vmem:[%s8651_s1 + $0xe8] sm:$0xff]  ;;  %v5089_v43 = vld [vmem:[%s8651_s1 + $0x2f0] sm:$0xff] }
  0x27   : > { %6589 = vmatpush3.bf16.msra.mxu0 %v7235_v41  ;;  %6463 = vmatprep.subr.bf16.mxu1 %v6462_v46  ;;  %v4862_v2 = vld [vmem:[%s8651_s1 + $0xd8] sm:$0xff]  ;;  %v4863_v24 = vld [vmem:[%s8651_s1 + $0xe0] sm:$0xff]  ;;  %v7475_v31 = vld [vmem:[%s7188_s6 + $0x14f] sm:$0xff] }
  0x28   : > { %6591 = vmatprep.subr.bf16.mxu0 %v7251_v47  ;;  %v7479_v37 = vld [vmem:[%s7188_s6 + $0x160] sm:$0xff]  ;;  %v7504_v57 = vld [vmem:[%s7188_s6 + $0x168] sm:$0xff]  ;;  %v4942_v55 = vld [vmem:[%s7188_s6 + $0x157] sm:$0xff] }
  0x29   : > { %v7613_v41 = vld [vmem:[%s7188_s6 + $0x119] sm:$0xff]  ;;  %v7620_v27 = vld [vmem:[%s7188_s6 + $0x18f] sm:$0xff]  ;;  %v7624_v8 = vld [vmem:[%s7188_s6 + $0x121] sm:$0xff] }
  0x2a   : > { %6465 = vmatpush3.bf16.msra.mxu1 %v6462_v46  ;;  %v5083_v46 = vld [vmem:[%s8651_s1 + $0x2c0] sm:$0xff]  ;;  %8800 = vst [vmem:[#allocation16_spill] sm:$0xff] %v7613_v41  ;;  %8804 = vst [vmem:[#allocation18_spill] sm:$0xff] %v7624_v8  ;;  %v4937_v7 = vld [vmem:[%s7188_s6 + $0x12f] sm:$0xff] }
  0x2b   : > { %6593 = vmatpush3.bf16.msra.mxu0 %v7251_v47  ;;  %6467 = vmatprep.subr.bf16.mxu1 %v6466_v52  ;;  %v6614_v60 = vpack.c.bf16 %v5084_v48, %v5083_v46  ;;  %v6494_v46 = vpack.c.bf16 %v4864_v26, %v4863_v24  ;;  %v7493_v48 = vld [vmem:[%s7188_s6 + $0x157] sm:$0xff]  ;;  %v4900_v24 = vld [vmem:[%s8651_s1 + $0x108] sm:$0xff]  ;;  %v246_v47 = vadd.s32 40, %v7153_v13  ;;  %v4935_v25 = vld [vmem:[%s7188_s6 + $0x11f] sm:$0xff] }
  0x2c   : > { %6595 = vmatprep.subr.bf16.mxu0 %v7267_v53  ;;  %v7540_v26 = vld [vmem:[%s7188_s6 + $0x178] sm:$0xff]  ;;  %v4941_v39 = vld [vmem:[%s7188_s6 + $0x14f] sm:$0xff]  ;;  %v4944_v5 = vld [vmem:[%s7188_s6 + $0x167] sm:$0xff] }
  0x2d   : > { %v312_v20 = vand.u32 15, %v246_v47  ;;  %v5146_v47 = vld [vmem:[%s8651_s1 + $0x338] sm:$0xff] }
  0x2e   : > { %6469 = vmatpush3.bf16.msra.mxu1 %v6466_v52  ;;  %v4860_v52 = vld [vmem:[%s8651_s1 + $0xc8] sm:$0xff]  ;;  %v4939_v22 = vld [vmem:[%s7188_s6 + $0x13f] sm:$0xff]  ;;  %v4946_v30 = vld [vmem:[%s7188_s6 + $0x177] sm:$0xff] }
  0x2f   : > { %6597 = vmatpush3.bf16.msra.mxu0 %v7267_v53  ;;  %6471 = vmatprep.subr.bf16.mxu1 %v6470_v59  ;;  %v6486_v63 = vpack.c.bf16 %v4860_v52, %v4859_v51  ;;  %v4865_v51 = vld [vmem:[%s8651_s1 + $0xf0] sm:$0xff]  ;;  %v4866_v52 = vld [vmem:[%s8651_s1 + $0xf8] sm:$0xff]  ;;  %vm7644_vm13 = vcmp.ne.s32.totalorder %v312_v20, 15 }
  0x30   : > { %6599 = vmatprep.subr.bf16.mxu0 %v6598_v61 }
  0x31   : > { %5751 = vmatmul.mubr.f32.vlgmr.msra.gmra.mrb[0].mxu1 %v4772_v1  ;;  %v4861_v1 = vld [vmem:[%s8651_s1 + $0xd0] sm:$0xff] }
  0x32   : > { %6071 = vmatmul.mubr.f32.vlgmr.msra.gmra.mrb[0].mxu0 %v7300_v4  ;;  %6473 = vmatpush3.bf16.msra.mxu1 %v6470_v59  ;;  %v7409_v59 = vld [vmem:[%s7188_s6 + $0x140] sm:$0xff]  ;;  %v6490_v18 = vpack.c.bf16 %v4862_v2, %v4861_v1 }
  0x33   : > { %6601 = vmatpush3.bf16.msra.mxu0 %v6598_v61  ;;  %5753 = vmatprep.mubr.msk.f32.mxu1 %vm7303_vm1, %v4773_v9  ;;  %v5085_v61 = vld [vmem:[%s8651_s1 + $0x2d0] sm:$0xff]  ;;  %v361_v9 = vand.u32 15, %v253_v58  ;;  %v5139_v2 = vld [vmem:[%s8651_s1 + $0x300] sm:$0xff] }
  0x34   : > { %6073 = vmatprep.mubr.f32.mxu0 %v7309_v11  ;;  %6603 = vmatprep.subr.bf16.mxu0 %v6602_v10  ;;  %v6618_v15 = vpack.c.bf16 %v5086_v62, %v5085_v61  ;;  %v389_v61 = vand.u32 15, %v257_v36  ;;  %v259_v62 = vadd.s32 144, %v7153_v13  ;;  %v7547_v36 = vld [vmem:[%s7188_s6 + $0x16f] sm:$0xff]  ;;  %v4948_v58 = vld [vmem:[%s7188_s6 + $0x187] sm:$0xff] }
  0x35   : > { %5754 = vmatmul.mubr.f32.gmra.mrb[2].mxu1 %v4774_v17  ;;  %6475 = vmatprep.subr.bf16.mxu1 %v6474_v12  ;;  %v5088_v17 = vld [vmem:[%s8651_s1 + $0x2e8] sm:$0xff]  ;;  %vm7470_vm6 = vcmp.ne.s32.totalorder %v361_v9, 0 }
  0x36   : > { %6074 = vmatmul.mubr.f32.gmra.mrb[2].mxu0 %v7328_v21  ;;  %5756 = vmatprep.mubr.msk.f32.mxu1 %vm7330_vm2, %v7335_v23  ;;  %v6622_v42 = vpack.c.bf16 %v5088_v17, %v5087_v16  ;;  %v5140_v9 = vld [vmem:[%s8651_s1 + $0x308] sm:$0xff]  ;;  %v244_v17 = vadd.s32 24, %v7153_v13  ;;  %vm7542_vm8 = vcmp.ne.s32.totalorder %v389_v61, 0 }
  0x37   : > { %6605 = vmatpush3.bf16.msra.mxu0 %v6602_v10  ;;  %6076 = vmatprep.mubr.f32.mxu0 %v7340_v28  ;;  %v255_v10 = vadd.s32 112, %v7153_v13 }
  0x38   : > { %6607 = vmatprep.subr.bf16.mxu0 %v6606_v29  ;;  %6477 = vmatpush3.bf16.msra.mxu1 %v6474_v12  ;;  %v7444_v12 = vld [vmem:[%s7188_s6 + $0x150] sm:$0xff] }
  0x39   : > { %5757 = vmatmul.mubr.f32.gmra.mrb[4].mxu1 %v7353_v34  ;;  %6479 = vmatprep.subr.bf16.mxu1 %v6478_v32 }
  0x3a   : > { %6077 = vmatmul.mubr.f32.gmra.mrb[4].mxu0 %v7363_v38  ;;  %5759 = vmatprep.mubr.msk.f32.mxu1 %vm7365_vm3, %v7370_v40 }
  0x3b   : > { %6609 = vmatpush3.bf16.msra.mxu0 %v6606_v29  ;;  %6079 = vmatprep.mubr.f32.mxu0 %v7374_v44  ;;  %v7468_v29 = vld [vmem:[%s7188_s6 + $0x158] sm:$0xff] }
  0x3c   : > { %6611 = vmatprep.subr.bf16.mxu0 %v6610_v45  ;;  %6481 = vmatpush3.bf16.msra.mxu1 %v6478_v32  ;;  %v375_v32 = vand.u32 15, %v255_v10  ;;  %v6498_v10 = vpack.c.bf16 %v4866_v52, %v4865_v51  ;;  %v6630_v51 = vpack.c.bf16 %v5140_v9, %v5139_v2  ;;  %v5142_v52 = vld [vmem:[%s8651_s1 + $0x318] sm:$0xff]  ;;  %v298_v2 = vand.u32 15, %v244_v17  ;;  %v7575_v9 = vld [vmem:[%s7188_s6 + $0x109] sm:$0xff] }
  0x3d   : > { %5760 = vmatmul.mubr.f32.gmra.mrb[6].mxu1 %v7388_v50  ;;  %6483 = vmatprep.subr.bf16.mxu1 %v6482_v49  ;;  %8792 = vst [vmem:[#allocation12_spill] sm:$0xff] %v7575_v9  ;;  %v7587_v17 = vld [vmem:[%s7188_s6 + $0x111] sm:$0xff] }
  0x3e   : > { %6080 = vmatmul.mubr.f32.gmra.mrb[6].mxu0 %v7398_v54  ;;  %5762 = vmatprep.mubr.msk.f32.mxu1 %vm7400_vm4, %v7405_v56  ;;  %vm7506_vm7 = vcmp.ne.s32.totalorder %v375_v32, 0  ;;  %8796 = vst [vmem:[#allocation14_spill] sm:$0xff] %v7587_v17  ;;  %vm7606_vm11 = vcmp.ne.s32.totalorder %v298_v2, 15  ;;  %v4950_v32 = vld [vmem:[%s7188_s6 + $0x197] sm:$0xff] }
  0x3f   : > { %6613 = vmatpush3.bf16.msra.mxu0 %v6610_v45  ;;  %6082 = vmatprep.mubr.f32.mxu0 %v7409_v59  ;;  %v5090_v45 = vld [vmem:[%s8651_s1 + $0x2f8] sm:$0xff] }
  0x40   : > { %6615 = vmatprep.subr.bf16.mxu0 %v6614_v60  ;;  %6485 = vmatpush3.bf16.msra.mxu1 %v6482_v49  ;;  %v242_v49 = vadd.s32 8, %v7153_v13  ;;  %v6626_v1 = vpack.c.bf16 %v5090_v45, %v5089_v43  ;;  %v403_v43 = vand.u32 15, %v259_v62  ;;  %v261_v45 = vadd.s32 160, %v7153_v13  ;;  %v4952_v62 = vld [vmem:[%s7188_s6 + $0x1a7] sm:$0xff] }
  0x41   : > { %5763 = vmatmul.mubr.f32.gmra.mrb[8].mxu1 %v7423_v0  ;;  %6487 = vmatprep.subr.bf16.mxu1 %v6486_v63 }
  0x42   : > { %6083 = vmatmul.mubr.f32.gmra.mrb[8].mxu0 %v7433_v3  ;;  %5765 = vmatprep.mubr.msk.f32.mxu1 %vm7435_vm5, %v7440_v6  ;;  %v284_v16 = vand.u32 15, %v242_v49  ;;  %v7551_v49 = vld [vmem:[%s7188_s6 + $0x101] sm:$0xff]  ;;  %vm7577_vm10 = vcmp.ne.s32.totalorder %v403_v43, 0  ;;  %v417_v53 = vand.u32 15, %v261_v45 }
  0x43   : > { %6617 = vmatpush3.bf16.msra.mxu0 %v6614_v60  ;;  %6085 = vmatprep.mubr.f32.mxu0 %v7444_v12  ;;  %v7511_v60 = vld [vmem:[%s7188_s6 + $0x15f] sm:$0xff]  ;;  %8789 = vst [vmem:[#allocation11_spill] sm:$0xff] %v7551_v49  ;;  %v5144_v45 = vld [vmem:[%s8651_s1 + $0x328] sm:$0xff] }
  0x44   : > { %6619 = vmatprep.subr.bf16.mxu0 %v6618_v15  ;;  %6489 = vmatpush3.bf16.msra.mxu1 %v6486_v63  ;;  %v7515_v63 = vld [vmem:[%s7188_s6 + $0x170] sm:$0xff]  ;;  %vm7569_vm9 = vcmp.ne.s32.totalorder %v284_v16, 15  ;;  %v263_v16 = vadd.s32 176, %v7153_v13  ;;  %v5143_v43 = vld [vmem:[%s8651_s1 + $0x320] sm:$0xff]  ;;  %vm7615_vm12 = vcmp.ne.s32.totalorder %v417_v53, 0 }
  0x45   : > { %5766 = vmatmul.mubr.f32.gmra.mrb[10].mxu1 %v7458_v19  ;;  %6491 = vmatprep.subr.bf16.mxu1 %v6490_v18  ;;  %v8802_v35 = vsel %vm7615_vm12, 4294967295, %v8801_v35  ;;  %v5145_v53 = vld [vmem:[%s8651_s1 + $0x330] sm:$0xff] }
  0x46   : > { %6086 = vmatmul.mubr.f32.gmra.mrb[10].mxu0 %v7468_v29  ;;  %5768 = vmatprep.mubr.msk.f32.mxu1 %vm7470_vm6, %v7475_v31  ;;  %8803 = vst [vmem:[#allocation17_spill] sm:$0xff] %v8802_v35  ;;  %v431_v2 = vand.u32 15, %v263_v16  ;;  %v7656_v35 = vld [vmem:[%s7188_s6 + $0x19f] sm:$0xff]  ;;  %v6642_v20 = vpack.c.bf16 %v5146_v47, %v5145_v53 }
  0x47   : > { %6621 = vmatpush3.bf16.msra.mxu0 %v6618_v15  ;;  %6088 = vmatprep.mubr.f32.mxu0 %v7479_v37  ;;  %v7529_v15 = vld [vmem:[%s7188_s6 + $0x167] sm:$0xff]  ;;  %8812 = vst [vmem:[#allocation22_spill] sm:$0xff] %v7656_v35  ;;  %v7684_v47 = vld [vmem:[%s7188_s6 + $0x139] sm:$0xff] }
  0x48   : > { %6623 = vmatprep.subr.bf16.mxu0 %v6622_v42  ;;  %6493 = vmatpush3.bf16.msra.mxu1 %v6490_v18  ;;  %v4899_v18 = vld [vmem:[%s8651_s1 + $0x100] sm:$0xff]  ;;  %vm7651_vm14 = vcmp.ne.s32.totalorder %v431_v2, 0  ;;  %8818 = vst [vmem:[#allocation26_spill] sm:$0xff] %v7684_v47 }
  0x49   : > { %5769 = vmatmul.mubr.f32.gmra.mrb[12].mxu1 %v7493_v48  ;;  %6495 = vmatprep.subr.bf16.mxu1 %v6494_v46  ;;  %v7560_v61 = vpack.c.bf16 %v4900_v24, %v4899_v18  ;;  %v8793_v18 = vmov 0  ;;  %v7582_v24 = vld [vmem:[%s7188_s6 + $0x17f] sm:$0xff] }
  0x4a   : > { %6089 = vmatmul.mubr.f32.gmra.mrb[12].mxu0 %v7504_v57  ;;  %5771 = vmatprep.mubr.msk.f32.mxu1 %vm7506_vm7, %v7511_v60  ;;  %v8794_v18 = vsel %vm7577_vm10, 4294967295, %v8793_v18  ;;  %v5147_v2 = vld [vmem:[%s8651_s1 + $0x340] sm:$0xff] }
  0x4b   : > { %6625 = vmatpush3.bf16.msra.mxu0 %v6622_v42  ;;  %6091 = vmatprep.mubr.f32.mxu0 %v7515_v63  ;;  %v5141_v42 = vld [vmem:[%s8651_s1 + $0x310] sm:$0xff]  ;;  %8795 = vst [vmem:[#allocation13_spill] sm:$0xff] %v8794_v18  ;;  %v5148_v18 = vld [vmem:[%s8651_s1 + $0x348] sm:$0xff] }
  0x4c   : > { %6627 = vmatprep.subr.bf16.mxu0 %v6626_v1  ;;  %6497 = vmatpush3.bf16.msra.mxu1 %v6494_v46  ;;  %v7567_v46 = vld [vmem:[%s7188_s6 + $0x177] sm:$0xff] }
  0x4d   : > { %5772 = vmatmul.mubr.f32.gmra.mrb[14].mxu1 %v7529_v15  ;;  %6499 = vmatprep.subr.bf16.mxu1 %v6498_v10 }
  0x4e   : > { %6092 = vmatmul.mubr.f32.gmra.mrb[14].mxu0 %v7540_v26  ;;  %5774 = vmatprep.mubr.msk.f32.mxu1 %vm7542_vm8, %v7547_v36 }
  0x4f   : > { %6629 = vmatpush3.bf16.msra.mxu0 %v6626_v1  ;;  %6150 = vmatprep.mubr.f32.mxu0 %v7551_v49  ;;  %v6634_v1 = vpack.c.bf16 %v5142_v52, %v5141_v42  ;;  %v8797_v42 = vmov 0  ;;  %v248_v52 = vadd.s32 56, %v7153_v13  ;;  %v8819_v49 = vmov 0 }
  0x50   : > { %6631 = vmatprep.subr.bf16.mxu0 %v6630_v51  ;;  %6501 = vmatpush3.bf16.msra.mxu1 %v6498_v10  ;;  %v7604_v10 = vld [vmem:[%s7188_s6 + $0x187] sm:$0xff]  ;;  %v8798_v42 = vsel %vm7606_vm11, 4294967295, %v8797_v42 }
  0x51   : > { %5775 = vmatmul.mubr.f32.gmra.mrb[16].mxu1 %v7567_v46  ;;  %6503 = vmatprep.subr.bf16.mxu1 %v7560_v61  ;;  %8799 = vst [vmem:[#allocation15_spill] sm:$0xff] %v8798_v42  ;;  %v326_v16 = vand.u32 15, %v248_v52  ;;  %v445_v52 = vand.u32 15, %v265_v14  ;;  %v267_v42 = vadd.s32 208, %v7153_v13  ;;  %v7676_v14 = vld [vmem:[%s7188_s6 + $0x1a7] sm:$0xff] }
  0x52   : > { %6151 = vmatmul.mubr.msk.f32.vlgmr.msra.gmra.mrb[0].mxu0 %vm7569_vm9, %v7575_v9  ;;  %5777 = vmatprep.mubr.msk.f32.mxu1 %vm7577_vm10, %v7582_v24  ;;  %v7649_v9 = vld [vmem:[%s7188_s6 + $0x129] sm:$0xff]  ;;  %8814 = vst [vmem:[#allocation24_spill] sm:$0xff] %v7676_v14 }
  0x53   : > { %6153 = vmatprep.mubr.f32.mxu0 %v7587_v17  ;;  %6633 = vmatpush3.bf16.msra.mxu0 %v6630_v51  ;;  %v6638_v17 = vpack.c.bf16 %v5144_v45, %v5143_v43  ;;  %v7640_v51 = vld [vmem:[%s7188_s6 + $0x197] sm:$0xff]  ;;  %v250_v43 = vadd.s32 72, %v7153_v13  ;;  %v8805_v45 = vmov 0  ;;  %8808 = vst [vmem:[#allocation20_spill] sm:$0xff] %v7649_v9  ;;  %vm7678_vm15 = vcmp.ne.s32.totalorder %v326_v16, 15 }
  0x54   : > { %6635 = vmatprep.subr.bf16.mxu0 %v6634_v1  ;;  %v8806_v45 = vsel %vm7644_vm13, 4294967295, %v8805_v45  ;;  %v252_v16 = vadd.s32 88, %v7153_v13 }
  0x55   : > { %5778 = vmatmul.mubr.f32.gmra.mrb[18].mxu1 %v7604_v10  ;;  %8807 = vst [vmem:[#allocation19_spill] sm:$0xff] %v8806_v45  ;;  %v340_v53 = vand.u32 15, %v250_v43  ;;  %v269_v45 = vadd.s32 224, %v7153_v13  ;;  %v7696_v43 = vld [vmem:[%s7188_s6 + $0x141] sm:$0xff] }
  0x56   : > { %6154 = vmatmul.mubr.msk.f32.gmra.mrb[2].mxu0 %vm7606_vm11, %v7613_v41  ;;  %5780 = vmatprep.mubr.msk.f32.mxu1 %vm7615_vm12, %v7620_v27  ;;  %v8809_v41 = vmov 0  ;;  %vm7686_vm12 = vcmp.ne.s32.totalorder %v445_v52, 0  ;;  %8823 = vst [vmem:[#allocation29_spill] sm:$0xff] %v7696_v43  ;;  %v5149_v52 = vld [vmem:[%s8651_s1 + $0x350] sm:$0xff] }
  0x57   : > { %6156 = vmatprep.mubr.f32.mxu0 %v7624_v8  ;;  %v8810_v41 = vsel %vm7651_vm14, 4294967295, %v8809_v41  ;;  %6637 = vmatpush3.bf16.msra.mxu0 %v6634_v1  ;;  %v7660_v8 = vld [vmem:[%s7188_s6 + $0x131] sm:$0xff]  ;;  %v8815_v1 = vmov 0  ;;  %v8820_v49 = vsel %vm7686_vm12, 4294967295, %v8819_v49 }
  0x58   : > { %8811 = vst [vmem:[#allocation21_spill] sm:$0xff] %v8810_v41  ;;  %8813 = vst [vmem:[#allocation23_spill] sm:$0xff] %v7660_v8  ;;  %6639 = vmatprep.subr.bf16.mxu0 %v6638_v17  ;;  %v8816_v1 = vsel %vm7678_vm15, 4294967295, %v8815_v1  ;;  %v459_v41 = vand.u32 15, %v267_v42  ;;  %v8825_v42 = vmov 0 }
  0x59   : > { %5781 = vmatmul.mubr.f32.gmra.mrb[20].mxu1 %v7640_v51  ;;  %8817 = vst [vmem:[#allocation25_spill] sm:$0xff] %v8816_v1  ;;  %8821 = vst [vmem:[#allocation27_spill] sm:$0xff] %v8820_v49  ;;  %v8829_v1 = vmov 0  ;;  %v354_v49 = vand.u32 15, %v252_v16  ;;  %v5152_v16 = vld [vmem:[%s8651_s1 + $0x368] sm:$0xff] }
  0x5a   : > { %6157 = vmatmul.mubr.msk.f32.gmra.mrb[4].mxu0 %vm7644_vm13, %v7649_v9  ;;  %5783 = vmatprep.mubr.msk.f32.mxu1 %vm7651_vm14, %v7656_v35  ;;  %v7691_v9 = vld [vmem:[%s7188_s6 + $0x1af] sm:$0xff]  ;;  %vm7714_vm14 = vcmp.ne.s32.totalorder %v340_v53, 15  ;;  %vm7723_vm13 = vcmp.ne.s32.totalorder %v459_v41, 0  ;;  %v271_v53 = vadd.s32 240, %v7153_v13  ;;  %v5151_v41 = vld [vmem:[%s8651_s1 + $0x360] sm:$0xff] }
  0x5b   : > { %6159 = vmatprep.mubr.f32.mxu0 %v7660_v8  ;;  %8822 = vst [vmem:[#allocation28_spill] sm:$0xff] %v7691_v9  ;;  %6641 = vmatpush3.bf16.msra.mxu0 %v6638_v17  ;;  %v6646_v8 = vpack.c.bf16 %v5148_v18, %v5147_v2  ;;  %v5150_v17 = vld [vmem:[%s8651_s1 + $0x358] sm:$0xff]  ;;  %v8826_v42 = vsel %vm7714_vm14, 4294967295, %v8825_v42  ;;  %v254_v2 = vadd.s32 104, %v7153_v13  ;;  %v8830_v1 = vsel %vm7723_vm13, 4294967295, %v8829_v1 }
  0x5c   : > { %6643 = vmatprep.subr.bf16.mxu0 %v6642_v20  ;;  %v7712_v18 = vld [vmem:[%s7188_s6 + $0x1b7] sm:$0xff]  ;;  %8827 = vst [vmem:[#allocation31_spill] sm:$0xff] %v8826_v42  ;;  %8831 = vst [vmem:[#allocation33_spill] sm:$0xff] %v8830_v1  ;;  %v487_v1 = vand.u32 15, %v271_v53  ;;  %v8843_v53 = vmov 0 }
  0x5d   : > { %5784 = vmatmul.mubr.f32.gmra.mrb[22].mxu1 %v7676_v14  ;;  %8824 = vst [vmem:[#allocation30_spill] sm:$0xff] %v7712_v18  ;;  %v7721_v14 = vld [vmem:[%s7188_s6 + $0x149] sm:$0xff]  ;;  %v7732_v35 = vld [vmem:[%s7188_s6 + $0x151] sm:$0xff] }
  0x5e   : > { %6160 = vmatmul.mubr.msk.f32.gmra.mrb[6].mxu0 %vm7678_vm15, %v7684_v47  ;;  %5786 = vmatprep.mubr.msk.f32.mxu1 %vm7686_vm12, %v7691_v9  ;;  %8828 = vst [vmem:[#allocation32_spill] sm:$0xff] %v7721_v14  ;;  %v7728_v47 = vld [vmem:[%s7188_s6 + $0x1bf] sm:$0xff]  ;;  %v473_v9 = vand.u32 15, %v269_v45  ;;  %8832 = vst [vmem:[#allocation34_spill] sm:$0xff] %v7732_v35  ;;  %v7748_v45 = vld [vmem:[%s7188_s6 + $0x1c7] sm:$0xff]  ;;  %vm7751_vm12 = vcmp.ne.s32.totalorder %v354_v49, 15  ;;  %v6654_v49 = vpack.c.bf16 %v5152_v16, %v5151_v41 }
  0x5f   : > { %6162 = vmatprep.mubr.f32.mxu0 %v7696_v43  ;;  %6645 = vmatpush3.bf16.msra.mxu0 %v6642_v20  ;;  %v6650_v43 = vpack.c.bf16 %v5150_v17, %v5149_v52  ;;  %v368_v20 = vand.u32 15, %v254_v2  ;;  %v8833_v52 = vmov 0  ;;  %v7756_v17 = vld [vmem:[%s7188_s6 + $0x159] sm:$0xff]  ;;  %v256_v2 = vadd.s32 120, %v7153_v13  ;;  %v7791_v41 = vld [vmem:[%s7188_s6 + $0x169] sm:$0xff] }
  0x60   : > { %6647 = vmatprep.subr.bf16.mxu0 %v6646_v8  ;;  %v8834_v52 = vsel %vm7751_vm12, 4294967295, %v8833_v52  ;;  %8836 = vst [vmem:[#allocation36_spill] sm:$0xff] %v7756_v17  ;;  %vm7758_vm15 = vcmp.ne.s32.totalorder %v473_v9, 0  ;;  %v5153_v9 = vld [vmem:[%s8651_s1 + $0x370] sm:$0xff]  ;;  %v5154_v42 = vld [vmem:[%s8651_s1 + $0x378] sm:$0xff]  ;;  %8846 = vst [vmem:[#allocation42_spill] sm:$0xff] %v7791_v41 }
  0x61   : > { %5787 = vmatmul.mubr.f32.gmra.mrb[24].mxu1 %v7712_v18  ;;  %8835 = vst [vmem:[#allocation35_spill] sm:$0xff] %v8834_v52  ;;  %v8837_v18 = vmov 0  ;;  %v8847_v16 = vmov 0  ;;  %v258_v52 = vadd.s32 136, %v7153_v13 }
  0x62   : > { %6163 = vmatmul.mubr.msk.f32.gmra.mrb[8].mxu0 %vm7714_vm14, %v7721_v14  ;;  %5789 = vmatprep.mubr.msk.f32.mxu1 %vm7723_vm13, %v7728_v47  ;;  %v8838_v18 = vsel %vm7758_vm15, 4294967295, %v8837_v18  ;;  %v7763_v14 = vld [vmem:[%s7188_s6 + $0x1cf] sm:$0xff]  ;;  %vm7786_vm13 = vcmp.ne.s32.totalorder %v368_v20, 15  ;;  %vm7793_vm14 = vcmp.ne.s32.totalorder %v487_v1, 0  ;;  %v6658_v20 = vpack.c.bf16 %v5154_v42, %v5153_v9  ;;  %v5203_v1 = vld [vmem:[%s8651_s1 + $0x380] sm:$0xff] }
  0x63   : > { %6165 = vmatprep.mubr.f32.mxu0 %v7732_v35  ;;  %8839 = vst [vmem:[#allocation37_spill] sm:$0xff] %v8838_v18  ;;  %8840 = vst [vmem:[#allocation38_spill] sm:$0xff] %v7763_v14  ;;  %6649 = vmatpush3.bf16.msra.mxu0 %v6646_v8  ;;  %v7767_v35 = vld [vmem:[%s7188_s6 + $0x161] sm:$0xff]  ;;  %v7783_v8 = vld [vmem:[%s7188_s6 + $0x1d7] sm:$0xff]  ;;  %v8844_v53 = vsel %vm7786_vm13, 4294967295, %v8843_v53  ;;  %v8848_v16 = vsel %vm7793_vm14, 4294967295, %v8847_v16 }
  0x64   : > { %8841 = vst [vmem:[#allocation39_spill] sm:$0xff] %v7767_v35  ;;  %6651 = vmatprep.subr.bf16.mxu0 %v6650_v43  ;;  %8842 = vst [vmem:[#allocation40_spill] sm:$0xff] %v7783_v8  ;;  %v382_v18 = vand.u32 15, %v256_v2  ;;  %v8853_v42 = vmov 0  ;;  %v7826_v2 = vld [vmem:[%s7188_s6 + $0x179] sm:$0xff]  ;;  %v4819_v9 = vld [vmem:[%s7188_s6 + $0xf0] sm:$0xff] }
  0x65   : > { %5790 = vmatmul.mubr.f32.gmra.mrb[26].mxu1 %v7748_v45  ;;  %8845 = vst [vmem:[#allocation41_spill] sm:$0xff] %v8844_v53  ;;  %8849 = vst [vmem:[#allocation43_spill] sm:$0xff] %v8848_v16  ;;  %v7831_v16 = vld [vmem:[%s7188_s6 + $0x181] sm:$0xff] }
  0x66   : > { %6166 = vmatmul.mubr.msk.f32.gmra.mrb[10].mxu0 %vm7751_vm12, %v7756_v17  ;;  %5792 = vmatprep.mubr.msk.f32.mxu1 %vm7758_vm15, %v7763_v14  ;;  %v7798_v17 = vld [vmem:[%s7188_s6 + $0x1df] sm:$0xff]  ;;  %v5204_v14 = vld [vmem:[%s8651_s1 + $0x388] sm:$0xff]  ;;  %vm7821_vm15 = vcmp.ne.s32.totalorder %v382_v18, 15  ;;  %v4901_v18 = vld [vmem:[%s8651_s1 + $0x110] sm:$0xff] }
  0x67   : > { %6168 = vmatprep.mubr.f32.mxu0 %v7767_v35  ;;  %8850 = vst [vmem:[#allocation44_spill] sm:$0xff] %v7798_v17  ;;  %6653 = vmatpush3.bf16.msra.mxu0 %v6650_v43  ;;  %v7802_v35 = vld [vmem:[%s7188_s6 + $0x171] sm:$0xff]  ;;  %v7818_v43 = vld [vmem:[%s7188_s6 + $0x1e7] sm:$0xff]  ;;  %v8854_v42 = vsel %vm7821_vm15, 4294967295, %v8853_v42  ;;  %v7833_v53 = vpack.c.bf16 %v5204_v14, %v5203_v1  ;;  %v8856_v14 = vmov 0 }
  0x68   : > { %8851 = vst [vmem:[#allocation45_spill] sm:$0xff] %v7802_v35  ;;  %6655 = vmatprep.subr.bf16.mxu0 %v6654_v49  ;;  %8852 = vst [vmem:[#allocation46_spill] sm:$0xff] %v7818_v43 }
  0x69   : > { %5793 = vmatmul.mubr.f32.gmra.mrb[28].mxu1 %v7783_v8  ;;  %8855 = vst [vmem:[#allocation47_spill] sm:$0xff] %v8854_v42  ;;  %v396_v8 = vand.u32 15, %v258_v52  ;;  %v4820_v52 = vld [vmem:[%s7188_s6 + $0xf8] sm:$0xff] }
  0x6a   : > { %6169 = vmatmul.mubr.msk.f32.gmra.mrb[12].mxu0 %vm7786_vm13, %v7791_v41  ;;  %5795 = vmatprep.mubr.msk.f32.mxu1 %vm7793_vm14, %v7798_v17  ;;  %v260_v41 = vadd.s32 152, %v7153_v13  ;;  %v7856_v17 = vld [vmem:[%s7188_s6 + $0x191] sm:$0xff] }
  0x6b   : > { %6171 = vmatprep.mubr.f32.mxu0 %v7802_v35  ;;  %6657 = vmatpush3.bf16.msra.mxu0 %v6654_v49  ;;  %v4902_v35 = vld [vmem:[%s8651_s1 + $0x118] sm:$0xff]  ;;  %vm7847_vm14 = vcmp.ne.s32.totalorder %v396_v8, 15  ;;  %v7852_v49 = vld [vmem:[%s7188_s6 + $0x189] sm:$0xff]  ;;  %v4903_v8 = vld [vmem:[%s8651_s1 + $0x120] sm:$0xff] }
  0x6c   : > { %6659 = vmatprep.subr.bf16.mxu0 %v6658_v20  ;;  %v8857_v14 = vsel %vm7847_vm14, 4294967295, %v8856_v14  ;;  %8858 = vst [vmem:[#allocation48_spill] sm:$0xff] %v7852_v49  ;;  %v410_v1 = vand.u32 15, %v260_v41  ;;  %v6506_v42 = vpack.c.bf16 %v4902_v35, %v4901_v18  ;;  %v8859_v35 = vmov 0  ;;  %v7876_v41 = vld [vmem:[%s7188_s6 + $0x199] sm:$0xff] }
  0x6d   : > { %5796 = vmatmul.mubr.f32.gmra.mrb[30].mxu1 %v7818_v43  ;;  %v262_v43 = vadd.s32 168, %v7153_v13  ;;  %8861 = vst [vmem:[#allocation49_spill] sm:$0xff] %v7876_v41  ;;  %v264_v18 = vadd.s32 184, %v7153_v13 }
  0x6e   : > { %6172 = vmatmul.mubr.msk.f32.gmra.mrb[14].mxu0 %vm7821_vm15, %v7826_v2  ;;  %5830 = vmatprep.mubr.f32.mxu1 %v4819_v9  ;;  %v4904_v9 = vld [vmem:[%s8651_s1 + $0x128] sm:$0xff]  ;;  %vm7871_vm15 = vcmp.ne.s32.totalorder %v410_v1, 15 }
  0x6f   : > { %6174 = vmatprep.mubr.f32.mxu0 %v7831_v16  ;;  %6661 = vmatpush3.bf16.msra.mxu0 %v6658_v20  ;;  %v8860_v35 = vsel %vm7871_vm15, 4294967295, %v8859_v35  ;;  %v424_v20 = vand.u32 15, %v262_v43  ;;  %v8862_v43 = vmov 0  ;;  %v438_v1 = vand.u32 15, %v264_v18 }
  0x70   : > { %6663 = vmatprep.subr.bf16.mxu0 %v7833_v53 }
  0x71   : > { %5831 = vmatmul.mubr.f32.vlgmr.msra.gmra.mrb[0].mxu1 %v4820_v52  ;;  %v7880_v52 = vld [vmem:[%s7188_s6 + $0x1a1] sm:$0xff] }
  0x72   : > { %6175 = vmatmul.mubr.msk.f32.gmra.mrb[16].mxu0 %vm7847_vm14, %v7852_v49  ;;  %6505 = vmatpush3.bf16.msra.mxu1 %v7560_v61  ;;  %v6510_v49 = vpack.c.bf16 %v4904_v9, %v4903_v8  ;;  %v4906_v61 = vld [vmem:[%s8651_s1 + $0x138] sm:$0xff]  ;;  %vm7894_vm14 = vcmp.ne.s32.totalorder %v424_v20, 15  ;;  %v266_v8 = vadd.s32 200, %v7153_v13  ;;  %v4908_v20 = vld [vmem:[%s8651_s1 + $0x148] sm:$0xff] }
  0x73   : > { %5833 = vmatprep.mubr.f32.mxu1 %v7214_v33  ;;  %6177 = vmatprep.mubr.f32.mxu0 %v7856_v17  ;;  %v4905_v33 = vld [vmem:[%s8651_s1 + $0x130] sm:$0xff]  ;;  %v8863_v43 = vsel %vm7894_vm14, 4294967295, %v8862_v43 }
  0x74   : > { %6507 = vmatprep.subr.bf16.mxu1 %v6506_v42  ;;  %v7903_v9 = vld [vmem:[%s7188_s6 + $0x1b1] sm:$0xff]  ;;  %v452_v18 = vand.u32 15, %v266_v8 }
  0x75   : > { %5834 = vmatmul.mubr.f32.gmra.mrb[2].mxu1 %v7300_v4  ;;  %v7899_v4 = vld [vmem:[%s7188_s6 + $0x1a9] sm:$0xff] }
  0x76   : > { %6178 = vmatmul.mubr.msk.f32.gmra.mrb[18].mxu0 %vm7871_vm15, %v7876_v41  ;;  %5836 = vmatprep.mubr.f32.mxu1 %v7309_v11  ;;  %8864 = vst [vmem:[#allocation50_spill] sm:$0xff] %v7899_v4  ;;  %v6514_v41 = vpack.c.bf16 %v4906_v61, %v4905_v33  ;;  %v4907_v11 = vld [vmem:[%s8651_s1 + $0x140] sm:$0xff]  ;;  %vm7917_vm15 = vcmp.ne.s32.totalorder %v438_v1, 15  ;;  %v268_v33 = vadd.s32 216, %v7153_v13  ;;  %v4910_v1 = vld [vmem:[%s8651_s1 + $0x158] sm:$0xff] }
  0x77   : > { %6180 = vmatprep.mubr.f32.mxu0 %v7880_v52  ;;  %6509 = vmatpush3.bf16.msra.mxu1 %v6506_v42  ;;  %v8865_v42 = vmov 0  ;;  %v7926_v61 = vld [vmem:[%s7188_s6 + $0x1c1] sm:$0xff] }
  0x78   : > { %6511 = vmatprep.subr.bf16.mxu1 %v6510_v49  ;;  %v8866_v42 = vsel %vm7917_vm15, 4294967295, %v8865_v42  ;;  %v466_v8 = vand.u32 15, %v268_v33 }
  0x79   : > { %5837 = vmatmul.mubr.f32.gmra.mrb[4].mxu1 %v7328_v21  ;;  %v7922_v21 = vld [vmem:[%s7188_s6 + $0x1b9] sm:$0xff] }
  0x7a   : > { %6181 = vmatmul.mubr.msk.f32.gmra.mrb[20].mxu0 %vm7894_vm14, %v7899_v4  ;;  %5839 = vmatprep.mubr.f32.mxu1 %v7340_v28  ;;  %8867 = vst [vmem:[#allocation51_spill] sm:$0xff] %v7922_v21  ;;  %v6518_v4 = vpack.c.bf16 %v4908_v20, %v4907_v11  ;;  %v4909_v28 = vld [vmem:[%s8651_s1 + $0x150] sm:$0xff]  ;;  %vm7940_vm14 = vcmp.ne.s32.totalorder %v452_v18, 15  ;;  %v270_v11 = vadd.s32 232, %v7153_v13  ;;  %v4912_v18 = vld [vmem:[%s8651_s1 + $0x168] sm:$0xff] }
  0x7b   : > { %6183 = vmatprep.mubr.f32.mxu0 %v7903_v9  ;;  %6513 = vmatpush3.bf16.msra.mxu1 %v6510_v49  ;;  %v8868_v49 = vmov 0  ;;  %v7949_v20 = vld [vmem:[%s7188_s6 + $0x1d1] sm:$0xff] }
  0x7c   : > { %6515 = vmatprep.subr.bf16.mxu1 %v6514_v41  ;;  %v8869_v49 = vsel %vm7940_vm14, 4294967295, %v8868_v49  ;;  %v480_v33 = vand.u32 15, %v270_v11  ;;  %v5073_v11 = vld [vmem:[%s7188_s6 + $0x1f1] sm:$0xff] }
  0x7d   : > { %5840 = vmatmul.mubr.f32.gmra.mrb[6].mxu1 %v7363_v38  ;;  %v7945_v38 = vld [vmem:[%s7188_s6 + $0x1c9] sm:$0xff] }
  0x7e   : > { %6184 = vmatmul.mubr.msk.f32.gmra.mrb[22].mxu0 %vm7917_vm15, %v7922_v21  ;;  %5842 = vmatprep.mubr.f32.mxu1 %v7374_v44  ;;  %8870 = vst [vmem:[#allocation52_spill] sm:$0xff] %v7945_v38  ;;  %v6522_v21 = vpack.c.bf16 %v4910_v1, %v4909_v28  ;;  %v4911_v44 = vld [vmem:[%s8651_s1 + $0x160] sm:$0xff]  ;;  %vm7963_vm15 = vcmp.ne.s32.totalorder %v466_v8, 15  ;;  %v272_v28 = vadd.s32 248, %v7153_v13  ;;  %v4914_v8 = vld [vmem:[%s8651_s1 + $0x178] sm:$0xff] }
  0x7f   : > { %6186 = vmatprep.mubr.f32.mxu0 %v7926_v61  ;;  %6517 = vmatpush3.bf16.msra.mxu1 %v6514_v41  ;;  %v8871_v41 = vmov 0  ;;  %v7972_v1 = vld [vmem:[%s7188_s6 + $0x1e1] sm:$0xff] }
  0x80   : > { %6519 = vmatprep.subr.bf16.mxu1 %v6518_v4  ;;  %v8872_v41 = vsel %vm7963_vm15, 4294967295, %v8871_v41 }
  0x81   : > { %5843 = vmatmul.mubr.f32.gmra.mrb[8].mxu1 %v7398_v54  ;;  %v7968_v54 = vld [vmem:[%s7188_s6 + $0x1d9] sm:$0xff] }
  0x82   : > { %6187 = vmatmul.mubr.msk.f32.gmra.mrb[24].mxu0 %vm7940_vm14, %v7945_v38  ;;  %5845 = vmatprep.mubr.f32.mxu1 %v7409_v59  ;;  %v6526_v38 = vpack.c.bf16 %v4912_v18, %v4911_v44  ;;  %v4913_v59 = vld [vmem:[%s8651_s1 + $0x170] sm:$0xff]  ;;  %vm7986_vm14 = vcmp.ne.s32.totalorder %v480_v33, 15  ;;  %v4964_v18 = vld [vmem:[%s8651_s1 + $0x188] sm:$0xff] }
  0x83   : > { %6189 = vmatprep.mubr.f32.mxu0 %v7949_v20  ;;  %6521 = vmatpush3.bf16.msra.mxu1 %v6518_v4  ;;  %v494_v4 = vand.u32 15, %v272_v28  ;;  %v6530_v44 = vpack.c.bf16 %v4914_v8, %v4913_v59  ;;  %v5205_v28 = vld [vmem:[%s8651_s1 + $0x390] sm:$0xff]  ;;  %v5207_v59 = vld [vmem:[%s8651_s1 + $0x3a0] sm:$0xff] }
  0x84   : > { %6523 = vmatprep.subr.bf16.mxu1 %v6522_v21 }
  0x85   : > { %5846 = vmatmul.mubr.f32.gmra.mrb[10].mxu1 %v7433_v3  ;;  %v7991_v3 = vld [vmem:[%s7188_s6 + $0x1e9] sm:$0xff] }
  0x86   : > { %6190 = vmatmul.mubr.msk.f32.gmra.mrb[26].mxu0 %vm7963_vm15, %v7968_v54  ;;  %5848 = vmatprep.mubr.f32.mxu1 %v7444_v12  ;;  %v4963_v12 = vld [vmem:[%s8651_s1 + $0x180] sm:$0xff]  ;;  %vm8005_vm15 = vcmp.ne.s32.totalorder %v494_v4, 15  ;;  %v5210_v4 = vld [vmem:[%s8651_s1 + $0x3b8] sm:$0xff] }
  0x87   : > { %6192 = vmatprep.mubr.f32.mxu0 %v7972_v1  ;;  %6525 = vmatpush3.bf16.msra.mxu1 %v6522_v21  ;;  %v8010_v33 = vpack.c.bf16 %v4964_v18, %v4963_v12  ;;  %v8082_v12 = vld [vmem:[%s7188_s6 + $0x1b0] sm:$0xff] }
  0x88   : > { %6527 = vmatprep.subr.bf16.mxu1 %v6526_v38 }
  0x89   : > { %5849 = vmatmul.mubr.f32.gmra.mrb[12].mxu1 %v7468_v29  ;;  %v5074_v29 = vld [vmem:[%s7188_s6 + $0x1f9] sm:$0xff] }
  0x8a   : > { %6193 = vmatmul.mubr.msk.f32.gmra.mrb[28].mxu0 %vm7986_vm14, %v7991_v3  ;;  %5851 = vmatprep.mubr.f32.mxu1 %v7479_v37  ;;  %v5206_v37 = vld [vmem:[%s8651_s1 + $0x398] sm:$0xff] }
  0x8b   : > { %6195 = vmatprep.mubr.f32.mxu0 %v5073_v11  ;;  %6529 = vmatpush3.bf16.msra.mxu1 %v6526_v38  ;;  %v8026_v38 = vld [vmem:[%s7188_s6 + $0x180] sm:$0xff] }
  0x8c   : > { %6531 = vmatprep.subr.bf16.mxu1 %v6530_v44 }
  0x8d   : > { %5852 = vmatmul.mubr.f32.gmra.mrb[14].mxu1 %v7504_v57  ;;  %v6666_v57 = vpack.c.bf16 %v5206_v37, %v5205_v28  ;;  %v8100_v28 = vld [vmem:[%s7188_s6 + $0x1c0] sm:$0xff] }
  0x8e   : > { %6196 = vmatmul.mubr.msk.f32.gmra.mrb[30].mxu0 %vm8005_vm15, %v5074_v29  ;;  %5854 = vmatprep.mubr.f32.mxu1 %v7515_v63  ;;  %v5208_v63 = vld [vmem:[%s8651_s1 + $0x3a8] sm:$0xff]  ;;  %v5214_v29 = vld [vmem:[%s8651_s1 + $0x3d8] sm:$0xff] }
  0x8f   : > { %6230 = vmatprep.mubr.msk.f32.mxu0 %vm7190_vm0, %v7335_v23  ;;  %6533 = vmatpush3.bf16.msra.mxu1 %v6530_v44  ;;  %v8039_v23 = vld [vmem:[%s7188_s6 + $0x188] sm:$0xff]  ;;  %v6670_v8 = vpack.c.bf16 %v5208_v63, %v5207_v59  ;;  %v8118_v59 = vld [vmem:[%s7188_s6 + $0x1d0] sm:$0xff] }
  0x90   : > { %6535 = vmatprep.subr.bf16.mxu1 %v8010_v33  ;;  %v5212_v44 = vld [vmem:[%s8651_s1 + $0x3c8] sm:$0xff] }
  0x91   : > { %5855 = vmatmul.mubr.f32.gmra.mrb[16].mxu1 %v7540_v26  ;;  %v8046_v26 = vld [vmem:[%s7188_s6 + $0x190] sm:$0xff] }
  0x92   : > { %6231 = vmatmul.mubr.f32.vlgmr.msra.gmra.mrb[0].mxu0 %v7353_v34  ;;  %5857 = vmatprep.mubr.f32.mxu1 %v8026_v38  ;;  %v5209_v34 = vld [vmem:[%s8651_s1 + $0x3b0] sm:$0xff] }
  0x93   : > { %6233 = vmatprep.mubr.msk.f32.mxu0 %vm7303_vm1, %v7370_v40  ;;  %6665 = vmatpush3.bf16.msra.mxu0 %v7833_v53  ;;  %v8058_v40 = vld [vmem:[%s7188_s6 + $0x198] sm:$0xff]  ;;  %v8064_v53 = vld [vmem:[%s7188_s6 + $0x1a0] sm:$0xff]  ;;  %v6674_v11 = vpack.c.bf16 %v5210_v4, %v5209_v34 }
  0x94   : > { %6667 = vmatprep.subr.bf16.mxu0 %v6666_v57  ;;  %v8136_v34 = vld [vmem:[%s7188_s6 + $0x1e0] sm:$0xff] }
  0x95   : > { %5858 = vmatmul.mubr.f32.gmra.mrb[18].mxu1 %v8039_v23 }
  0x96   : > { %6234 = vmatmul.mubr.f32.gmra.mrb[2].mxu0 %v7388_v50  ;;  %5860 = vmatprep.mubr.f32.mxu1 %v8046_v26  ;;  %v5211_v50 = vld [vmem:[%s8651_s1 + $0x3c0] sm:$0xff] }
  0x97   : > { %6236 = vmatprep.mubr.msk.f32.mxu0 %vm7330_vm2, %v7405_v56  ;;  %6669 = vmatpush3.bf16.msra.mxu0 %v6666_v57  ;;  %v8076_v56 = vld [vmem:[%s7188_s6 + $0x1a8] sm:$0xff]  ;;  %v6678_v18 = vpack.c.bf16 %v5212_v44, %v5211_v50  ;;  %v4867_v50 = vld [vmem:[%s7188_s6 + $0xf1] sm:$0xff] }
  0x98   : > { %6671 = vmatprep.subr.bf16.mxu0 %v6670_v8  ;;  %v5216_v57 = vld [vmem:[%s8651_s1 + $0x3e8] sm:$0xff] }
  0x99   : > { %5861 = vmatmul.mubr.f32.gmra.mrb[20].mxu1 %v8058_v40 }
  0x9a   : > { %6237 = vmatmul.mubr.f32.gmra.mrb[4].mxu0 %v7423_v0  ;;  %5863 = vmatprep.mubr.f32.mxu1 %v8064_v53  ;;  %v5213_v0 = vld [vmem:[%s8651_s1 + $0x3d0] sm:$0xff] }
  0x9b   : > { %6239 = vmatprep.mubr.msk.f32.mxu0 %vm7365_vm3, %v7440_v6  ;;  %6673 = vmatpush3.bf16.msra.mxu0 %v6670_v8  ;;  %v8094_v6 = vld [vmem:[%s7188_s6 + $0x1b8] sm:$0xff]  ;;  %v6682_v37 = vpack.c.bf16 %v5214_v29, %v5213_v0  ;;  %v4967_v29 = vld [vmem:[%s8651_s1 + $0x1a0] sm:$0xff] }
  0x9c   : > { %6675 = vmatprep.subr.bf16.mxu0 %v6674_v11  ;;  %v5218_v8 = vld [vmem:[%s8651_s1 + $0x3f8] sm:$0xff] }
  0x9d   : > { %5864 = vmatmul.mubr.f32.gmra.mrb[22].mxu1 %v8076_v56  ;;  %v4868_v0 = vld [vmem:[%s7188_s6 + $0xf9] sm:$0xff] }
  0x9e   : > { %6240 = vmatmul.mubr.f32.gmra.mrb[6].mxu0 %v7458_v19  ;;  %5866 = vmatprep.mubr.f32.mxu1 %v8082_v12  ;;  %v5215_v19 = vld [vmem:[%s8651_s1 + $0x3e0] sm:$0xff] }
  0x9f   : > { %6242 = vmatprep.mubr.msk.f32.mxu0 %vm7400_vm4, %v7475_v31  ;;  %6677 = vmatpush3.bf16.msra.mxu0 %v6674_v11  ;;  %v8112_v31 = vld [vmem:[%s7188_s6 + $0x1c8] sm:$0xff]  ;;  %v6686_v63 = vpack.c.bf16 %v5216_v57, %v5215_v19  ;;  %v8879_v19 = vld [vmem:[#allocation13_spill] sm:$0xff] }
  0xa0   : > { %6679 = vmatprep.subr.bf16.mxu0 %v6678_v18  ;;  %v5252_v11 = vld [vmem:[%s8651_s1 + $0x408] sm:$0xff] }
  0xa1   : > { %5867 = vmatmul.mubr.f32.gmra.mrb[24].mxu1 %v8094_v6 }
  0xa2   : > { %6243 = vmatmul.mubr.f32.gmra.mrb[8].mxu0 %v7493_v48  ;;  %5869 = vmatprep.mubr.f32.mxu1 %v8100_v28  ;;  %v5217_v48 = vld [vmem:[%s8651_s1 + $0x3f0] sm:$0xff] }
  0xa3   : > { %6245 = vmatprep.mubr.msk.f32.mxu0 %vm7435_vm5, %v7511_v60  ;;  %6681 = vmatpush3.bf16.msra.mxu0 %v6678_v18  ;;  %v8130_v60 = vld [vmem:[%s7188_s6 + $0x1d8] sm:$0xff]  ;;  %v6690_v4 = vpack.c.bf16 %v5218_v8, %v5217_v48  ;;  %v4965_v18 = vld [vmem:[%s8651_s1 + $0x190] sm:$0xff]  ;;  %v8881_v48 = vld [vmem:[#allocation15_spill] sm:$0xff] }
  0xa4   : > { %6683 = vmatprep.subr.bf16.mxu0 %v6682_v37  ;;  %v4969_v8 = vld [vmem:[%s8651_s1 + $0x1b0] sm:$0xff] }
  0xa5   : > { %5870 = vmatmul.mubr.f32.gmra.mrb[26].mxu1 %v8112_v31 }
  0xa6   : > { %6246 = vmatmul.mubr.f32.gmra.mrb[10].mxu0 %v7529_v15  ;;  %5872 = vmatprep.mubr.f32.mxu1 %v8118_v59  ;;  %v5251_v15 = vld [vmem:[%s8651_s1 + $0x400] sm:$0xff] }
  0xa7   : > { %6248 = vmatprep.mubr.msk.f32.mxu0 %vm7470_vm6, %v7547_v36  ;;  %6685 = vmatpush3.bf16.msra.mxu0 %v6682_v37  ;;  %v8148_v36 = vld [vmem:[%s7188_s6 + $0x1e8] sm:$0xff]  ;;  %v8154_v44 = vpack.c.bf16 %v5252_v11, %v5251_v15  ;;  %v8878_v37 = vld [vmem:[#allocation22_spill] sm:$0xff]  ;;  %v8885_v11 = vld [vmem:[#allocation17_spill] sm:$0xff] }
  0xa8   : > { %6687 = vmatprep.subr.bf16.mxu0 %v6686_v63  ;;  %v8884_v15 = vld [vmem:[#allocation28_spill] sm:$0xff] }
  0xa9   : > { %5873 = vmatmul.mubr.f32.gmra.mrb[28].mxu1 %v8130_v60 }
  0xaa   : > { %6249 = vmatmul.mubr.f32.gmra.mrb[12].mxu0 %v7567_v46  ;;  %5875 = vmatprep.mubr.f32.mxu1 %v8136_v34  ;;  %v4966_v46 = vld [vmem:[%s8651_s1 + $0x198] sm:$0xff] }
  0xab   : > { %6251 = vmatprep.mubr.msk.f32.mxu0 %vm7506_vm7, %v7582_v24  ;;  %6689 = vmatpush3.bf16.msra.mxu0 %v6686_v63  ;;  %v6538_v24 = vpack.c.bf16 %v4966_v46, %v4965_v18  ;;  %v8880_v63 = vld [vmem:[#allocation12_spill] sm:$0xff]  ;;  %v8888_v46 = vld [vmem:[#allocation19_spill] sm:$0xff] }
  0xac   : > { %6691 = vmatprep.subr.bf16.mxu0 %v6690_v4  ;;  %v8887_v18 = vld [vmem:[#allocation16_spill] sm:$0xff] }
  0xad   : > { %5876 = vmatmul.mubr.f32.gmra.mrb[30].mxu1 %v8148_v36 }
  0xae   : > { %6252 = vmatmul.mubr.f32.gmra.mrb[14].mxu0 %v7604_v10  ;;  %5910 = vmatprep.mubr.f32.mxu1 %v4867_v50  ;;  %v4968_v10 = vld [vmem:[%s8651_s1 + $0x1a8] sm:$0xff] }
  0xaf   : > { %6254 = vmatprep.mubr.msk.f32.mxu0 %vm7542_vm8, %v7620_v27  ;;  %6693 = vmatpush3.bf16.msra.mxu0 %v6690_v4  ;;  %v8877_v27 = vld [vmem:[#allocation11_spill] sm:$0xff]  ;;  %v6542_v57 = vpack.c.bf16 %v4968_v10, %v4967_v29  ;;  %v8883_v4 = vld [vmem:[#allocation14_spill] sm:$0xff]  ;;  %v4972_v29 = vld [vmem:[%s8651_s1 + $0x1c8] sm:$0xff] }
  0xb0   : > { %6695 = vmatprep.subr.bf16.mxu0 %v8154_v44  ;;  %v8890_v10 = vld [vmem:[#allocation30_spill] sm:$0xff] }
  0xb1   : > { %5911 = vmatmul.mubr.msk.f32.vlgmr.msra.gmra.mrb[0].mxu1 %vm7569_vm9, %v4868_v0  ;;  %v4971_v0 = vld [vmem:[%s8651_s1 + $0x1c0] sm:$0xff] }
  0xb2   : > { %6255 = vmatmul.mubr.f32.gmra.mrb[16].mxu0 %v7640_v51  ;;  %6537 = vmatpush3.bf16.msra.mxu1 %v8010_v33  ;;  %v4970_v51 = vld [vmem:[%s8651_s1 + $0x1b8] sm:$0xff]  ;;  %v8882_v33 = vld [vmem:[#allocation24_spill] sm:$0xff] }
  0xb3   : > { %5913 = vmatprep.mubr.f32.mxu1 %v8877_v27  ;;  %6257 = vmatprep.mubr.msk.f32.mxu0 %vm7577_vm10, %v8878_v37  ;;  %vm8886_vm10 = vnez %v8885_v11  ;;  %v6546_v50 = vpack.c.bf16 %v4970_v51, %v4969_v8  ;;  %v8891_v27 = vld [vmem:[#allocation18_spill] sm:$0xff]  ;;  %v6550_v37 = vpack.c.bf16 %v4972_v29, %v4971_v0  ;;  %v8895_v8 = vld [vmem:[#allocation25_spill] sm:$0xff]  ;;  %v8902_v0 = vld [vmem:[#allocation31_spill] sm:$0xff] }
  0xb4   : > { %6539 = vmatprep.subr.bf16.mxu1 %v6538_v24  ;;  %v4973_v51 = vld [vmem:[%s8651_s1 + $0x1d0] sm:$0xff]  ;;  %v4975_v29 = vld [vmem:[%s8651_s1 + $0x1e0] sm:$0xff] }
  0xb5   : > { %5914 = vmatmul.mubr.msk.f32.gmra.mrb[2].mxu1 %vm7606_vm11, %v8880_v63  ;;  %vm8889_vm11 = vnez %v8888_v46  ;;  %v8894_v63 = vld [vmem:[#allocation20_spill] sm:$0xff] }
  0xb6   : > { %6258 = vmatmul.mubr.f32.gmra.mrb[18].mxu0 %v8882_v33  ;;  %5916 = vmatprep.mubr.f32.mxu1 %v8883_v4  ;;  %v4974_v33 = vld [vmem:[%s8651_s1 + $0x1d8] sm:$0xff]  ;;  %v8897_v4 = vld [vmem:[#allocation23_spill] sm:$0xff] }
  0xb7   : > { %6260 = vmatprep.mubr.msk.f32.mxu0 %vm8886_vm10, %v8884_v15  ;;  %6541 = vmatpush3.bf16.msra.mxu1 %v6538_v24  ;;  %v8892_v24 = vld [vmem:[#allocation21_spill] sm:$0xff]  ;;  %v6554_v15 = vpack.c.bf16 %v4974_v33, %v4973_v51 }
  0xb8   : > { %6543 = vmatprep.subr.bf16.mxu1 %v6542_v57  ;;  %vm8893_vm10 = vnez %v8892_v24  ;;  %v8240_v51 = vld [vmem:[%s7188_s6 + $0x1ef] sm:$0xff] }
  0xb9   : > { %5917 = vmatmul.mubr.msk.f32.gmra.mrb[4].mxu1 %vm8889_vm11, %v8887_v18  ;;  %vm8896_vm11 = vnez %v8895_v8  ;;  %v8901_v18 = vld [vmem:[#allocation26_spill] sm:$0xff]  ;;  %8909 = vst [vmem:[#allocation11_spill] sm:$0xff] %v8240_v51 }
  0xba   : > { %6261 = vmatmul.mubr.f32.gmra.mrb[20].mxu0 %v8890_v10  ;;  %5919 = vmatprep.mubr.f32.mxu1 %v8891_v27  ;;  %v8904_v10 = vld [vmem:[#allocation40_spill] sm:$0xff]  ;;  %v8905_v27 = vld [vmem:[#allocation29_spill] sm:$0xff] }
  0xbb   : > { %6263 = vmatprep.mubr.msk.f32.mxu0 %vm8893_vm10, %v7728_v47  ;;  %6545 = vmatpush3.bf16.msra.mxu1 %v6542_v57  ;;  %v8898_v47 = vld [vmem:[#allocation38_spill] sm:$0xff]  ;;  %v8899_v57 = vld [vmem:[#allocation27_spill] sm:$0xff] }
  0xbc   : > { %6547 = vmatprep.subr.bf16.mxu1 %v6546_v50  ;;  %vm8900_vm10 = vnez %v8899_v57 }
  0xbd   : > { %5920 = vmatmul.mubr.msk.f32.gmra.mrb[6].mxu1 %vm8896_vm11, %v8894_v63  ;;  %vm8903_vm11 = vnez %v8902_v0  ;;  %v8907_v63 = vld [vmem:[#allocation33_spill] sm:$0xff]  ;;  %v8922_v0 = vld [vmem:[#allocation47_spill] sm:$0xff] }
  0xbe   : > { %6264 = vmatmul.mubr.f32.gmra.mrb[22].mxu0 %v7748_v45  ;;  %5922 = vmatprep.mubr.f32.mxu1 %v8897_v4  ;;  %v4976_v45 = vld [vmem:[%s8651_s1 + $0x1e8] sm:$0xff] }
  0xbf   : > { %6266 = vmatprep.mubr.msk.f32.mxu0 %vm8900_vm10, %v8898_v47  ;;  %6549 = vmatpush3.bf16.msra.mxu1 %v6546_v50  ;;  %v8906_v50 = vld [vmem:[#allocation44_spill] sm:$0xff]  ;;  %vm8908_vm10 = vnez %v8907_v63  ;;  %v6558_v33 = vpack.c.bf16 %v4976_v45, %v4975_v29  ;;  %v8914_v29 = vld [vmem:[#allocation37_spill] sm:$0xff]  ;;  %v5236_v63 = vld [vmem:[%s7188_s6 + $0x199] sm:$0xff] }
  0xc0   : > { %6551 = vmatprep.subr.bf16.mxu1 %v6550_v37  ;;  %v8910_v4 = vld [vmem:[#allocation32_spill] sm:$0xff]  ;;  %v8257_v45 = vld [vmem:[%s7188_s6 + $0x1f7] sm:$0xff] }
  0xc1   : > { %5923 = vmatmul.mubr.msk.f32.gmra.mrb[8].mxu1 %vm8903_vm11, %v8901_v18  ;;  %v4977_v18 = vld [vmem:[%s8651_s1 + $0x1f0] sm:$0xff]  ;;  %v8916_v47 = vld [vmem:[#allocation36_spill] sm:$0xff] }
  0xc2   : > { %6267 = vmatmul.mubr.f32.gmra.mrb[24].mxu0 %v8904_v10  ;;  %5925 = vmatprep.mubr.f32.mxu1 %v8905_v27  ;;  %v4978_v10 = vld [vmem:[%s8651_s1 + $0x1f8] sm:$0xff] }
  0xc3   : > { %6269 = vmatprep.mubr.msk.f32.mxu0 %vm8908_vm10, %v8906_v50  ;;  %6553 = vmatpush3.bf16.msra.mxu1 %v6550_v37  ;;  %v8912_v27 = vld [vmem:[#allocation46_spill] sm:$0xff]  ;;  %vm8915_vm10 = vnez %v8914_v29  ;;  %v5171_v29 = vld [vmem:[%s7188_s6 + $0x110] sm:$0xff] }
  0xc4   : > { %6555 = vmatprep.subr.bf16.mxu1 %v6554_v15  ;;  %v8913_v37 = vld [vmem:[#allocation34_spill] sm:$0xff] }
  0xc5   : > { %5926 = vmatmul.mubr.msk.f32.gmra.mrb[10].mxu1 %vm7751_vm12, %v8910_v4  ;;  %v5137_v50 = vld [vmem:[%s7188_s6 + $0x1ff] sm:$0xff]  ;;  %v6562_v4 = vpack.c.bf16 %v4978_v10, %v4977_v18  ;;  %v8924_v10 = vld [vmem:[#allocation45_spill] sm:$0xff] }
  0xc6   : > { %6270 = vmatmul.mubr.f32.gmra.mrb[26].mxu0 %v8912_v27  ;;  %5928 = vmatprep.mubr.f32.mxu1 %v8913_v37  ;;  %v8918_v27 = vld [vmem:[#allocation39_spill] sm:$0xff]  ;;  %v5254_v18 = vld [vmem:[%s8651_s1 + $0x418] sm:$0xff] }
  0xc7   : > { %6272 = vmatprep.mubr.msk.f32.mxu0 %vm8915_vm10, %v8240_v51  ;;  %6557 = vmatpush3.bf16.msra.mxu1 %v6554_v15  ;;  %v8919_v37 = vld [vmem:[#allocation43_spill] sm:$0xff]  ;;  %v8921_v15 = vld [vmem:[#allocation42_spill] sm:$0xff]  ;;  %vm8923_vm10 = vnez %v8922_v0 }
  0xc8   : > { %6559 = vmatprep.subr.bf16.mxu1 %v6558_v33  ;;  %vm8920_vm12 = vnez %v8919_v37  ;;  %v5138_v51 = vld [vmem:[%s7188_s6 + $0x207] sm:$0xff]  ;;  %v5239_v37 = vld [vmem:[%s7188_s6 + $0x1b1] sm:$0xff] }
  0xc9   : > { %5929 = vmatmul.mubr.msk.f32.gmra.mrb[12].mxu1 %vm7786_vm13, %v8916_v47  ;;  %v5253_v47 = vld [vmem:[%s8651_s1 + $0x410] sm:$0xff]  ;;  %v8925_v0 = vld [vmem:[#allocation3_spill] sm:$0xff] }
  0xca   : > { %6273 = vmatmul.mubr.f32.gmra.mrb[28].mxu0 %v8257_v45  ;;  %5931 = vmatprep.mubr.f32.mxu1 %v8918_v27  ;;  %v6698_v27 = vpack.c.bf16 %v5254_v18, %v5253_v47  ;;  %v8927_v47 = vld [vmem:[#allocation48_spill] sm:$0xff]  ;;  %v5257_v18 = vld [vmem:[%s8651_s1 + $0x430] sm:$0xff] }
  0xcb   : > { %6275 = vmatprep.mubr.msk.f32.mxu0 %vm8920_vm12, %v5137_v50  ;;  %6561 = vmatpush3.bf16.msra.mxu1 %v6558_v33  ;;  %v5172_v33 = vld [vmem:[%s7188_s6 + $0x118] sm:$0xff]  ;;  %v5173_v50 = vld [vmem:[%s7188_s6 + $0x120] sm:$0xff] }
  0xcc   : > { %6563 = vmatprep.subr.bf16.mxu1 %v6562_v4 }
  0xcd   : > { %5932 = vmatmul.mubr.msk.f32.gmra.mrb[14].mxu1 %vm8923_vm10, %v8921_v15  ;;  %vm8926_vm10 = vnez %v8857_v14  ;;  %v5255_v15 = vld [vmem:[%s8651_s1 + $0x420] sm:$0xff] }
  0xce   : > { %6276 = vmatmul.mubr.f32.gmra.mrb[30].mxu0 %v5138_v51  ;;  %5934 = vmatprep.mubr.f32.mxu1 %v8924_v10  ;;  %v5256_v51 = vld [vmem:[%s8651_s1 + $0x428] sm:$0xff]  ;;  %v5177_v10 = vld [vmem:[%s7188_s6 + $0x140] sm:$0xff] }
  0xcf   : > { %6310 = vmatprep.mubr.f32.mxu0 %v5171_v29  ;;  %6565 = vmatpush3.bf16.msra.mxu1 %v6562_v4  ;;  %v5174_v29 = vld [vmem:[%s7188_s6 + $0x128] sm:$0xff]  ;;  %v5175_v4 = vld [vmem:[%s7188_s6 + $0x130] sm:$0xff] }
  0xd0   : > { %6726 = vmatprep.subr.bf16.mxu1 %v8925_v0 }
  0xd1   : > { %5935 = vmatmul.mubr.msk.f32.gmra.mrb[16].mxu1 %vm8926_vm10, %v7826_v2  ;;  %v6702_v2 = vpack.c.bf16 %v5256_v51, %v5255_v15  ;;  %vm8928_vm10 = vnez %v8860_v35  ;;  %v5259_v15 = vld [vmem:[%s8651_s1 + $0x440] sm:$0xff]  ;;  %v5260_v51 = vld [vmem:[%s8651_s1 + $0x448] sm:$0xff] }
  0xd2   : > { %6311 = vmatmul.mubr.f32.vlgmr.msra.gmra.mrb[0].mxu0 %v5172_v33  ;;  %5937 = vmatprep.mubr.f32.mxu1 %v7831_v16  ;;  %v5258_v16 = vld [vmem:[%s8651_s1 + $0x438] sm:$0xff] }
  0xd3   : > { %6313 = vmatprep.mubr.f32.mxu0 %v5173_v50  ;;  %6697 = vmatpush3.bf16.msra.mxu0 %v8154_v44  ;;  %v5176_v44 = vld [vmem:[%s7188_s6 + $0x138] sm:$0xff]  ;;  %v6706_v33 = vpack.c.bf16 %v5258_v16, %v5257_v18  ;;  %v8929_v50 = vld [vmem:[#allocation49_spill] sm:$0xff] }
  0xd4   : > { %6699 = vmatprep.subr.bf16.mxu0 %v6698_v27  ;;  %v5262_v18 = vld [vmem:[%s8651_s1 + $0x458] sm:$0xff] }
  0xd5   : > { %5938 = vmatmul.mubr.msk.f32.gmra.mrb[18].mxu1 %vm8928_vm10, %v8927_v47  ;;  %vm8930_vm10 = vnez %v8863_v43  ;;  %v5261_v47 = vld [vmem:[%s8651_s1 + $0x450] sm:$0xff] }
  0xd6   : > { %6314 = vmatmul.mubr.f32.gmra.mrb[2].mxu0 %v5174_v29  ;;  %5940 = vmatprep.mubr.f32.mxu1 %v7856_v17  ;;  %v5178_v17 = vld [vmem:[%s7188_s6 + $0x148] sm:$0xff]  ;;  %v6710_v29 = vpack.c.bf16 %v5260_v51, %v5259_v15  ;;  %v6714_v16 = vpack.c.bf16 %v5262_v18, %v5261_v47  ;;  %v4938_v18 = vld [vmem:[%s7188_s6 + $0x137] sm:$0xff] }
  0xd7   : > { %6316 = vmatprep.mubr.f32.mxu0 %v5175_v4  ;;  %6701 = vmatpush3.bf16.msra.mxu0 %v6698_v27  ;;  %v5179_v27 = vld [vmem:[%s7188_s6 + $0x150] sm:$0xff]  ;;  %v8931_v4 = vld [vmem:[#allocation50_spill] sm:$0xff]  ;;  %v8935_v51 = vld [vmem:[#allocation52_spill] sm:$0xff] }
  0xd8   : > { %6703 = vmatprep.subr.bf16.mxu0 %v6702_v2  ;;  %v4936_v47 = vld [vmem:[%s7188_s6 + $0x127] sm:$0xff] }
  0xd9   : > { %5941 = vmatmul.mubr.msk.f32.gmra.mrb[20].mxu1 %vm8930_vm10, %v8929_v50  ;;  %vm8932_vm10 = vnez %v8866_v42  ;;  %v5264_v50 = vld [vmem:[%s8651_s1 + $0x468] sm:$0xff] }
  0xda   : > { %6317 = vmatmul.mubr.f32.gmra.mrb[4].mxu0 %v5176_v44  ;;  %5943 = vmatprep.mubr.f32.mxu1 %v7880_v52  ;;  %v5180_v52 = vld [vmem:[%s7188_s6 + $0x158] sm:$0xff]  ;;  %v8933_v44 = vld [vmem:[#allocation51_spill] sm:$0xff] }
  0xdb   : > { %6319 = vmatprep.mubr.f32.mxu0 %v5177_v10  ;;  %6705 = vmatpush3.bf16.msra.mxu0 %v6702_v2  ;;  %v5181_v2 = vld [vmem:[%s7188_s6 + $0x160] sm:$0xff] }
  0xdc   : > { %6707 = vmatprep.subr.bf16.mxu0 %v6706_v33  ;;  %v5263_v10 = vld [vmem:[%s8651_s1 + $0x460] sm:$0xff] }
  0xdd   : > { %5944 = vmatmul.mubr.msk.f32.gmra.mrb[22].mxu1 %vm8932_vm10, %v8931_v4  ;;  %vm8934_vm10 = vnez %v8869_v49  ;;  %v6718_v15 = vpack.c.bf16 %v5264_v50, %v5263_v10  ;;  %v4931_v4 = vld [vmem:[%s7188_s6 + $0xff] sm:$0xff]  ;;  %v8409_v10 = vld [vmem:[%s7188_s6 + $0x1f0] sm:$0xff]  ;;  %v8941_v50 = vld [vmem:[#allocation8_spill] sm:$0xff] }
  0xde   : > { %6320 = vmatmul.mubr.f32.gmra.mrb[6].mxu0 %v5178_v17  ;;  %5946 = vmatprep.mubr.f32.mxu1 %v7903_v9  ;;  %v5182_v9 = vld [vmem:[%s7188_s6 + $0x168] sm:$0xff]  ;;  %v5265_v17 = vld [vmem:[%s8651_s1 + $0x470] sm:$0xff] }
  0xdf   : > { %6322 = vmatprep.mubr.f32.mxu0 %v5179_v27  ;;  %6709 = vmatpush3.bf16.msra.mxu0 %v6706_v33  ;;  %v5183_v33 = vld [vmem:[%s7188_s6 + $0x170] sm:$0xff]  ;;  %v5266_v27 = vld [vmem:[%s8651_s1 + $0x478] sm:$0xff] }
  0xe0   : > { %6711 = vmatprep.subr.bf16.mxu0 %v6710_v29 }
  0xe1   : > { %5947 = vmatmul.mubr.msk.f32.gmra.mrb[24].mxu1 %vm8934_vm10, %v8933_v44  ;;  %vm8936_vm10 = vnez %v8872_v41  ;;  %v4943_v44 = vld [vmem:[%s7188_s6 + $0x15f] sm:$0xff] }
  0xe2   : > { %6323 = vmatmul.mubr.f32.gmra.mrb[8].mxu0 %v5180_v52  ;;  %5949 = vmatprep.mubr.f32.mxu1 %v7926_v61  ;;  %v5184_v61 = vld [vmem:[%s7188_s6 + $0x178] sm:$0xff] }
  0xe3   : > { %6325 = vmatprep.mubr.f32.mxu0 %v5181_v2  ;;  %6713 = vmatpush3.bf16.msra.mxu0 %v6710_v29  ;;  %v6722_v29 = vpack.c.bf16 %v5266_v27, %v5265_v17  ;;  %v8939_v52 = vld [vmem:[#allocation6_spill] sm:$0xff]  ;;  %v4940_v2 = vld [vmem:[%s7188_s6 + $0x147] sm:$0xff] }
  0xe4   : > { %6715 = vmatprep.subr.bf16.mxu0 %v6714_v16  ;;  %v5202_v17 = vld [vmem:[%s7188_s6 + $0x208] sm:$0xff]  ;;  %v4947_v27 = vld [vmem:[%s7188_s6 + $0x17f] sm:$0xff] }
  0xe5   : > { %5950 = vmatmul.mubr.msk.f32.gmra.mrb[26].mxu1 %vm8936_vm10, %v8935_v51  ;;  %v8942_v51 = vld [vmem:[#allocation9_spill] sm:$0xff] }
  0xe6   : > { %6326 = vmatmul.mubr.f32.gmra.mrb[10].mxu0 %v5182_v9  ;;  %5952 = vmatprep.mubr.f32.mxu1 %v7949_v20  ;;  %v4932_v20 = vld [vmem:[%s7188_s6 + $0x107] sm:$0xff]  ;;  %v8418_v9 = vld [vmem:[%s7188_s6 + $0x1f8] sm:$0xff] }
  0xe7   : > { %6328 = vmatprep.mubr.f32.mxu0 %v5183_v33  ;;  %6717 = vmatpush3.bf16.msra.mxu0 %v6714_v16  ;;  %v8940_v16 = vld [vmem:[#allocation7_spill] sm:$0xff]  ;;  %v4945_v33 = vld [vmem:[%s7188_s6 + $0x16f] sm:$0xff] }
  0xe8   : > { %6719 = vmatprep.subr.bf16.mxu0 %v6718_v15 }
  0xe9   : > { %5953 = vmatmul.mubr.msk.f32.gmra.mrb[28].mxu1 %vm7986_vm14, %v7968_v54  ;;  %v4933_v54 = vld [vmem:[%s7188_s6 + $0x10f] sm:$0xff] }
  0xea   : > { %6329 = vmatmul.mubr.f32.gmra.mrb[12].mxu0 %v5184_v61  ;;  %5955 = vmatprep.mubr.f32.mxu1 %v7972_v1  ;;  %v4934_v1 = vld [vmem:[%s7188_s6 + $0x117] sm:$0xff] }
  0xeb   : > { %6331 = vmatprep.mubr.f32.mxu0 %v8026_v38  ;;  %6721 = vmatpush3.bf16.msra.mxu0 %v6718_v15  ;;  %v5201_v15 = vld [vmem:[%s7188_s6 + $0x200] sm:$0xff]  ;;  %v5219_v61 = vld [vmem:[%s7188_s6 + $0x111] sm:$0xff] }
  0xec   : > { %6723 = vmatprep.subr.bf16.mxu0 %v6722_v29 }
  0xed   : > { %5956 = vmatmul.mubr.msk.f32.gmra.mrb[30].mxu1 %vm8005_vm15, %v7991_v3  ;;  %v8937_v3 = vld [vmem:[#allocation4_spill] sm:$0xff] }
  0xee   : > { %6332 = vmatmul.mubr.f32.gmra.mrb[14].mxu0 %v8039_v23  ;;  %5990 = vmatprep.mubr.msk.f32.mxu1 %vm7190_vm0, %v4931_v4  ;;  %v5220_v4 = vld [vmem:[%s7188_s6 + $0x119] sm:$0xff]  ;;  %vm8944_vm0 = vnez %v8879_v19 }
  0xef   : > { %6334 = vmatprep.mubr.f32.mxu0 %v8046_v26  ;;  %6725 = vmatpush3.bf16.msra.mxu0 %v6722_v29  ;;  %v8943_v29 = vld [vmem:[#allocation10_spill] sm:$0xff] }
  0xf0   : > { %v5224_v19 = vld [vmem:[%s7188_s6 + $0x139] sm:$0xff] }
  0xf1   : > { %5991 = vmatmul.mubr.f32.vlgmr.msra.gmra.mrb[0].mxu1 %v4932_v20  ;;  %v4949_v20 = vld [vmem:[%s7188_s6 + $0x18f] sm:$0xff] }
  0xf2   : > { %6335 = vmatmul.mubr.f32.gmra.mrb[16].mxu0 %v8058_v40  ;;  %6734 = vmatpush3.bf16.msra.mxu1 %v8925_v0  ;;  %v8938_v0 = vld [vmem:[#allocation5_spill] sm:$0xff] }
  0xf3   : > { %5993 = vmatprep.mubr.msk.f32.mxu1 %vm7303_vm1, %v4933_v54  ;;  %6337 = vmatprep.mubr.f32.mxu0 %v8064_v53  ;;  %v5221_v54 = vld [vmem:[%s7188_s6 + $0x121] sm:$0xff]  ;;  %vm8945_vm1 = vnez %v8881_v48  ;;  %v4954_v48 = vld [vmem:[%s7188_s6 + $0x1b7] sm:$0xff] }
  0xf4   : > { %6727 = vmatprep.subr.bf16.mxu1 %v8937_v3 }
  0xf5   : > { %5994 = vmatmul.mubr.f32.gmra.mrb[2].mxu1 %v4934_v1  ;;  %v5222_v1 = vld [vmem:[%s7188_s6 + $0x129] sm:$0xff] }
  0xf6   : > { %6338 = vmatmul.mubr.f32.gmra.mrb[18].mxu0 %v8076_v56  ;;  %5996 = vmatprep.mubr.msk.f32.mxu1 %vm7330_vm2, %v4935_v25  ;;  %v4951_v25 = vld [vmem:[%s7188_s6 + $0x19f] sm:$0xff]  ;;  %vm8946_vm2 = vnez %v8885_v11  ;;  %v5226_v11 = vld [vmem:[%s7188_s6 + $0x149] sm:$0xff] }
  0xf7   : > { %6340 = vmatprep.mubr.f32.mxu0 %v8082_v12  ;;  %6735 = vmatpush3.bf16.msra.mxu1 %v8937_v3  ;;  %v5223_v3 = vld [vmem:[%s7188_s6 + $0x131] sm:$0xff] }
  0xf8   : > { %6728 = vmatprep.subr.bf16.mxu1 %v8938_v0 }
  0xf9   : > { %5997 = vmatmul.mubr.f32.gmra.mrb[4].mxu1 %v4936_v47  ;;  %v4953_v47 = vld [vmem:[%s7188_s6 + $0x1af] sm:$0xff] }
  0xfa   : > { %6341 = vmatmul.mubr.f32.gmra.mrb[20].mxu0 %v8094_v6  ;;  %5999 = vmatprep.mubr.msk.f32.mxu1 %vm7365_vm3, %v4937_v7  ;;  %v5225_v7 = vld [vmem:[%s7188_s6 + $0x141] sm:$0xff]  ;;  %vm8947_vm3 = vnez %v8888_v46 }
  0xfb   : > { %6343 = vmatprep.mubr.f32.mxu0 %v8100_v28  ;;  %6736 = vmatpush3.bf16.msra.mxu1 %v8938_v0  ;;  %v4955_v0 = vld [vmem:[%s7188_s6 + $0x1bf] sm:$0xff]  ;;  %v4956_v46 = vld [vmem:[%s7188_s6 + $0x1c7] sm:$0xff] }
  0xfc   : > { %6729 = vmatprep.subr.bf16.mxu1 %v8939_v52 }
  0xfd   : > { %6000 = vmatmul.mubr.f32.gmra.mrb[6].mxu1 %v4938_v18  ;;  %v5227_v18 = vld [vmem:[%s7188_s6 + $0x151] sm:$0xff] }
  0xfe   : > { %6344 = vmatmul.mubr.f32.gmra.mrb[22].mxu0 %v8112_v31  ;;  %6002 = vmatprep.mubr.msk.f32.mxu1 %vm7400_vm4, %v4939_v22  ;;  %vm8948_vm4 = vnez %v8892_v24  ;;  %v5228_v24 = vld [vmem:[%s7188_s6 + $0x159] sm:$0xff]  ;;  %v4957_v22 = vld [vmem:[%s7188_s6 + $0x1cf] sm:$0xff] }
  0xff   : > { %6346 = vmatprep.mubr.f32.mxu0 %v8118_v59  ;;  %6737 = vmatpush3.bf16.msra.mxu1 %v8939_v52  ;;  %v5229_v52 = vld [vmem:[%s7188_s6 + $0x161] sm:$0xff] }
 0x100   : > { %6730 = vmatprep.subr.bf16.mxu1 %v8940_v16 }
 0x101   : > { %6003 = vmatmul.mubr.f32.gmra.mrb[8].mxu1 %v4940_v2 }
 0x102   : > { %6347 = vmatmul.mubr.f32.gmra.mrb[24].mxu0 %v8130_v60  ;;  %6005 = vmatprep.mubr.msk.f32.mxu1 %vm7435_vm5, %v4941_v39  ;;  %vm8949_vm5 = vnez %v8895_v8  ;;  %v8952_v39 = vld [vmem:[#allocation33_spill] sm:$0xff] }
 0x103   : > { %6349 = vmatprep.mubr.f32.mxu0 %v8136_v34  ;;  %6738 = vmatpush3.bf16.msra.mxu1 %v8940_v16  ;;  %v4958_v8 = vld [vmem:[%s7188_s6 + $0x1d7] sm:$0xff]  ;;  %v4959_v16 = vld [vmem:[%s7188_s6 + $0x1df] sm:$0xff] }
 0x104   : > { %6731 = vmatprep.subr.bf16.mxu1 %v8941_v50 }
 0x105   : > { %6006 = vmatmul.mubr.f32.gmra.mrb[10].mxu1 %v4942_v55  ;;  %v5231_v55 = vld [vmem:[%s7188_s6 + $0x171] sm:$0xff] }
 0x106   : > { %6350 = vmatmul.mubr.f32.gmra.mrb[26].mxu0 %v8148_v36  ;;  %6008 = vmatprep.mubr.msk.f32.mxu1 %vm7470_vm6, %v4943_v44  ;;  %vm8950_vm6 = vnez %v8899_v57  ;;  %v5230_v57 = vld [vmem:[%s7188_s6 + $0x169] sm:$0xff]  ;;  %v8954_v44 = vld [vmem:[#allocation35_spill] sm:$0xff] }
 0x107   : > { %6352 = vmatprep.mubr.f32.mxu0 %v8409_v10  ;;  %6739 = vmatpush3.bf16.msra.mxu1 %v8941_v50  ;;  %v8956_v50 = vld [vmem:[#allocation37_spill] sm:$0xff] }
 0x108   : > { %6732 = vmatprep.subr.bf16.mxu1 %v8942_v51 }
 0x109   : > { %6009 = vmatmul.mubr.f32.gmra.mrb[12].mxu1 %v4944_v5  ;;  %v4960_v5 = vld [vmem:[%s7188_s6 + $0x1e7] sm:$0xff] }
 0x10a   : > { %6353 = vmatmul.mubr.f32.gmra.mrb[28].mxu0 %v8418_v9  ;;  %6011 = vmatprep.mubr.msk.f32.mxu1 %vm7506_vm7, %v4945_v33  ;;  %vm8953_vm7 = vnez %v8952_v39  ;;  %v5232_v33 = vld [vmem:[%s7188_s6 + $0x179] sm:$0xff] }
 0x10b   : > { %6355 = vmatprep.mubr.f32.mxu0 %v5201_v15  ;;  %6740 = vmatpush3.bf16.msra.mxu1 %v8942_v51  ;;  %v5233_v15 = vld [vmem:[%s7188_s6 + $0x181] sm:$0xff] }
 0x10c   : > { %6733 = vmatprep.subr.bf16.mxu1 %v8943_v29  ;;  %v8958_v51 = vld [vmem:[#allocation11_spill] sm:$0xff] }
 0x10d   : > { %6012 = vmatmul.mubr.f32.gmra.mrb[14].mxu1 %v4946_v30  ;;  %v5234_v30 = vld [vmem:[%s7188_s6 + $0x189] sm:$0xff] }
 0x10e   : > { %6356 = vmatmul.mubr.f32.gmra.mrb[30].mxu0 %v5202_v17  ;;  %6014 = vmatprep.mubr.msk.f32.mxu1 %vm7542_vm8, %v4947_v27  ;;  %vm8955_vm8 = vnez %v8954_v44  ;;  %v5235_v17 = vld [vmem:[%s7188_s6 + $0x191] sm:$0xff]  ;;  %v8959_v27 = vld [vmem:[#allocation47_spill] sm:$0xff] }
 0x10f   : > { %6390 = vmatprep.mubr.f32.mxu0 %v5219_v61  ;;  %6741 = vmatpush3.bf16.msra.mxu1 %v8943_v29  ;;  %v5237_v61 = vld [vmem:[%s7188_s6 + $0x1a1] sm:$0xff] }
 0x111   : > { %6015 = vmatmul.mubr.f32.gmra.mrb[16].mxu1 %v4948_v58 }
 0x112   : > { %6391 = vmatmul.mubr.msk.f32.vlgmr.msra.gmra.mrb[0].mxu0 %vm7569_vm9, %v5220_v4  ;;  %6017 = vmatprep.mubr.msk.f32.mxu1 %vm8944_vm0, %v4949_v20  ;;  %vm8957_vm9 = vnez %v8956_v50  ;;  %vm8963_vm0 = vnez %v8863_v43  ;;  %v5245_v43 = vld [vmem:[%s7188_s6 + $0x1e1] sm:$0xff]  ;;  %v8557_v4 = vld [vmem:[%s8652_s2] ss:$0 sm:$0xff] }
 0x113   : > { %6393 = vmatprep.mubr.f32.mxu0 %v5221_v54 }
 0x115   : > { %6018 = vmatmul.mubr.f32.gmra.mrb[18].mxu1 %v4950_v32 }
 0x116   : > { %6394 = vmatmul.mubr.msk.f32.gmra.mrb[2].mxu0 %vm8945_vm1, %v5222_v1  ;;  %6020 = vmatprep.mubr.msk.f32.mxu1 %vm8946_vm2, %v4951_v25  ;;  %vm8964_vm1 = vnez %v8866_v42  ;;  %vm8965_vm2 = vnez %v8869_v49  ;;  %v5248_v42 = vld [vmem:[%s7188_s6 + $0x1f9] sm:$0xff]  ;;  %v5250_v49 = vld [vmem:[%s7188_s6 + $0x209] sm:$0xff] }
 0x117   : > { %6396 = vmatprep.mubr.f32.mxu0 %v5223_v3 }
 0x119   : > { %6021 = vmatmul.mubr.f32.gmra.mrb[20].mxu1 %v4952_v62 }
 0x11a   : > { %6397 = vmatmul.mubr.msk.f32.gmra.mrb[4].mxu0 %vm8947_vm3, %v5224_v19  ;;  %6023 = vmatprep.mubr.msk.f32.mxu1 %vm8948_vm4, %v4953_v47 }
 0x11b   : > { %6399 = vmatprep.mubr.f32.mxu0 %v5225_v7 }
 0x11d   : > { %6024 = vmatmul.mubr.f32.gmra.mrb[22].mxu1 %v4954_v48 }
 0x11e   : > { %6400 = vmatmul.mubr.msk.f32.gmra.mrb[6].mxu0 %vm8949_vm5, %v5226_v11  ;;  %6026 = vmatprep.mubr.msk.f32.mxu1 %vm8950_vm6, %v4955_v0 }
 0x11f   : > { %6402 = vmatprep.mubr.f32.mxu0 %v5227_v18 }
 0x121   : > { %6027 = vmatmul.mubr.f32.gmra.mrb[24].mxu1 %v4956_v46 }
 0x122   : > { %6403 = vmatmul.mubr.msk.f32.gmra.mrb[8].mxu0 %vm8903_vm11, %v5228_v24  ;;  %6029 = vmatprep.mubr.msk.f32.mxu1 %vm8953_vm7, %v4957_v22  ;;  %vm8960_vm11 = vnez %v8959_v27 }
 0x123   : > { %6405 = vmatprep.mubr.f32.mxu0 %v5229_v52 }
 0x125   : > { %6030 = vmatmul.mubr.f32.gmra.mrb[26].mxu1 %v4958_v8 }
 0x126   : > { %6406 = vmatmul.mubr.msk.f32.gmra.mrb[10].mxu0 %vm8955_vm8, %v5230_v57  ;;  %6032 = vmatprep.mubr.msk.f32.mxu1 %vm8957_vm9, %v4959_v16 }
 0x127   : > { %6408 = vmatprep.mubr.f32.mxu0 %v5231_v55 }
 0x129   : > { %6033 = vmatmul.mubr.f32.gmra.mrb[28].mxu1 %v4960_v5 }
 0x12a   : > { %6409 = vmatmul.mubr.msk.f32.gmra.mrb[12].mxu0 %vm7786_vm13, %v5232_v33  ;;  %6035 = vmatprep.mubr.msk.f32.mxu1 %vm8920_vm12, %v8958_v51  ;;  %vm8961_vm13 = vnez %v8857_v14  ;;  %vm8962_vm12 = vnez %v8860_v35  ;;  %v5241_v14 = vld [vmem:[%s7188_s6 + $0x1c1] sm:$0xff]  ;;  %v5243_v35 = vld [vmem:[%s7188_s6 + $0x1d1] sm:$0xff] }
 0x12b   : > { %6411 = vmatprep.mubr.f32.mxu0 %v5233_v15 }
 0x12d   : > { %6036 = vmatmul.mubr.f32.gmra.mrb[30].mxu1 %v8257_v45  ;;  %v5238_v45 = vld [vmem:[%s7188_s6 + $0x1a9] sm:$0xff] }
 0x12e   : > { %6412 = vmatmul.mubr.msk.f32.gmra.mrb[14].mxu0 %vm8960_vm11, %v5234_v30  ;;  %6094 = vmatprep.mubr.f32.mxu1 %v8026_v38  ;;  %v5240_v38 = vld [vmem:[%s7188_s6 + $0x1b9] sm:$0xff] }
 0x12f   : > { %6414 = vmatprep.mubr.f32.mxu0 %v5235_v17 }
 0x131   : > { %6095 = vmatmul.mubr.f32.vlgmr.msra.gmra.mrb[16].mxu1 %v8039_v23  ;;  %v5242_v23 = vld [vmem:[%s7188_s6 + $0x1c9] sm:$0xff] }
 0x132   : > { %6415 = vmatmul.mubr.msk.f32.gmra.mrb[16].mxu0 %vm8961_vm13, %v5236_v63  ;;  %6097 = vmatprep.mubr.f32.mxu1 %v8046_v26  ;;  %v5244_v26 = vld [vmem:[%s7188_s6 + $0x1d9] sm:$0xff] }
 0x133   : > { %6417 = vmatprep.mubr.f32.mxu0 %v5237_v61 }
 0x135   : > { %6098 = vmatmul.mubr.f32.gmra.mrb[18].mxu1 %v8058_v40  ;;  %v5246_v40 = vld [vmem:[%s7188_s6 + $0x1e9] sm:$0xff] }
 0x136   : > { %6418 = vmatmul.mubr.msk.f32.gmra.mrb[18].mxu0 %vm8962_vm12, %v5238_v45  ;;  %6100 = vmatprep.mubr.f32.mxu1 %v8064_v53  ;;  %v5247_v53 = vld [vmem:[%s7188_s6 + $0x1f1] sm:$0xff] }
 0x137   : > { %6420 = vmatprep.mubr.f32.mxu0 %v5239_v37 }
 0x139   : > { %6101 = vmatmul.mubr.f32.gmra.mrb[20].mxu1 %v8076_v56  ;;  %v5249_v56 = vld [vmem:[%s7188_s6 + $0x201] sm:$0xff] }
 0x13a   : > { %6421 = vmatmul.mubr.msk.f32.gmra.mrb[20].mxu0 %vm8963_vm0, %v5240_v38  ;;  %6103 = vmatprep.mubr.f32.mxu1 %v8082_v12 }
 0x13b   : > { %6423 = vmatprep.mubr.f32.mxu0 %v5241_v14 }
 0x13d   : > { %6104 = vmatmul.mubr.f32.gmra.mrb[22].mxu1 %v8094_v6 }
 0x13e   : > { %6424 = vmatmul.mubr.msk.f32.gmra.mrb[22].mxu0 %vm8964_vm1, %v5242_v23  ;;  %6106 = vmatprep.mubr.f32.mxu1 %v8100_v28 }
 0x13f   : > { %6426 = vmatprep.mubr.f32.mxu0 %v5243_v35 }
 0x141   : > { %6107 = vmatmul.mubr.f32.gmra.mrb[24].mxu1 %v8112_v31 }
 0x142   : > { %6427 = vmatmul.mubr.msk.f32.gmra.mrb[24].mxu0 %vm8965_vm2, %v5244_v26  ;;  %6109 = vmatprep.mubr.f32.mxu1 %v8118_v59 }
 0x143   : > { %6429 = vmatprep.mubr.f32.mxu0 %v5245_v43 }
 0x145   : > { %6110 = vmatmul.mubr.f32.gmra.mrb[26].mxu1 %v8130_v60 }
 0x146   : > { %6430 = vmatmul.mubr.msk.f32.gmra.mrb[26].mxu0 %vm8936_vm10, %v5246_v40  ;;  %6112 = vmatprep.mubr.f32.mxu1 %v8136_v34  ;;  %vm4603_vm10 = vcmask 1040384  }
 0x147   : > { %6432 = vmatprep.mubr.f32.mxu0 %v5247_v53 }
 0x149   : > { %6113 = vmatmul.mubr.f32.gmra.mrb[28].mxu1 %v8148_v36 }
 0x14a   : > { %6433 = vmatmul.mubr.msk.f32.gmra.mrb[28].mxu0 %vm7986_vm14, %v5248_v42  ;;  %6115 = vmatprep.mubr.f32.mxu1 %v8409_v10 }
 0x14b   : > { %6435 = vmatprep.mubr.f32.mxu0 %v5249_v56 }
 0x14d   : > { %6116 = vmatmul.mubr.f32.gmra.mrb[30].mxu1 %v8418_v9 }
 0x14e   : > { %6436 = vmatmul.mubr.msk.f32.gmra.mrb[30].mxu0 %vm8005_vm15, %v5250_v49 }
 0x1c4   : > { %v5992_v41 = vpop.f32.mrb[0].mxu1 }
 0x1c5   : > { %v2253_v12 = vpop.f32.mrb[1].mxu1  ;;  %v6742_v54 = vadd.f32 %v5992_v41, %v8557_v4 }
 0x1c6   : > { %v6744_v32 = vadd.f32 %v8557_v4, %v2253_v12 }
 0x1c8   : > { %v5995_v6 = vpop.f32.mrb[2].mxu1 }
 0x1c9   : > { %v2263_v28 = vpop.f32.mrb[3].mxu1  ;;  %v6746_v19 = vadd.f32 %v5995_v6, %v8557_v4 }
 0x1ca   : > { %v6748_v7 = vadd.f32 %v8557_v4, %v2263_v28 }
 0x1cc   : > { %v5998_v31 = vpop.f32.mrb[4].mxu1 }
 0x1cd   : > { %v2273_v59 = vpop.f32.mrb[5].mxu1  ;;  %v6750_v52 = vadd.f32 %v5998_v31, %v8557_v4 }
 0x1ce   : > { %v6752_v2 = vadd.f32 %v8557_v4, %v2273_v59 }
 0x1d0   : > { %v6001_v60 = vpop.f32.mrb[6].mxu1 }
 0x1d1   : > { %v2283_v34 = vpop.f32.mrb[7].mxu1  ;;  %v6754_v15 = vadd.f32 %v6001_v60, %v8557_v4 }
 0x1d2   : > { %v6756_v51 = vadd.f32 %v8557_v4, %v2283_v34 }
 0x1d4   : > { %v6004_v13 = vpop.f32.mrb[8].mxu1 }
 0x1d5   : > { %v2293_v36 = vpop.f32.mrb[9].mxu1  ;;  %v6758_v35 = vadd.f32 %v6004_v13, %v8557_v4 }
 0x1d6   : > { %v6760_v26 = vadd.f32 %v8557_v4, %v2293_v36 }
 0x1d8   : > { %v8544_v29 = vpop.f32.mrb[10].mxu1 }
 0x1d9   : > { %v8546_v10 = vpop.f32.mrb[11].mxu1  ;;  %v6762_v31 = vadd.f32 %v8544_v29, %v8557_v4 }
 0x1da   : > { %v6764_v59 = vadd.f32 %v8557_v4, %v8546_v10 }
 0x1dc   : > { %v8548_v58 = vpop.f32.mrb[12].mxu1 }
 0x1dd   : > { %v8550_v9 = vpop.f32.mrb[13].mxu1  ;;  %v6766_v29 = vadd.f32 %v8548_v58, %v8557_v4 }
 0x1de   : > { %v6768_v10 = vadd.f32 %v8557_v4, %v8550_v9 }
 0x1e0   : > { %v8552_v21 = vpop.f32.mrb[14].mxu1 }
 0x1e1   : > { %v8559_v20 = vpop.f32.mrb[15].mxu1  ;;  %v6770_v58 = vadd.f32 %v8552_v21, %v8557_v4 }
 0x1e2   : > { %v6772_v9 = vadd.f32 %v8557_v4, %v8559_v20 }
 0x1e5   : > { %v6392_v1 = vpop.f32.mrb[0].mxu0 }
 0x1e6   : > { %v6743_v25 = vadd.f32 %v6742_v54, %v6392_v1  ;;  %v4210_v3 = vpop.f32.mrb[1].mxu0 }
 0x1e7   : > { %v6745_v62 = vadd.f32 %v6744_v32, %v4210_v3 }
 0x1e8   : > { %4466 = vst [vmem:[%s8567_s19 + $0x8] sm:$0xff] %v6743_v25  ;;  %v4535_v47 = vmul.f32 %v6743_v25, %v6743_v25 }
 0x1e9   : > { %4465 = vst [vmem:[%s8567_s19] sm:$0xff] %v6745_v62  ;;  %v4497_v48 = vadd.f32 %v6745_v62, %v6743_v25  ;;  %v4534_v11 = vmul.f32 %v6745_v62, %v6745_v62  ;;  %v6395_v0 = vpop.f32.mrb[2].mxu0 }
 0x1ea   : > { %v6747_v18 = vadd.f32 %v6746_v19, %v6395_v0  ;;  %v4220_v46 = vpop.f32.mrb[3].mxu0 }
 0x1eb   : > { %v4566_v24 = vadd.f32 %v4535_v47, %v4534_v11  ;;  %v6749_v22 = vadd.f32 %v6748_v7, %v4220_v46 }
 0x1ec   : > { %4468 = vst [vmem:[%s8567_s19 + $0x18] sm:$0xff] %v6747_v18  ;;  %v4537_v44 = vmul.f32 %v6747_v18, %v6747_v18 }
 0x1ed   : > { %4467 = vst [vmem:[%s8567_s19 + $0x10] sm:$0xff] %v6749_v22  ;;  %v4498_v39 = vadd.f32 %v6749_v22, %v4497_v48  ;;  %v4536_v8 = vmul.f32 %v6749_v22, %v6749_v22  ;;  %v6398_v57 = vpop.f32.mrb[4].mxu0 }
 0x1ee   : > { %v6751_v16 = vadd.f32 %v6750_v52, %v6398_v57  ;;  %v4230_v55 = vpop.f32.mrb[5].mxu0 }
 0x1ef   : > { %v4567_v50 = vadd.f32 %v4566_v24, %v4536_v8  ;;  %v6753_v5 = vadd.f32 %v6752_v2, %v4230_v55  ;;  %v4499_v33 = vadd.f32 %v6747_v18, %v4498_v39 }
 0x1f0   : > { %4470 = vst [vmem:[%s8567_s19 + $0x28] sm:$0xff] %v6751_v16  ;;  %v4539_v37 = vmul.f32 %v6751_v16, %v6751_v16 }
 0x1f1   : > { %4469 = vst [vmem:[%s8567_s19 + $0x20] sm:$0xff] %v6753_v5  ;;  %v4500_v30 = vadd.f32 %v6753_v5, %v4499_v33  ;;  %v4538_v17 = vmul.f32 %v6753_v5, %v6753_v5  ;;  %v4568_v27 = vadd.f32 %v4567_v50, %v4537_v44  ;;  %v6401_v63 = vpop.f32.mrb[6].mxu0 }
 0x1f2   : > { %v6755_v61 = vadd.f32 %v6754_v15, %v6401_v63  ;;  %v4240_v45 = vpop.f32.mrb[7].mxu0 }
 0x1f3   : > { %v4569_v38 = vadd.f32 %v4568_v27, %v4538_v17  ;;  %v6757_v14 = vadd.f32 %v6756_v51, %v4240_v45  ;;  %v4501_v23 = vadd.f32 %v6751_v16, %v4500_v30 }
 0x1f4   : > { %4472 = vst [vmem:[%s8567_s19 + $0x38] sm:$0xff] %v6755_v61  ;;  %v4541_v41 = vmul.f32 %v6755_v61, %v6755_v61 }
 0x1f5   : > { %4471 = vst [vmem:[%s8567_s19 + $0x30] sm:$0xff] %v6757_v14  ;;  %v4502_v43 = vadd.f32 %v6757_v14, %v4501_v23  ;;  %v4540_v40 = vmul.f32 %v6757_v14, %v6757_v14  ;;  %v4570_v53 = vadd.f32 %v4569_v38, %v4539_v37  ;;  %v6404_v42 = vpop.f32.mrb[8].mxu0 }
 0x1f6   : > { %v6759_v56 = vadd.f32 %v6758_v35, %v6404_v42  ;;  %v4250_v49 = vpop.f32.mrb[9].mxu0 }
 0x1f7   : > { %v4571_v12 = vadd.f32 %v4570_v53, %v4540_v40  ;;  %v6761_v6 = vadd.f32 %v6760_v26, %v4250_v49  ;;  %v4503_v28 = vadd.f32 %v6755_v61, %v4502_v43 }
 0x1f8   : > { %4474 = vst [vmem:[%s8567_s19 + $0x48] sm:$0xff] %v6759_v56  ;;  %v4543_v1 = vmul.f32 %v6759_v56, %v6759_v56 }
 0x1f9   : > { %4473 = vst [vmem:[%s8567_s19 + $0x40] sm:$0xff] %v6761_v6  ;;  %v4504_v60 = vadd.f32 %v6761_v6, %v4503_v28  ;;  %v4542_v34 = vmul.f32 %v6761_v6, %v6761_v6  ;;  %v4572_v13 = vadd.f32 %v4571_v12, %v4541_v41  ;;  %v6407_v36 = vpop.f32.mrb[10].mxu0 }
 0x1fa   : > { %v6763_v54 = vadd.f32 %v6762_v31, %v6407_v36  ;;  %v4260_v32 = vpop.f32.mrb[11].mxu0 }
 0x1fb   : > { %v4573_v25 = vadd.f32 %v4572_v13, %v4542_v34  ;;  %v6765_v3 = vadd.f32 %v6764_v59, %v4260_v32  ;;  %v4505_v62 = vadd.f32 %v6759_v56, %v4504_v60 }
 0x1fc   : > { %4476 = vst [vmem:[%s8567_s19 + $0x58] sm:$0xff] %v6763_v54  ;;  %v4545_v18 = vmul.f32 %v6763_v54, %v6763_v54 }
 0x1fd   : > { %4475 = vst [vmem:[%s8567_s19 + $0x50] sm:$0xff] %v6765_v3  ;;  %v4506_v19 = vadd.f32 %v6765_v3, %v4505_v62  ;;  %v4544_v47 = vmul.f32 %v6765_v3, %v6765_v3  ;;  %v4574_v7 = vadd.f32 %v4573_v25, %v4543_v1  ;;  %v6410_v48 = vpop.f32.mrb[12].mxu0 }
 0x1fe   : > { %v6767_v11 = vadd.f32 %v6766_v29, %v6410_v48  ;;  %v4270_v0 = vpop.f32.mrb[13].mxu0 }
 0x1ff   : > { %v4575_v46 = vadd.f32 %v4574_v7, %v4544_v47  ;;  %v6769_v24 = vadd.f32 %v6768_v10, %v4270_v0  ;;  %v4507_v22 = vadd.f32 %v6763_v54, %v4506_v19 }
 0x200   : > { %4478 = vst [vmem:[%s8567_s19 + $0x68] sm:$0xff] %v6767_v11  ;;  %v4547_v55 = vmul.f32 %v6767_v11, %v6767_v11 }
 0x201   : > { %4477 = vst [vmem:[%s8567_s19 + $0x60] sm:$0xff] %v6769_v24  ;;  %v4508_v52 = vadd.f32 %v6769_v24, %v4507_v22  ;;  %v4546_v2 = vmul.f32 %v6769_v24, %v6769_v24  ;;  %v4576_v39 = vadd.f32 %v4575_v46, %v4545_v18  ;;  %v6413_v8 = vpop.f32.mrb[14].mxu0 }
 0x202   : > { %v6771_v57 = vadd.f32 %v6770_v58, %v6413_v8  ;;  %v4280_v16 = vpop.f32.mrb[15].mxu0 }
 0x203   : > { %v4577_v44 = vadd.f32 %v4576_v39, %v4546_v2  ;;  %v6773_v50 = vadd.f32 %v6772_v9, %v4280_v16  ;;  %v4509_v5 = vadd.f32 %v6767_v11, %v4508_v52 }
 0x204   : > { %4480 = vst [vmem:[%s8567_s19 + $0x78] sm:$0xff] %v6771_v57  ;;  %v6096_v33 = vpop.f32.mrb[16].mxu1  ;;  %v4549_v61 = vmul.f32 %v6771_v57, %v6771_v57 }
 0x205   : > { %4479 = vst [vmem:[%s8567_s19 + $0x70] sm:$0xff] %v6773_v50  ;;  %v4510_v21 = vadd.f32 %v6773_v50, %v4509_v5  ;;  %v4548_v15 = vmul.f32 %v6773_v50, %v6773_v50  ;;  %v4578_v51 = vadd.f32 %v4577_v44, %v4547_v55  ;;  %v6774_v20 = vadd.f32 %v6096_v33, %v8557_v4  ;;  %v6416_v30 = vpop.f32.mrb[16].mxu0  ;;  %v2704_v17 = vpop.f32.mrb[17].mxu1 }
 0x206   : > { %v6776_v27 = vadd.f32 %v8557_v4, %v2704_v17  ;;  %v4290_v63 = vpop.f32.mrb[17].mxu0 }
 0x207   : > { %v4579_v45 = vadd.f32 %v4578_v51, %v4548_v15  ;;  %v6775_v37 = vadd.f32 %v6774_v20, %v6416_v30  ;;  %v4511_v38 = vadd.f32 %v6771_v57, %v4510_v21 }
 0x208   : > { %v6777_v14 = vadd.f32 %v6776_v27, %v4290_v63  ;;  %v6099_v23 = vpop.f32.mrb[18].mxu1 }
 0x209   : > { %4482 = vst [vmem:[%s8567_s19 + $0x88] sm:$0xff] %v6775_v37  ;;  %v4580_v35 = vadd.f32 %v4579_v45, %v4549_v61  ;;  %v6778_v26 = vadd.f32 %v6099_v23, %v8557_v4  ;;  %v6419_v43 = vpop.f32.mrb[18].mxu0  ;;  %v2714_v40 = vpop.f32.mrb[19].mxu1  ;;  %v4551_v12 = vmul.f32 %v6775_v37, %v6775_v37 }
 0x20a   : > { %4481 = vst [vmem:[%s8567_s19 + $0x80] sm:$0xff] %v6777_v14  ;;  %v4512_v53 = vadd.f32 %v6777_v14, %v4511_v38  ;;  %v4550_v42 = vmul.f32 %v6777_v14, %v6777_v14  ;;  %v6780_v56 = vadd.f32 %v8557_v4, %v2714_v40  ;;  %v4300_v49 = vpop.f32.mrb[19].mxu0 }
 0x20b   : > { %v6779_v41 = vadd.f32 %v6778_v26, %v6419_v43 }
 0x20c   : > { %v4581_v6 = vadd.f32 %v4580_v35, %v4550_v42  ;;  %v6781_v28 = vadd.f32 %v6780_v56, %v4300_v49  ;;  %v4513_v31 = vadd.f32 %v6775_v37, %v4512_v53  ;;  %v6102_v59 = vpop.f32.mrb[20].mxu1 }
 0x20d   : > { %4484 = vst [vmem:[%s8567_s19 + $0x98] sm:$0xff] %v6779_v41  ;;  %v6782_v60 = vadd.f32 %v6102_v59, %v8557_v4  ;;  %v6422_v34 = vpop.f32.mrb[20].mxu0  ;;  %v2724_v13 = vpop.f32.mrb[21].mxu1  ;;  %v4553_v62 = vmul.f32 %v6779_v41, %v6779_v41 }
 0x20e   : > { %4483 = vst [vmem:[%s8567_s19 + $0x90] sm:$0xff] %v6781_v28  ;;  %v4514_v36 = vadd.f32 %v6781_v28, %v4513_v31  ;;  %v4552_v54 = vmul.f32 %v6781_v28, %v6781_v28  ;;  %v4582_v32 = vadd.f32 %v4581_v6, %v4551_v12  ;;  %v6784_v1 = vadd.f32 %v8557_v4, %v2724_v13  ;;  %v4310_v25 = vpop.f32.mrb[21].mxu0 }
 0x20f   : > { %v6783_v3 = vadd.f32 %v6782_v60, %v6422_v34 }
 0x210   : > { %v4583_v29 = vadd.f32 %v4582_v32, %v4552_v54  ;;  %v6785_v10 = vadd.f32 %v6784_v1, %v4310_v25  ;;  %v4515_v19 = vadd.f32 %v6779_v41, %v4514_v36  ;;  %v6105_v47 = vpop.f32.mrb[22].mxu1 }
 0x211   : > { %4486 = vst [vmem:[%s8567_s19 + $0xa8] sm:$0xff] %v6783_v3  ;;  %v6786_v7 = vadd.f32 %v6105_v47, %v8557_v4  ;;  %v6425_v48 = vpop.f32.mrb[22].mxu0  ;;  %v2734_v11 = vpop.f32.mrb[23].mxu1  ;;  %v4555_v9 = vmul.f32 %v6783_v3, %v6783_v3 }
 0x212   : > { %4485 = vst [vmem:[%s8567_s19 + $0xa0] sm:$0xff] %v6785_v10  ;;  %v4516_v0 = vadd.f32 %v6785_v10, %v4515_v19  ;;  %v4554_v18 = vmul.f32 %v6785_v10, %v6785_v10  ;;  %v4584_v46 = vadd.f32 %v4583_v29, %v4553_v62  ;;  %v6788_v24 = vadd.f32 %v8557_v4, %v2734_v11  ;;  %v4320_v22 = vpop.f32.mrb[23].mxu0 }
 0x213   : > { %v6787_v58 = vadd.f32 %v6786_v7, %v6425_v48 }
 0x214   : > { %v4585_v52 = vadd.f32 %v4584_v46, %v4554_v18  ;;  %v6789_v2 = vadd.f32 %v6788_v24, %v4320_v22  ;;  %v4517_v39 = vadd.f32 %v6783_v3, %v4516_v0  ;;  %v6108_v8 = vpop.f32.mrb[24].mxu1 }
 0x215   : > { %4488 = vst [vmem:[%s8567_s19 + $0xb8] sm:$0xff] %v6787_v58  ;;  %v6790_v57 = vadd.f32 %v6108_v8, %v8557_v4  ;;  %v6428_v16 = vpop.f32.mrb[24].mxu0  ;;  %v2744_v55 = vpop.f32.mrb[25].mxu1  ;;  %v4557_v51 = vmul.f32 %v6787_v58, %v6787_v58 }
 0x216   : > { %4487 = vst [vmem:[%s8567_s19 + $0xb0] sm:$0xff] %v6789_v2  ;;  %v4518_v44 = vadd.f32 %v6789_v2, %v4517_v39  ;;  %v4556_v50 = vmul.f32 %v6789_v2, %v6789_v2  ;;  %v4586_v5 = vadd.f32 %v4585_v52, %v4555_v9  ;;  %v6792_v33 = vadd.f32 %v8557_v4, %v2744_v55  ;;  %v4330_v21 = vpop.f32.mrb[25].mxu0 }
 0x217   : > { %v6791_v15 = vadd.f32 %v6790_v57, %v6428_v16 }
 0x218   : > { %v4587_v20 = vadd.f32 %v4586_v5, %v4556_v50  ;;  %v6793_v30 = vadd.f32 %v6792_v33, %v4330_v21  ;;  %v4519_v17 = vadd.f32 %v6787_v58, %v4518_v44  ;;  %v6111_v27 = vpop.f32.mrb[26].mxu1 }
 0x219   : > { %4490 = vst [vmem:[%s8567_s19 + $0xc8] sm:$0xff] %v6791_v15  ;;  %v6794_v63 = vadd.f32 %v6111_v27, %v8557_v4  ;;  %v6431_v61 = vpop.f32.mrb[26].mxu0  ;;  %v2754_v45 = vpop.f32.mrb[27].mxu1  ;;  %v4559_v43 = vmul.f32 %v6791_v15, %v6791_v15 }
 0x21a   : > { %4489 = vst [vmem:[%s8567_s19 + $0xc0] sm:$0xff] %v6793_v30  ;;  %v4520_v37 = vadd.f32 %v6793_v30, %v4519_v17  ;;  %v4558_v38 = vmul.f32 %v6793_v30, %v6793_v30  ;;  %v4588_v14 = vadd.f32 %v4587_v20, %v4557_v51  ;;  %v6796_v23 = vadd.f32 %v8557_v4, %v2754_v45  ;;  %v4340_v35 = vpop.f32.mrb[27].mxu0 }
 0x21b   : > { %v6795_v26 = vadd.f32 %v6794_v63, %v6431_v61 }
 0x21c   : > { %v4589_v40 = vadd.f32 %v4588_v14, %v4558_v38  ;;  %v6797_v53 = vadd.f32 %v6796_v23, %v4340_v35  ;;  %v4521_v42 = vadd.f32 %v6791_v15, %v4520_v37  ;;  %v6114_v56 = vpop.f32.mrb[28].mxu1 }
 0x21d   : > { %4492 = vst [vmem:[%s8567_s19 + $0xd8] sm:$0xff] %v6795_v26  ;;  %v6798_v49 = vadd.f32 %v6114_v56, %v8557_v4  ;;  %v6434_v41 = vpop.f32.mrb[28].mxu0  ;;  %v2764_v12 = vpop.f32.mrb[29].mxu1  ;;  %v4561_v13 = vmul.f32 %v6795_v26, %v6795_v26 }
 0x21e   : > { %4491 = vst [vmem:[%s8567_s19 + $0xd0] sm:$0xff] %v6797_v53  ;;  %v4522_v6 = vadd.f32 %v6797_v53, %v4521_v42  ;;  %v4560_v28 = vmul.f32 %v6797_v53, %v6797_v53  ;;  %v4590_v31 = vadd.f32 %v4589_v40, %v4559_v43  ;;  %v6800_v59 = vadd.f32 %v8557_v4, %v2764_v12  ;;  %v4350_v60 = vpop.f32.mrb[29].mxu0 }
 0x21f   : > { %v6799_v34 = vadd.f32 %v6798_v49, %v6434_v41 }
 0x220   : > { %v4591_v36 = vadd.f32 %v4590_v31, %v4560_v28  ;;  %v6801_v54 = vadd.f32 %v6800_v59, %v4350_v60  ;;  %v4523_v32 = vadd.f32 %v6795_v26, %v4522_v6  ;;  %v6117_v1 = vpop.f32.mrb[30].mxu1 }
 0x221   : > { %4494 = vst [vmem:[%s8567_s19 + $0xe8] sm:$0xff] %v6799_v34  ;;  %v6802_v25 = vadd.f32 %v6117_v1, %v8557_v4  ;;  %v6437_v3 = vpop.f32.mrb[30].mxu0  ;;  %v2774_v62 = vpop.f32.mrb[31].mxu1  ;;  %v4563_v11 = vmul.f32 %v6799_v34, %v6799_v34 }
 0x222   : > { %4493 = vst [vmem:[%s8567_s19 + $0xe0] sm:$0xff] %v6801_v54  ;;  %v4524_v29 = vadd.f32 %v6801_v54, %v4523_v32  ;;  %v4562_v10 = vmul.f32 %v6801_v54, %v6801_v54  ;;  %v4592_v19 = vadd.f32 %v4591_v36, %v4561_v13  ;;  %v6804_v47 = vadd.f32 %v8557_v4, %v2774_v62  ;;  %v4360_v7 = vpop.f32.mrb[31].mxu0 }
 0x223   : > { %v6803_v48 = vadd.f32 %v6802_v25, %v6437_v3 }
 0x224   : > { %v4593_v0 = vadd.f32 %v4592_v19, %v4562_v10  ;;  %v6805_v18 = vadd.f32 %v6804_v47, %v4360_v7  ;;  %v4525_v46 = vadd.f32 %v6799_v34, %v4524_v29 }
 0x225   : > { %4496 = vst [vmem:[%s8567_s19 + $0xf8] sm:$0xff] %v6803_v48  ;;  %v4565_v9 = vmul.f32 %v6803_v48, %v6803_v48 }
 0x226   : > { %4495 = vst [vmem:[%s8567_s19 + $0xf0] sm:$0xff] %v6805_v18  ;;  %v4526_v24 = vadd.f32 %v6805_v18, %v4525_v46  ;;  %v4564_v22 = vmul.f32 %v6805_v18, %v6805_v18  ;;  %v4594_v58 = vadd.f32 %v4593_v0, %v4563_v11 }
 0x228   : > { %v4527_v52 = vadd.f32 %v6803_v48, %v4526_v24  ;;  %v4595_v2 = vadd.f32 %v4594_v58, %v4564_v22 }
 0x22a   : > { %v4528_v39 = vrot.slane %v4527_v52, 4  ;;  %v4596_v8 = vadd.f32 %v4595_v2, %v4565_v9 }
 0x22c   : > { %v4529_v57 = vadd.f32 %v4528_v39, %v4527_v52  ;;  %v4597_v16 = vrot.slane %v4596_v8, 4 }
 0x22e   : > { %v4530_v4 = vrot.slane %v4529_v57, 2  ;;  %v4598_v55 = vadd.f32 %v4597_v16, %v4596_v8 }
 0x230   : > { %v4531_v44 = vadd.f32 %v4530_v4, %v4529_v57  ;;  %v4599_v50 = vrot.slane %v4598_v55, 2 }
 0x232   : > { %v4532_v5 = vrot.slane %v4531_v44, 1  ;;  %v4600_v33 = vadd.f32 %v4599_v50, %v4598_v55 }
 0x234   : > { %v4601_v21 = vrot.slane %v4600_v33, 1  ;;  %v4533_v15 = vadd.f32 %v4532_v5, %v4531_v44 }
 0x236   : > { %v4602_v51 = vadd.f32 %v4601_v21, %v4600_v33 }
 0x238   : > { %v4604_v20 = vsel %vm4603_vm10, %v4533_v15, %v4602_v51 }
 0x239   : > { %4605 = vst [vmem:[%s239_s23] sm:$0x3] %v4604_v20 }
 0x23a PF: > { %s15_s17 = sadd.s32 1, %s7077_s17   ;;  %s8966_s15 = smov %s7073_s16 }
 0x23b   : > { %p12_p5 = scmp.ge.s32.totalorder %s15_s17, 4   ;;  %s8967_s16 = smov %s8969_s18 }
 0x23d   :  { %14 = sbr.rel (!%p12_p5) target bundleno = 2 (0x2), region = 91 }

// kernel: double_conv.4
= control target key start
LH: loop header
LB: loop body
LE: loop exit
PB: predicated region body
PF: predicated region fallthrough
CT: control target
= control target key end

     0   :  { %s7236_s15 = smov 0   ;;  %s7238_s16 = smov 0   ;;  %s8657_s0 = inlined_call_operand.vmem [shape: f32[2,768,4], index: 0, kind: input, shape index: {}]   ;;  %s8658_s1 = inlined_call_operand.vmem [shape: f32[9,4,128], index: 1, kind: input, shape index: {}]   ;;  %s8659_s2 = inlined_call_operand.vmem [shape: f32[1,128], index: 2, kind: input, shape index: {}]   ;;  %s8660_s3 = inlined_call_operand.vmem [shape: f32[2,256,128], index: 3, kind: output, shape index: {0}]   ;;  %s8661_s4 = inlined_call_operand.vmem [shape: f32[2,1,2,128], index: 4, kind: output, shape index: {1}]  }
   0x1   :  { %s7240_s17 = smov 0  }
   0x2 LB: > { %s27_s18 = sadd.s32 1, %s7205_s16  ;;  %p5523_p0 = scmp.ge.s32.totalorder %s7209_s17, 1  ;;  %s7209_s17 = sphi %s7240_s17, %s15_s17   ;;  %s7205_s16 = sphi %s7238_s16, %s9058_s16   ;;  %s7201_s15 = sphi %s7236_s15, %s9057_s15  }
   0x3   : > { %p29_p1 = scmp.ge.s32.totalorder %s27_s18, 2  ;;  %p181_p2 = scmp.lt.s32.totalorder %s7209_s17, 3 }
   0x5   : > { %s9060_s18 = smov (%p29_p1, %s27_s18), 0  ;;  %p182_p3 = pnand %p5523_p0, %p181_p2 }
   0x7   : > { %185 = sbr.rel (%p182_p3) target bundleno = 544 (0x220), region = 32 }
   0xe   : > { %v926_v0 = vld [vmem:[%s8658_s1] sm:$0xf]  ;;  %vm8671_vm0 = vcmask 1043456   ;;  %v7260_v1 = vld [vmem:[%s8658_s1 + $0x10] sm:$0xf]  ;;  %p218_p4 = scmp.lt.s32.totalorder %s7201_s15, 1  ;;  %v240_v2 = vlaneseq }
   0xf   : > { %8808 = vst [vmem:[#allocation3_spill] sm:$0xff] %v7260_v1  ;;  %6422 = vmatprep.subr.msk.mxu1 %vm8671_vm0, %v926_v0  ;;  %6622 = vmatprep.subr.msk.mxu0 %vm8671_vm0, %v7260_v1  ;;  %v5626_v3 = vld [vmem:[%s8658_s1 + $0x4] sm:$0xf]  ;;  %v5890_v4 = vld [vmem:[%s8658_s1 + $0x14] sm:$0xf]  ;;  %vm927_vm1 = vcmask 31744  }
  0x10   : > { %6423 = vmatpush3.msk.msra.mxu1 %vm8671_vm0, %v926_v0  ;;  %6623 = vmatpush3.msk.msra.mxu0 %vm8671_vm0, %v7260_v1  ;;  %s9062_s15 = smov (!%p218_p4, %s7201_s15), 1  ;;  %v7276_v5 = vshrl.u32 %v240_v2, 7  ;;  %v8809_v10 = vmov 0  ;;  %v8811_v19 = vmov 0  ;;  %v7327_v25 = vld [vmem:[%s8658_s1 + $0x18] sm:$0xf] }
  0x11   : > { %6472 = vmatprep.subr.msk.mxu1 %vm8671_vm0, %v5626_v3  ;;  %6672 = vmatprep.subr.msk.mxu0 %vm8671_vm0, %v5890_v4  ;;  %s7162_s27 = smul.u32 768, %s9062_s15  ;;  %v7341_v28 = vld [vmem:[%s8658_s1 + $0x8] sm:$0xf]  ;;  %s6124_s21 = sshll.u32 %s9062_s15, 8 }
  0x12   : > { %v277_v6 = vand.u32 15, %v7276_v5  ;;  %v243_v7 = vadd.s32 16, %v7276_v5  ;;  %v245_v8 = vadd.s32 32, %v7276_v5  ;;  %v247_v9 = vadd.s32 48, %v7276_v5  ;;  %s8574_s24 = scalar_lea.vmem %s8660_s3, %s6124_s21  ;;  %s5527_s25 = sshll.u32 %s9062_s15, 1 }
  0x13   : > { %s7288_s30 = scalar_lea.vmem %s8657_s0, %s7162_s27  ;;  %v249_v24 = vadd.s32 64, %v7276_v5  ;;  %v251_v35 = vadd.s32 80, %v7276_v5  ;;  %v253_v43 = vadd.s32 96, %v7276_v5  ;;  %v255_v51 = vadd.s32 112, %v7276_v5  ;;  %s239_s28 = scalar_lea.vmem %s8661_s4, %s5527_s25 }
  0x14   : > { %vm7290_vm2 = vcmp.ne.s32.totalorder %v277_v6, 0  ;;  %v291_v11 = vand.u32 15, %v243_v7  ;;  %v305_v12 = vand.u32 15, %v245_v8  ;;  %v7295_v13 = vld [vmem:[%s7288_s30 + $0x100] sm:$0xff]  ;;  %v5529_v14 = vld [vmem:[%s7288_s30 + $0xef] sm:$0xff]  ;;  %v5530_v17 = vld [vmem:[%s7288_s30 + $0xf7] sm:$0xff] }
  0x15   : > { %v8810_v10 = vsel %vm7290_vm2, 4294967295, %v8809_v10  ;;  %v7299_v15 = vld [vmem:[%s7288_s30 + $0x108] sm:$0xff]  ;;  %6624 = vmatprep.mubr.msk.f32.mxu0 %vm927_vm1, %v7295_v13  ;;  %v862_v16 = vsel %vm7290_vm2, %v5529_v14, 0.0  ;;  %v7307_v18 = vld [vmem:[%s7288_s30 + $0x110] sm:$0xff]  ;;  %v5531_v20 = vld [vmem:[%s7288_s30 + $0xff] sm:$0xff]  ;;  %v319_v23 = vand.u32 15, %v247_v9 }
  0x16   : > { %vm7309_vm3 = vcmp.ne.s32.totalorder %v291_v11, 0  ;;  %6424 = vmatprep.mubr.msk.f32.mxu1 %vm927_vm1, %v862_v16  ;;  %6625 = vmatmul.mubr.msk.f32.vlgmr.msra.gmra.mrb[0].mxu0 %vm927_vm1, %v7299_v15  ;;  %vm7319_vm4 = vcmp.ne.s32.totalorder %v305_v12, 0  ;;  %v7333_v26 = vld [vmem:[%s7288_s30 + $0x118] sm:$0xff]  ;;  %v7336_v27 = vld [vmem:[%s7288_s30 + $0x10f] sm:$0xff]  ;;  %v5532_v29 = vld [vmem:[%s7288_s30 + $0x107] sm:$0xff]  ;;  %v333_v34 = vand.u32 15, %v249_v24 }
  0x17   : > { %v8812_v19 = vsel %vm7309_vm3, 4294967295, %v8811_v19  ;;  %v864_v21 = vsel %vm7309_vm3, %v5531_v20, 0.0  ;;  %6425 = vmatmul.mubr.msk.f32.vlgmr.msra.gmra.mrb[0].mxu1 %vm927_vm1, %v5530_v17  ;;  %6627 = vmatprep.mubr.msk.f32.mxu0 %vm927_vm1, %v7307_v18  ;;  %v7347_v30 = vld [vmem:[%s7288_s30 + $0x120] sm:$0xff]  ;;  %v866_v31 = vsel %vm7319_vm4, %v7336_v27, 0.0  ;;  %vm7357_vm5 = vcmp.ne.s32.totalorder %v319_v23, 0  ;;  %v7371_v36 = vld [vmem:[%s7288_s30 + $0x128] sm:$0xff] }
  0x18   : > { %6473 = vmatpush3.msk.msra.mxu1 %vm8671_vm0, %v5626_v3  ;;  %6673 = vmatpush3.msk.msra.mxu0 %vm8671_vm0, %v5890_v4  ;;  %v7362_v33 = vld [vmem:[%s7288_s30 + $0x11f] sm:$0xff]  ;;  %v7375_v37 = vld [vmem:[%s7288_s30 + $0x117] sm:$0xff]  ;;  %vm7385_vm6 = vcmp.ne.s32.totalorder %v333_v34, 0  ;;  %v7390_v41 = vld [vmem:[%s7288_s30 + $0x12f] sm:$0xff]  ;;  %v347_v42 = vand.u32 15, %v251_v35  ;;  %v361_v50 = vand.u32 15, %v253_v43 }
  0x19   : > { %6427 = vmatprep.mubr.msk.f32.mxu1 %vm927_vm1, %v864_v21  ;;  %6722 = vmatprep.subr.msk.mxu0 %vm8671_vm0, %v7327_v25  ;;  %v7378_v38 = vld [vmem:[%s7288_s30 + $0x130] sm:$0xff]  ;;  %v868_v39 = vsel %vm7357_vm5, %v7362_v33, 0.0  ;;  %v7398_v44 = vld [vmem:[%s7288_s30 + $0x138] sm:$0xff]  ;;  %v7402_v45 = vld [vmem:[%s7288_s30 + $0x127] sm:$0xff]  ;;  %v870_v47 = vsel %vm7385_vm6, %v7390_v41, 0.0  ;;  %v375_v58 = vand.u32 15, %v255_v51 }
  0x1a   : > { %6628 = vmatmul.mubr.msk.f32.gmra.mrb[2].mxu0 %vm927_vm1, %v7333_v26  ;;  %6522 = vmatprep.subr.msk.mxu1 %vm8671_vm0, %v7341_v28  ;;  %v7405_v46 = vld [vmem:[%s7288_s30 + $0x140] sm:$0xff]  ;;  %vm7412_vm7 = vcmp.ne.s32.totalorder %v347_v42, 0  ;;  %v7425_v52 = vld [vmem:[%s7288_s30 + $0x148] sm:$0xff]  ;;  %v7429_v53 = vld [vmem:[%s7288_s30 + $0x137] sm:$0xff]  ;;  %vm7439_vm8 = vcmp.ne.s32.totalorder %v361_v50, 0  ;;  %v257_v59 = vadd.s32 128, %v7276_v5 }
  0x1b   : > { %6428 = vmatmul.mubr.msk.f32.gmra.mrb[2].mxu1 %vm927_vm1, %v5532_v29  ;;  %6630 = vmatprep.mubr.msk.f32.mxu0 %vm927_vm1, %v7347_v30  ;;  %v7417_v49 = vld [vmem:[%s7288_s30 + $0x13f] sm:$0xff]  ;;  %v7432_v54 = vld [vmem:[%s7288_s30 + $0x150] sm:$0xff]  ;;  %v7456_v61 = vld [vmem:[%s7288_s30 + $0x147] sm:$0xff]  ;;  %v242_v63 = vadd.s32 8, %v7276_v5  ;;  %vm7467_vm9 = vcmp.ne.s32.totalorder %v375_v58, 0  ;;  %v259_v6 = vadd.s32 144, %v7276_v5 }
  0x1c   : > { %6430 = vmatprep.mubr.msk.f32.mxu1 %vm927_vm1, %v866_v31  ;;  %v872_v55 = vsel %vm7412_vm7, %v7417_v49, 0.0  ;;  %v7444_v57 = vld [vmem:[%s7288_s30 + $0x14f] sm:$0xff]  ;;  %v7452_v60 = vld [vmem:[%s7288_s30 + $0x158] sm:$0xff]  ;;  %v7459_v62 = vld [vmem:[%s7288_s30 + $0x160] sm:$0xff]  ;;  %v389_v4 = vand.u32 15, %v257_v59  ;;  %v244_v12 = vadd.s32 24, %v7276_v5 }
  0x1d   : > { %v874_v0 = vsel %vm7439_vm8, %v7444_v57, 0.0  ;;  %v7472_v3 = vld [vmem:[%s7288_s30 + $0x15f] sm:$0xff]  ;;  %v7480_v7 = vld [vmem:[%s7288_s30 + $0x168] sm:$0xff]  ;;  %v7484_v8 = vld [vmem:[%s7288_s30 + $0x157] sm:$0xff]  ;;  %v284_v11 = vand.u32 15, %v242_v63  ;;  %v403_v20 = vand.u32 15, %v259_v6 }
  0x1e   : > { %6631 = vmatmul.mubr.msk.f32.gmra.mrb[4].mxu0 %vm927_vm1, %v7371_v36  ;;  %v7487_v9 = vld [vmem:[%s7288_s30 + $0x170] sm:$0xff]  ;;  %v876_v14 = vsel %vm7467_vm9, %v7472_v3, 0.0  ;;  %vm7495_vm10 = vcmp.ne.s32.totalorder %v389_v4, 0  ;;  %v261_v21 = vadd.s32 160, %v7276_v5  ;;  %v7508_v23 = vld [vmem:[%s7288_s30 + $0x178] sm:$0xff]  ;;  %v7512_v24 = vld [vmem:[%s7288_s30 + $0x167] sm:$0xff] }
  0x1f   : > { %6431 = vmatmul.mubr.msk.f32.gmra.mrb[4].mxu1 %vm927_vm1, %v7375_v37  ;;  %6633 = vmatprep.mubr.msk.f32.mxu0 %vm927_vm1, %v7378_v38  ;;  %v7500_v17 = vld [vmem:[%s7288_s30 + $0x16f] sm:$0xff]  ;;  %v7515_v29 = vld [vmem:[%s7288_s30 + $0x101] sm:$0xff]  ;;  %vm7517_vm11 = vcmp.ne.s32.totalorder %v284_v11, 15  ;;  %v8828_v31 = vmov 0  ;;  %v298_v35 = vand.u32 15, %v244_v12  ;;  %vm7530_vm12 = vcmp.ne.s32.totalorder %v403_v20, 0 }
  0x20   : > { %6433 = vmatprep.mubr.msk.f32.mxu1 %vm927_vm1, %v868_v39  ;;  %8827 = vst [vmem:[#allocation4_spill] sm:$0xff] %v7515_v29  ;;  %v8829_v31 = vsel %vm7517_vm11, 4294967295, %v8828_v31  ;;  %v7522_v34 = vld [vmem:[%s7288_s30 + $0x109] sm:$0xff]  ;;  %v246_v39 = vadd.s32 40, %v7276_v5  ;;  %v878_v42 = vsel %vm7495_vm10, %v7500_v17, 0.0  ;;  %v8832_v43 = vmov 0 }
  0x21   : > { %8830 = vst [vmem:[#allocation5_spill] sm:$0xff] %v8829_v31  ;;  %8831 = vst [vmem:[#allocation6_spill] sm:$0xff] %v7522_v34  ;;  %v8833_v43 = vsel %vm7530_vm12, 4294967295, %v8832_v43  ;;  %v417_v50 = vand.u32 15, %v261_v21  ;;  %v263_v51 = vadd.s32 176, %v7276_v5  ;;  %v7546_v58 = vld [vmem:[%s7288_s30 + $0x177] sm:$0xff] }
  0x22   : > { %6634 = vmatmul.mubr.msk.f32.gmra.mrb[6].mxu0 %vm927_vm1, %v7398_v44  ;;  %8834 = vst [vmem:[#allocation7_spill] sm:$0xff] %v8833_v43  ;;  %v7550_v59 = vld [vmem:[%s7288_s30 + $0x111] sm:$0xff]  ;;  %vm7552_vm13 = vcmp.ne.s32.totalorder %v298_v35, 15  ;;  %v8836_v63 = vmov 0  ;;  %v312_v4 = vand.u32 15, %v246_v39  ;;  %v248_v6 = vadd.s32 56, %v7276_v5 }
  0x23   : > { %6434 = vmatmul.mubr.msk.f32.gmra.mrb[6].mxu1 %vm927_vm1, %v7402_v45  ;;  %6636 = vmatprep.mubr.msk.f32.mxu0 %vm927_vm1, %v7405_v46  ;;  %8835 = vst [vmem:[#allocation8_spill] sm:$0xff] %v7550_v59  ;;  %v8837_v63 = vsel %vm7552_vm13, 4294967295, %v8836_v63  ;;  %vm7567_vm14 = vcmp.ne.s32.totalorder %v417_v50, 0  ;;  %v7572_v20 = vld [vmem:[%s7288_s30 + $0x18f] sm:$0xff]  ;;  %v431_v21 = vand.u32 15, %v263_v51  ;;  %v265_v35 = vadd.s32 192, %v7276_v5 }
  0x24   : > { %6436 = vmatprep.mubr.msk.f32.mxu1 %vm927_vm1, %v870_v47  ;;  %v7535_v47 = vld [vmem:[%s7288_s30 + $0x17f] sm:$0xff]  ;;  %8838 = vst [vmem:[#allocation9_spill] sm:$0xff] %v8837_v63  ;;  %8843 = vst [vmem:[#allocation12_spill] sm:$0xff] %v7572_v20  ;;  %v7591_v50 = vld [vmem:[%s7288_s30 + $0x187] sm:$0xff]  ;;  %vm7596_vm15 = vcmp.ne.s32.totalorder %v312_v4, 15  ;;  %v8850_v4 = vmov 0 }
  0x25   : > { %v880_v12 = vsel %vm7530_vm12, %v7535_v47, 0.0  ;;  %v7578_v39 = vld [vmem:[%s8658_s1 + $0x1c] sm:$0xf]  ;;  %8844 = vst [vmem:[#allocation13_spill] sm:$0xff] %v7591_v50  ;;  %v7594_v51 = vld [vmem:[%s7288_s30 + $0x121] sm:$0xff]  ;;  %v7601_v11 = vld [vmem:[%s7288_s30 + $0x129] sm:$0xff] }
  0x26   : > { %6637 = vmatmul.mubr.msk.f32.gmra.mrb[8].mxu0 %vm927_vm1, %v7425_v52  ;;  %8845 = vst [vmem:[#allocation14_spill] sm:$0xff] %v7594_v51  ;;  %8849 = vst [vmem:[#allocation16_spill] sm:$0xff] %v7601_v11  ;;  %v267_v1 = vadd.s32 208, %v7276_v5  ;;  %v7637_v63 = vld [vmem:[%s7288_s30 + $0x139] sm:$0xff]  ;;  %v271_v43 = vadd.s32 240, %v7276_v5  ;;  %v5736_v32 = vld [vmem:[%s7288_s30 + $0x14f] sm:$0xff] }
  0x27   : > { %6437 = vmatmul.mubr.msk.f32.gmra.mrb[8].mxu1 %vm927_vm1, %v7429_v53  ;;  %6639 = vmatprep.mubr.msk.f32.mxu0 %vm927_vm1, %v7432_v54  ;;  %8859 = vst [vmem:[#allocation22_spill] sm:$0xff] %v7637_v63  ;;  %v8943_v31 = vld [vmem:[#allocation3_spill] sm:$0xff] }
  0x28   : > { %6439 = vmatprep.mubr.msk.f32.mxu1 %vm927_vm1, %v872_v55  ;;  %v3304_v55 = vsel %vm7517_vm11, %v7522_v34, 0.0  ;;  %v252_v34 = vadd.s32 88, %v7276_v5  ;;  %v5734_v22 = vld [vmem:[%s7288_s30 + $0x13f] sm:$0xff] }
  0x29   : > { %v5738_v40 = vld [vmem:[%s7288_s30 + $0x15f] sm:$0xff] }
  0x2a   : > { %6640 = vmatmul.mubr.msk.f32.gmra.mrb[10].mxu0 %vm927_vm1, %v7452_v60  ;;  %v2372_v48 = vsel %vm7439_vm8, %v5738_v40, 0.0 }
  0x2b   : > { %6440 = vmatmul.mubr.msk.f32.gmra.mrb[10].mxu1 %vm927_vm1, %v7456_v61  ;;  %6642 = vmatprep.mubr.msk.f32.mxu0 %vm927_vm1, %v7459_v62 }
  0x2c   : > { %6442 = vmatprep.mubr.msk.f32.mxu1 %vm927_vm1, %v874_v0  ;;  %v7557_v0 = vld [vmem:[%s7288_s30 + $0x119] sm:$0xff]  ;;  %v9011_v16 = vld [vmem:[#allocation13_spill] sm:$0xff] }
  0x2d   : > { %8839 = vst [vmem:[#allocation10_spill] sm:$0xff] %v7557_v0 }
  0x2e   : > { %6643 = vmatmul.mubr.msk.f32.gmra.mrb[12].mxu0 %vm927_vm1, %v7480_v7 }
  0x2f   : > { %6443 = vmatmul.mubr.msk.f32.gmra.mrb[12].mxu1 %vm927_vm1, %v7484_v8  ;;  %6645 = vmatprep.mubr.msk.f32.mxu0 %vm927_vm1, %v7487_v9 }
  0x30   : > { %6445 = vmatprep.mubr.msk.f32.mxu1 %vm927_vm1, %v876_v14  ;;  %v8840_v14 = vmov 0 }
  0x31   : > { %v8841_v14 = vsel %vm7567_vm14, 4294967295, %v8840_v14 }
  0x32   : > { %6646 = vmatmul.mubr.msk.f32.gmra.mrb[14].mxu0 %vm927_vm1, %v7508_v23  ;;  %8842 = vst [vmem:[#allocation11_spill] sm:$0xff] %v8841_v14  ;;  %v7630_v14 = vld [vmem:[%s7288_s30 + $0x131] sm:$0xff] }
  0x33   : > { %6446 = vmatmul.mubr.msk.f32.gmra.mrb[14].mxu1 %vm927_vm1, %v7512_v24  ;;  %6674 = vmatprep.mubr.msk.f32.mxu0 %vm927_vm1, %v7515_v29  ;;  %8855 = vst [vmem:[#allocation20_spill] sm:$0xff] %v7630_v14  ;;  %v269_v29 = vadd.s32 224, %v7276_v5 }
  0x34   : > { %6448 = vmatprep.mubr.msk.f32.mxu1 %vm927_vm1, %v878_v42  ;;  %v3306_v42 = vsel %vm7552_vm13, %v7557_v0, 0.0  ;;  %v250_v0 = vadd.s32 72, %v7276_v5  ;;  %vm7610_vm13 = vcmp.ne.s32.totalorder %v431_v21, 0  ;;  %v7627_v21 = vld [vmem:[%s7288_s30 + $0x197] sm:$0xff] }
  0x35   : > { %v8851_v4 = vsel %vm7610_vm13, 4294967295, %v8850_v4  ;;  %8854 = vst [vmem:[#allocation19_spill] sm:$0xff] %v7627_v21 }
  0x36   : > { %6675 = vmatmul.mubr.msk.f32.vlgmr.msra.gmra.mrb[0].mxu0 %vm927_vm1, %v3304_v55  ;;  %v8846_v55 = vmov 0  ;;  %8852 = vst [vmem:[#allocation17_spill] sm:$0xff] %v8851_v4  ;;  %v7671_v4 = vld [vmem:[%s7288_s30 + $0x149] sm:$0xff] }
  0x37   : > { %6449 = vmatmul.mubr.msk.f32.gmra.mrb[16].mxu1 %vm927_vm1, %v7546_v58  ;;  %6677 = vmatprep.mubr.msk.f32.mxu0 %vm927_vm1, %v7550_v59  ;;  %v8847_v55 = vsel %vm7596_vm15, 4294967295, %v8846_v55  ;;  %v326_v59 = vand.u32 15, %v248_v6  ;;  %v445_v6 = vand.u32 15, %v265_v35  ;;  %v8856_v35 = vmov 0  ;;  %8869 = vst [vmem:[#allocation28_spill] sm:$0xff] %v7671_v4 }
  0x38   : > { %6723 = vmatpush3.msk.msra.mxu0 %vm8671_vm0, %v7327_v25  ;;  %6451 = vmatprep.mubr.msk.f32.mxu1 %vm927_vm1, %v880_v12  ;;  %8848 = vst [vmem:[#allocation15_spill] sm:$0xff] %v8847_v55  ;;  %v882_v25 = vsel %vm7567_vm14, %v7572_v20, 0.0  ;;  %v7615_v12 = vld [vmem:[%s7288_s30 + $0x19f] sm:$0xff]  ;;  %v459_v55 = vand.u32 15, %v267_v1  ;;  %v8866_v1 = vmov 0 }
  0x39   : > { %6772 = vmatprep.subr.msk.mxu0 %vm8671_vm0, %v7578_v39  ;;  %8853 = vst [vmem:[#allocation18_spill] sm:$0xff] %v7615_v12  ;;  %vm7632_vm0 = vcmp.ne.s32.totalorder %v326_v59, 15  ;;  %v7649_v59 = vld [vmem:[%s7288_s30 + $0x1af] sm:$0xff] }
  0x3a   : > { %6678 = vmatmul.mubr.msk.f32.gmra.mrb[2].mxu0 %vm927_vm1, %v3306_v42  ;;  %v3308_v42 = vsel %vm7596_vm15, %v7601_v11, 0.0  ;;  %v8857_v35 = vsel %vm7632_vm0, 4294967295, %v8856_v35  ;;  %vm7644_vm15 = vcmp.ne.s32.totalorder %v445_v6, 0  ;;  %v8860_v11 = vmov 0  ;;  %8863 = vst [vmem:[#allocation24_spill] sm:$0xff] %v7649_v59  ;;  %v7661_v6 = vld [vmem:[%s7288_s30 + $0x1a7] sm:$0xff] }
  0x3b   : > { %6452 = vmatmul.mubr.msk.f32.gmra.mrb[18].mxu1 %vm927_vm1, %v7591_v50  ;;  %6680 = vmatprep.mubr.msk.f32.mxu0 %vm927_vm1, %v7594_v51  ;;  %8858 = vst [vmem:[#allocation21_spill] sm:$0xff] %v8857_v35  ;;  %v340_v51 = vand.u32 15, %v250_v0  ;;  %v8861_v11 = vsel %vm7644_vm15, 4294967295, %v8860_v11  ;;  %v3310_v0 = vsel %vm7632_vm0, %v7637_v63, 0.0  ;;  %8864 = vst [vmem:[#allocation25_spill] sm:$0xff] %v7661_v6  ;;  %vm7678_vm0 = vcmp.ne.s32.totalorder %v459_v55, 0 }
  0x3c   : > { %6454 = vmatprep.mubr.msk.f32.mxu1 %vm927_vm1, %v882_v25  ;;  %v884_v25 = vsel %vm7610_vm13, %v7615_v12, 0.0  ;;  %8862 = vst [vmem:[#allocation23_spill] sm:$0xff] %v8861_v11  ;;  %v8870_v63 = vmov 0  ;;  %v473_v35 = vand.u32 15, %v269_v29  ;;  %v7695_v55 = vld [vmem:[%s7288_s30 + $0x1b7] sm:$0xff]  ;;  %v8876_v29 = vmov 0 }
  0x3d   : > { %vm7666_vm13 = vcmp.ne.s32.totalorder %v340_v51, 15  ;;  %v8871_v63 = vsel %vm7678_vm0, 4294967295, %v8870_v63  ;;  %v7683_v51 = vld [vmem:[%s7288_s30 + $0x1bf] sm:$0xff]  ;;  %8874 = vst [vmem:[#allocation31_spill] sm:$0xff] %v7695_v55 }
  0x3e   : > { %6681 = vmatmul.mubr.msk.f32.gmra.mrb[4].mxu0 %vm927_vm1, %v3308_v42  ;;  %v7664_v42 = vld [vmem:[%s7288_s30 + $0x141] sm:$0xff]  ;;  %v8867_v1 = vsel %vm7666_vm13, 4294967295, %v8866_v1  ;;  %8872 = vst [vmem:[#allocation29_spill] sm:$0xff] %v8871_v63  ;;  %8873 = vst [vmem:[#allocation30_spill] sm:$0xff] %v7683_v51  ;;  %v7705_v11 = vld [vmem:[%s7288_s30 + $0x159] sm:$0xff] }
  0x3f   : > { %6455 = vmatmul.mubr.msk.f32.gmra.mrb[20].mxu1 %vm927_vm1, %v7627_v21  ;;  %6683 = vmatprep.mubr.msk.f32.mxu0 %vm927_vm1, %v7630_v14  ;;  %8865 = vst [vmem:[#allocation26_spill] sm:$0xff] %v7664_v42  ;;  %8868 = vst [vmem:[#allocation27_spill] sm:$0xff] %v8867_v1  ;;  %v354_v14 = vand.u32 15, %v252_v34  ;;  %v254_v21 = vadd.s32 104, %v7276_v5  ;;  %v3312_v34 = vsel %vm7666_vm13, %v7671_v4, 0.0  ;;  %vm7712_vm13 = vcmp.ne.s32.totalorder %v473_v35, 0 }
  0x40   : > { %6457 = vmatprep.mubr.msk.f32.mxu1 %vm927_vm1, %v884_v25  ;;  %v886_v25 = vsel %vm7644_vm15, %v7649_v59, 0.0  ;;  %8879 = vst [vmem:[#allocation34_spill] sm:$0xff] %v7705_v11  ;;  %v8880_v4 = vmov 0  ;;  %v487_v1 = vand.u32 15, %v271_v43  ;;  %v7728_v35 = vld [vmem:[%s7288_s30 + $0x1c7] sm:$0xff]  ;;  %v8886_v43 = vmov 0 }
  0x41   : > { %vm7700_vm15 = vcmp.ne.s32.totalorder %v354_v14, 15  ;;  %v8881_v4 = vsel %vm7712_vm13, 4294967295, %v8880_v4  ;;  %v7717_v14 = vld [vmem:[%s7288_s30 + $0x1cf] sm:$0xff]  ;;  %8884 = vst [vmem:[#allocation37_spill] sm:$0xff] %v7728_v35 }
  0x42   : > { %6684 = vmatmul.mubr.msk.f32.gmra.mrb[6].mxu0 %vm927_vm1, %v3310_v0  ;;  %v7698_v0 = vld [vmem:[%s7288_s30 + $0x151] sm:$0xff]  ;;  %v8877_v29 = vsel %vm7700_vm15, 4294967295, %v8876_v29  ;;  %8882 = vst [vmem:[#allocation35_spill] sm:$0xff] %v8881_v4  ;;  %8883 = vst [vmem:[#allocation36_spill] sm:$0xff] %v7717_v14  ;;  %v7738_v63 = vld [vmem:[%s7288_s30 + $0x169] sm:$0xff] }
  0x43   : > { %6458 = vmatmul.mubr.msk.f32.gmra.mrb[22].mxu1 %vm927_vm1, %v7661_v6  ;;  %6686 = vmatprep.mubr.msk.f32.mxu0 %vm927_vm1, %v7664_v42  ;;  %8875 = vst [vmem:[#allocation32_spill] sm:$0xff] %v7698_v0  ;;  %8878 = vst [vmem:[#allocation33_spill] sm:$0xff] %v8877_v29  ;;  %v368_v42 = vand.u32 15, %v254_v21  ;;  %v256_v6 = vadd.s32 120, %v7276_v5  ;;  %v3314_v21 = vsel %vm7700_vm15, %v7705_v11, 0.0  ;;  %v890_v11 = vsel %vm7712_vm13, %v7717_v14, 0.0 }
  0x44   : > { %6460 = vmatprep.mubr.msk.f32.mxu1 %vm927_vm1, %v886_v25  ;;  %v888_v25 = vsel %vm7678_vm0, %v7683_v51, 0.0  ;;  %8889 = vst [vmem:[#allocation40_spill] sm:$0xff] %v7738_v63  ;;  %vm7745_vm15 = vcmp.ne.s32.totalorder %v487_v1, 0  ;;  %v7750_v29 = vld [vmem:[%s7288_s30 + $0x1df] sm:$0xff]  ;;  %v7764_v1 = vld [vmem:[%s7288_s30 + $0x171] sm:$0xff]  ;;  %v9021_v2 = vld [vmem:[#allocation24_spill] sm:$0xff] }
  0x45   : > { %vm7733_vm0 = vcmp.ne.s32.totalorder %v368_v42, 15  ;;  %8893 = vst [vmem:[#allocation42_spill] sm:$0xff] %v7750_v29  ;;  %v7761_v42 = vld [vmem:[%s7288_s30 + $0x1d7] sm:$0xff]  ;;  %8895 = vst [vmem:[#allocation44_spill] sm:$0xff] %v7764_v1 }
  0x46   : > { %6687 = vmatmul.mubr.msk.f32.gmra.mrb[8].mxu0 %vm927_vm1, %v3312_v34  ;;  %v7731_v34 = vld [vmem:[%s7288_s30 + $0x161] sm:$0xff]  ;;  %v8887_v43 = vsel %vm7733_vm0, 4294967295, %v8886_v43  ;;  %8894 = vst [vmem:[#allocation43_spill] sm:$0xff] %v7761_v42  ;;  %v7771_v4 = vld [vmem:[%s7288_s30 + $0x179] sm:$0xff] }
  0x47   : > { %6461 = vmatmul.mubr.msk.f32.gmra.mrb[24].mxu1 %vm927_vm1, %v7695_v55  ;;  %6689 = vmatprep.mubr.msk.f32.mxu0 %vm927_vm1, %v7698_v0  ;;  %8885 = vst [vmem:[#allocation38_spill] sm:$0xff] %v7731_v34  ;;  %8888 = vst [vmem:[#allocation39_spill] sm:$0xff] %v8887_v43  ;;  %v382_v0 = vand.u32 15, %v256_v6  ;;  %v258_v55 = vadd.s32 136, %v7276_v5  ;;  %v3316_v6 = vsel %vm7733_vm0, %v7738_v63, 0.0  ;;  %v892_v63 = vsel %vm7745_vm15, %v7750_v29, 0.0 }
  0x48   : > { %6463 = vmatprep.mubr.msk.f32.mxu1 %vm927_vm1, %v888_v25  ;;  %v8890_v25 = vmov 0  ;;  %8899 = vst [vmem:[#allocation46_spill] sm:$0xff] %v7771_v4 }
  0x49   : > { %v8891_v25 = vsel %vm7745_vm15, 4294967295, %v8890_v25  ;;  %vm7766_vm13 = vcmp.ne.s32.totalorder %v382_v0, 15  ;;  %v7790_v0 = vld [vmem:[%s7288_s30 + $0x181] sm:$0xff] }
  0x4a   : > { %6690 = vmatmul.mubr.msk.f32.gmra.mrb[10].mxu0 %vm927_vm1, %v3314_v21  ;;  %8892 = vst [vmem:[#allocation41_spill] sm:$0xff] %v8891_v25  ;;  %v8896_v21 = vmov 0  ;;  %8901 = vst [vmem:[#allocation48_spill] sm:$0xff] %v7790_v0  ;;  %v7797_v25 = vld [vmem:[%s7288_s30 + $0x189] sm:$0xff] }
  0x4b   : > { %6464 = vmatmul.mubr.msk.f32.gmra.mrb[26].mxu1 %vm927_vm1, %v7728_v35  ;;  %6692 = vmatprep.mubr.msk.f32.mxu0 %vm927_vm1, %v7731_v34  ;;  %v8897_v21 = vsel %vm7766_vm13, 4294967295, %v8896_v21  ;;  %v396_v34 = vand.u32 15, %v258_v55  ;;  %v260_v35 = vadd.s32 152, %v7276_v5  ;;  %v7787_v55 = vld [vmem:[%s7288_s30 + $0x1e7] sm:$0xff]  ;;  %8904 = vst [vmem:[#allocation49_spill] sm:$0xff] %v7797_v25 }
  0x4c   : > { %6466 = vmatprep.mubr.msk.f32.mxu1 %vm927_vm1, %v890_v11  ;;  %8898 = vst [vmem:[#allocation45_spill] sm:$0xff] %v8897_v21  ;;  %v3318_v11 = vsel %vm7766_vm13, %v7771_v4, 0.0  ;;  %8900 = vst [vmem:[#allocation47_spill] sm:$0xff] %v7787_v55  ;;  %v8906_v4 = vmov 0 }
  0x4d   : > { %vm7792_vm15 = vcmp.ne.s32.totalorder %v396_v34, 15  ;;  %v410_v43 = vand.u32 15, %v260_v35  ;;  %v5595_v35 = vld [vmem:[%s7288_s30 + $0xf8] sm:$0xff] }
  0x4e   : > { %6693 = vmatmul.mubr.msk.f32.gmra.mrb[12].mxu0 %vm927_vm1, %v3316_v6  ;;  %v8902_v6 = vmov 0  ;;  %v7812_v34 = vld [vmem:[%s7288_s30 + $0x191] sm:$0xff] }
  0x4f   : > { %6467 = vmatmul.mubr.msk.f32.gmra.mrb[28].mxu1 %vm927_vm1, %v7761_v42  ;;  %6695 = vmatprep.mubr.msk.f32.mxu0 %vm927_vm1, %v7764_v1  ;;  %v8903_v6 = vsel %vm7792_vm15, 4294967295, %v8902_v6  ;;  %v262_v1 = vadd.s32 168, %v7276_v5  ;;  %v5594_v42 = vld [vmem:[%s7288_s30 + $0xf0] sm:$0xff]  ;;  %8905 = vst [vmem:[#allocation50_spill] sm:$0xff] %v7812_v34  ;;  %vm7814_vm13 = vcmp.ne.s32.totalorder %v410_v43, 15 }
  0x50   : > { %6469 = vmatprep.mubr.msk.f32.mxu1 %vm927_vm1, %v892_v63  ;;  %v3320_v63 = vsel %vm7792_vm15, %v7797_v25, 0.0  ;;  %v8907_v4 = vsel %vm7814_vm13, 4294967295, %v8906_v4  ;;  %v7826_v25 = vld [vmem:[%s8658_s1 + $0xc] sm:$0xf]  ;;  %vm8908_vm15 = vcmask 1043456  }
  0x51   : > { %v424_v21 = vand.u32 15, %v262_v1  ;;  %v8910_v1 = vmov 0 }
  0x52   : > { %6696 = vmatmul.mubr.msk.f32.gmra.mrb[14].mxu0 %vm927_vm1, %v3318_v11  ;;  %v7819_v11 = vld [vmem:[%s7288_s30 + $0x199] sm:$0xff] }
  0x53   : > { %6470 = vmatmul.mubr.msk.f32.gmra.mrb[30].mxu1 %vm927_vm1, %v7787_v55  ;;  %6698 = vmatprep.mubr.msk.f32.mxu0 %vm927_vm1, %v7790_v0  ;;  %v264_v0 = vadd.s32 184, %v7276_v5  ;;  %v3322_v43 = vsel %vm7814_vm13, %v7819_v11, 0.0  ;;  %vm7841_vm0 = vcmp.ne.s32.totalorder %v424_v21, 15  ;;  %vm8914_vm13 = vmmov %vm8908_vm15  ;;  %v8916_v21 = vmov 0 }
  0x54   : > { %6474 = vmatprep.mubr.msk.f32.mxu1 %vm927_vm1, %v5594_v42  ;;  %v7839_v42 = vld [vmem:[%s7288_s30 + $0x1a1] sm:$0xff]  ;;  %v8911_v1 = vsel %vm7841_vm0, 4294967295, %v8910_v1 }
  0x55   : > { %8909 = vst [vmem:[#allocation51_spill] sm:$0xff] %v7839_v42  ;;  %8912 = vst [vmem:[#allocation52_spill] sm:$0xff] %v8911_v1  ;;  %v270_v1 = vadd.s32 232, %v7276_v5 }
  0x56   : > { %6699 = vmatmul.mubr.msk.f32.gmra.mrb[16].mxu0 %vm927_vm1, %v3320_v63  ;;  %v7846_v63 = vld [vmem:[%s7288_s30 + $0x1a9] sm:$0xff] }
  0x57   : > { %6475 = vmatmul.mubr.msk.f32.vlgmr.msra.gmra.mrb[0].mxu1 %vm927_vm1, %v5595_v35  ;;  %6701 = vmatprep.mubr.msk.f32.mxu0 %vm927_vm1, %v7812_v34  ;;  %8913 = vst [vmem:[#allocation53_spill] sm:$0xff] %v7846_v63  ;;  %v438_v35 = vand.u32 15, %v264_v0  ;;  %v266_v34 = vadd.s32 200, %v7276_v5  ;;  %v7869_v0 = vld [vmem:[%s7288_s30 + $0x1b9] sm:$0xff] }
  0x58   : > { %6523 = vmatpush3.msk.msra.mxu1 %vm8908_vm15, %v7341_v28  ;;  %6477 = vmatprep.mubr.msk.f32.mxu1 %vm927_vm1, %v7295_v13  ;;  %v3324_v13 = vsel %vm7841_vm0, %v7846_v63, 0.0  ;;  %v7862_v28 = vld [vmem:[%s7288_s30 + $0x1b1] sm:$0xff]  ;;  %8919 = vst [vmem:[#allocation56_spill] sm:$0xff] %v7869_v0  ;;  %v8920_v63 = vmov 0 }
  0x59   : > { %6572 = vmatprep.subr.msk.mxu1 %vm8914_vm13, %v7826_v25  ;;  %8915 = vst [vmem:[#allocation54_spill] sm:$0xff] %v7862_v28  ;;  %vm7864_vm13 = vcmp.ne.s32.totalorder %v438_v35, 15 }
  0x5a   : > { %6702 = vmatmul.mubr.msk.f32.gmra.mrb[18].mxu0 %vm927_vm1, %v3322_v43  ;;  %v8917_v21 = vsel %vm7864_vm13, 4294967295, %v8916_v21  ;;  %v268_v43 = vadd.s32 216, %v7276_v5  ;;  %v3326_v35 = vsel %vm7864_vm13, %v7869_v0, 0.0  ;;  %v8923_v0 = vmov 0 }
  0x5b   : > { %6478 = vmatmul.mubr.msk.f32.gmra.mrb[2].mxu1 %vm927_vm1, %v7299_v15  ;;  %6704 = vmatprep.mubr.msk.f32.mxu0 %vm927_vm1, %v7839_v42  ;;  %8918 = vst [vmem:[#allocation55_spill] sm:$0xff] %v8917_v21  ;;  %v452_v15 = vand.u32 15, %v266_v34  ;;  %v7883_v34 = vld [vmem:[%s7288_s30 + $0x1c1] sm:$0xff]  ;;  %v272_v21 = vadd.s32 248, %v7276_v5  ;;  %v8926_v5 = vmov 0 }
  0x5c   : > { %6480 = vmatprep.mubr.msk.f32.mxu1 %vm927_vm1, %v7307_v18  ;;  %v466_v42 = vand.u32 15, %v268_v43  ;;  %v7904_v43 = vld [vmem:[%s7288_s30 + $0x1d1] sm:$0xff] }
  0x5d   : > { %vm7885_vm15 = vcmp.ne.s32.totalorder %v452_v15, 15 }
  0x5e   : > { %6705 = vmatmul.mubr.msk.f32.gmra.mrb[20].mxu0 %vm927_vm1, %v3324_v13  ;;  %v8921_v63 = vsel %vm7885_vm15, 4294967295, %v8920_v63  ;;  %v7890_v13 = vld [vmem:[%s7288_s30 + $0x1c9] sm:$0xff]  ;;  %vm7906_vm13 = vcmp.ne.s32.totalorder %v466_v42, 15 }
  0x5f   : > { %6481 = vmatmul.mubr.msk.f32.gmra.mrb[4].mxu1 %vm927_vm1, %v7333_v26  ;;  %6707 = vmatprep.mubr.msk.f32.mxu0 %vm927_vm1, %v7862_v28  ;;  %8922 = vst [vmem:[#allocation57_spill] sm:$0xff] %v7890_v13  ;;  %v3328_v15 = vsel %vm7885_vm15, %v7890_v13, 0.0  ;;  %v8924_v0 = vsel %vm7906_vm13, 4294967295, %v8923_v0  ;;  %v480_v28 = vand.u32 15, %v270_v1  ;;  %v7925_v1 = vld [vmem:[%s7288_s30 + $0x1e1] sm:$0xff]  ;;  %v494_v13 = vand.u32 15, %v272_v21 }
  0x60   : > { %6483 = vmatprep.mubr.msk.f32.mxu1 %vm927_vm1, %v7347_v30 }
  0x61   : > { %vm7927_vm15 = vcmp.ne.s32.totalorder %v480_v28, 15  ;;  %v7945_v28 = vld [vmem:[%s7288_s30 + $0x1f1] sm:$0xff] }
  0x62   : > { %6708 = vmatmul.mubr.msk.f32.gmra.mrb[22].mxu0 %vm927_vm1, %v3326_v35  ;;  %v7911_v35 = vld [vmem:[%s7288_s30 + $0x1d9] sm:$0xff]  ;;  %v8927_v5 = vsel %vm7927_vm15, 4294967295, %v8926_v5  ;;  %8929 = vst [vmem:[#allocation60_spill] sm:$0xff] %v7945_v28 }
  0x63   : > { %6484 = vmatmul.mubr.msk.f32.gmra.mrb[6].mxu1 %vm927_vm1, %v7371_v36  ;;  %6710 = vmatprep.mubr.msk.f32.mxu0 %vm927_vm1, %v7883_v34  ;;  %8925 = vst [vmem:[#allocation58_spill] sm:$0xff] %v7911_v35  ;;  %v3330_v42 = vsel %vm7906_vm13, %v7911_v35, 0.0  ;;  %vm7947_vm13 = vcmp.ne.s32.totalorder %v494_v13, 15  ;;  %v8933_v13 = vsel %vm7290_vm2, %v7336_v27, 0.0  ;;  %v7985_v27 = vld [vmem:[%s8658_s1 + $0x20] sm:$0xf] }
  0x64   : > { %6486 = vmatprep.mubr.msk.f32.mxu1 %vm927_vm1, %v7378_v38  ;;  %vm8934_vm2 = vcmask 1043456  }
  0x66   : > { %6711 = vmatmul.mubr.msk.f32.gmra.mrb[24].mxu0 %vm927_vm1, %v3328_v15  ;;  %v7932_v15 = vld [vmem:[%s7288_s30 + $0x1e9] sm:$0xff] }
  0x67   : > { %6487 = vmatmul.mubr.msk.f32.gmra.mrb[8].mxu1 %vm927_vm1, %v7398_v44  ;;  %6713 = vmatprep.mubr.msk.f32.mxu0 %vm927_vm1, %v7904_v43  ;;  %8928 = vst [vmem:[#allocation59_spill] sm:$0xff] %v7932_v15  ;;  %v3332_v35 = vsel %vm7927_vm15, %v7932_v15, 0.0 }
  0x68   : > { %6489 = vmatprep.mubr.msk.f32.mxu1 %vm927_vm1, %v7405_v46 }
  0x6a   : > { %6714 = vmatmul.mubr.msk.f32.gmra.mrb[26].mxu0 %vm927_vm1, %v3330_v42  ;;  %v7952_v42 = vld [vmem:[%s7288_s30 + $0x1f9] sm:$0xff] }
  0x6b   : > { %6490 = vmatmul.mubr.msk.f32.gmra.mrb[10].mxu1 %vm927_vm1, %v7425_v52  ;;  %6716 = vmatprep.mubr.msk.f32.mxu0 %vm927_vm1, %v7925_v1  ;;  %8932 = vst [vmem:[#allocation61_spill] sm:$0xff] %v7952_v42  ;;  %v3334_v15 = vsel %vm7947_vm13, %v7952_v42, 0.0  ;;  %v7978_v42 = vld [vmem:[%s7288_s30 + $0x180] sm:$0xff] }
  0x6c   : > { %6492 = vmatprep.mubr.msk.f32.mxu1 %vm927_vm1, %v7432_v54 }
  0x6e   : > { %6717 = vmatmul.mubr.msk.f32.gmra.mrb[28].mxu0 %vm927_vm1, %v3332_v35  ;;  %v3796_v35 = vsel %vm7309_vm3, %v7362_v33, 0.0  ;;  %v7995_v33 = vld [vmem:[%s7288_s30 + $0x188] sm:$0xff]  ;;  %vm8935_vm3 = vmmov %vm8934_vm2 }
  0x6f   : > { %6493 = vmatmul.mubr.msk.f32.gmra.mrb[12].mxu1 %vm927_vm1, %v7452_v60  ;;  %6719 = vmatprep.mubr.msk.f32.mxu0 %vm927_vm1, %v7945_v28  ;;  %v3812_v28 = vsel %vm7530_vm12, %v7615_v12, 0.0  ;;  %v3814_v12 = vsel %vm7567_vm14, %v7649_v59, 0.0  ;;  %vm8944_vm12 = vmmov %vm8934_vm2  ;;  %v8950_v59 = vld [vmem:[#allocation17_spill] sm:$0xff] }
  0x70   : > { %6495 = vmatprep.mubr.msk.f32.mxu1 %vm927_vm1, %v7459_v62  ;;  %vm8951_vm14 = vnez %v8950_v59 }
  0x72   : > { %6720 = vmatmul.mubr.msk.f32.gmra.mrb[30].mxu0 %vm927_vm1, %v3334_v15  ;;  %v8001_v15 = vld [vmem:[%s7288_s30 + $0x190] sm:$0xff] }
  0x73   : > { %6496 = vmatmul.mubr.msk.f32.gmra.mrb[14].mxu1 %vm927_vm1, %v7480_v7  ;;  %6724 = vmatprep.mubr.msk.f32.mxu0 %vm927_vm1, %v8933_v13  ;;  %v8019_v13 = vld [vmem:[%s7288_s30 + $0x1a0] sm:$0xff] }
  0x74   : > { %6498 = vmatprep.mubr.msk.f32.mxu1 %vm927_vm1, %v7487_v9 }
  0x76   : > { %6725 = vmatmul.mubr.msk.f32.vlgmr.msra.gmra.mrb[0].mxu0 %vm927_vm1, %v7375_v37  ;;  %v3798_v37 = vsel %vm7319_vm4, %v7390_v41, 0.0  ;;  %v3800_v41 = vsel %vm7357_vm5, %v7417_v49, 0.0  ;;  %v3802_v49 = vsel %vm7385_vm6, %v7444_v57, 0.0  ;;  %v3804_v57 = vsel %vm7412_vm7, %v7472_v3, 0.0 }
  0x77   : > { %6499 = vmatmul.mubr.msk.f32.gmra.mrb[16].mxu1 %vm927_vm1, %v7508_v23  ;;  %6727 = vmatprep.mubr.msk.f32.mxu0 %vm927_vm1, %v3796_v35  ;;  %v8035_v35 = vld [vmem:[%s7288_s30 + $0x1b0] sm:$0xff]  ;;  %v3806_v3 = vsel %vm7439_vm8, %v7500_v17, 0.0  ;;  %v3808_v17 = vsel %vm7467_vm9, %v7535_v47, 0.0 }
  0x78   : > { %6773 = vmatpush3.msk.msra.mxu0 %vm8934_vm2, %v7578_v39  ;;  %6501 = vmatprep.mubr.msk.f32.mxu1 %vm927_vm1, %v7978_v42  ;;  %v8013_v39 = vld [vmem:[%s7288_s30 + $0x198] sm:$0xff] }
  0x79   : > { %6822 = vmatprep.subr.msk.mxu0 %vm8935_vm3, %v7985_v27  ;;  %v5660_v47 = vld [vmem:[%s7288_s30 + $0xf1] sm:$0xff] }
  0x7a   : > { %6728 = vmatmul.mubr.msk.f32.gmra.mrb[2].mxu0 %vm927_vm1, %v7402_v45  ;;  %v8029_v45 = vld [vmem:[%s7288_s30 + $0x1a8] sm:$0xff] }
  0x7b   : > { %6502 = vmatmul.mubr.msk.f32.gmra.mrb[18].mxu1 %vm927_vm1, %v7995_v33  ;;  %6730 = vmatprep.mubr.msk.f32.mxu0 %vm927_vm1, %v3798_v37  ;;  %v8051_v37 = vld [vmem:[%s7288_s30 + $0x1c0] sm:$0xff] }
  0x7c   : > { %6504 = vmatprep.mubr.msk.f32.mxu1 %vm927_vm1, %v8001_v15 }
  0x7e   : > { %6731 = vmatmul.mubr.msk.f32.gmra.mrb[4].mxu0 %vm927_vm1, %v7429_v53  ;;  %v8045_v53 = vld [vmem:[%s7288_s30 + $0x1b8] sm:$0xff] }
  0x7f   : > { %6505 = vmatmul.mubr.msk.f32.gmra.mrb[20].mxu1 %vm927_vm1, %v8013_v39  ;;  %6733 = vmatprep.mubr.msk.f32.mxu0 %vm927_vm1, %v3800_v41  ;;  %v8067_v41 = vld [vmem:[%s7288_s30 + $0x1d0] sm:$0xff] }
  0x80   : > { %6507 = vmatprep.mubr.msk.f32.mxu1 %vm927_vm1, %v8019_v13 }
  0x82   : > { %6734 = vmatmul.mubr.msk.f32.gmra.mrb[6].mxu0 %vm927_vm1, %v7456_v61  ;;  %v8061_v61 = vld [vmem:[%s7288_s30 + $0x1c8] sm:$0xff] }
  0x83   : > { %6508 = vmatmul.mubr.msk.f32.gmra.mrb[22].mxu1 %vm927_vm1, %v8029_v45  ;;  %6736 = vmatprep.mubr.msk.f32.mxu0 %vm927_vm1, %v3802_v49  ;;  %v8083_v49 = vld [vmem:[%s7288_s30 + $0x1e0] sm:$0xff] }
  0x84   : > { %6510 = vmatprep.mubr.msk.f32.mxu1 %vm927_vm1, %v8035_v35 }
  0x86   : > { %6737 = vmatmul.mubr.msk.f32.gmra.mrb[8].mxu0 %vm927_vm1, %v7484_v8  ;;  %v8077_v8 = vld [vmem:[%s7288_s30 + $0x1d8] sm:$0xff] }
  0x87   : > { %6511 = vmatmul.mubr.msk.f32.gmra.mrb[24].mxu1 %vm927_vm1, %v8045_v53  ;;  %6739 = vmatprep.mubr.msk.f32.mxu0 %vm927_vm1, %v3804_v57  ;;  %v3810_v57 = vsel %vm7495_vm10, %v7572_v20, 0.0  ;;  %v8937_v20 = vld [vmem:[#allocation19_spill] sm:$0xff] }
  0x88   : > { %6513 = vmatprep.mubr.msk.f32.mxu1 %vm927_vm1, %v8051_v37 }
  0x8a   : > { %6740 = vmatmul.mubr.msk.f32.gmra.mrb[10].mxu0 %vm927_vm1, %v7512_v24  ;;  %v8093_v24 = vld [vmem:[%s7288_s30 + $0x1e8] sm:$0xff] }
  0x8b   : > { %6514 = vmatmul.mubr.msk.f32.gmra.mrb[26].mxu1 %vm927_vm1, %v8061_v61  ;;  %6742 = vmatprep.mubr.msk.f32.mxu0 %vm927_vm1, %v3806_v3  ;;  %v5661_v3 = vld [vmem:[%s7288_s30 + $0xf9] sm:$0xff] }
  0x8c   : > { %6516 = vmatprep.mubr.msk.f32.mxu1 %vm927_vm1, %v8067_v41 }
  0x8e   : > { %6743 = vmatmul.mubr.msk.f32.gmra.mrb[12].mxu0 %vm927_vm1, %v7546_v58  ;;  %v1871_v58 = vsel %vm7517_vm11, %v5661_v3, 0.0 }
  0x8f   : > { %6517 = vmatmul.mubr.msk.f32.gmra.mrb[28].mxu1 %vm927_vm1, %v8077_v8  ;;  %6745 = vmatprep.mubr.msk.f32.mxu0 %vm927_vm1, %v3808_v17  ;;  %v8952_v17 = vld [vmem:[#allocation31_spill] sm:$0xff] }
  0x90   : > { %6519 = vmatprep.mubr.msk.f32.mxu1 %vm927_vm1, %v8083_v49 }
  0x92   : > { %6746 = vmatmul.mubr.msk.f32.gmra.mrb[14].mxu0 %vm927_vm1, %v7591_v50  ;;  %v8940_v50 = vld [vmem:[#allocation9_spill] sm:$0xff] }
  0x93   : > { %6520 = vmatmul.mubr.msk.f32.gmra.mrb[30].mxu1 %vm927_vm1, %v8093_v24  ;;  %6748 = vmatprep.mubr.msk.f32.mxu0 %vm927_vm1, %v3810_v57  ;;  %v8938_v57 = vld [vmem:[#allocation4_spill] sm:$0xff]  ;;  %vm8941_vm3 = vnez %v8940_v50  ;;  %v8964_v50 = vld [vmem:[#allocation29_spill] sm:$0xff] }
  0x94   : > { %6524 = vmatprep.mubr.msk.f32.mxu1 %vm927_vm1, %v5660_v47  ;;  %v8939_v47 = vld [vmem:[#allocation6_spill] sm:$0xff] }
  0x95   : > { %v1873_v3 = vsel %vm8941_vm3, %v8939_v47, 0.0 }
  0x96   : > { %6749 = vmatmul.mubr.msk.f32.gmra.mrb[16].mxu0 %vm927_vm1, %v8937_v20  ;;  %v3816_v20 = vsel %vm8951_vm14, %v7683_v51, 0.0  ;;  %v8959_v51 = vld [vmem:[#allocation37_spill] sm:$0xff] }
  0x97   : > { %6525 = vmatmul.mubr.msk.f32.vlgmr.msra.gmra.mrb[0].mxu1 %vm927_vm1, %v1871_v58  ;;  %6751 = vmatprep.mubr.msk.f32.mxu0 %vm927_vm1, %v3812_v28  ;;  %v8945_v58 = vld [vmem:[#allocation25_spill] sm:$0xff]  ;;  %v8947_v28 = vld [vmem:[#allocation10_spill] sm:$0xff] }
  0x98   : > { %6573 = vmatpush3.msk.msra.mxu1 %vm8934_vm2, %v7826_v25  ;;  %6527 = vmatprep.mubr.msk.f32.mxu1 %vm927_vm1, %v8938_v57  ;;  %v8946_v25 = vld [vmem:[#allocation8_spill] sm:$0xff]  ;;  %v8948_v57 = vld [vmem:[#allocation15_spill] sm:$0xff]  ;;  %v4738_v40 = vsel %vm7517_vm11, %v8947_v28, 0.0 }
  0x99   : > { %6872 = vmatprep.subr.msk.mxu1 %vm8944_vm12, %v8943_v31  ;;  %vm8949_vm2 = vnez %v8948_v57  ;;  %v8957_v57 = vld [vmem:[#allocation23_spill] sm:$0xff] }
  0x9a   : > { %6752 = vmatmul.mubr.msk.f32.gmra.mrb[18].mxu0 %vm927_vm1, %v8945_v58  ;;  %v1875_v47 = vsel %vm8949_vm2, %v8947_v28, 0.0  ;;  %vm8958_vm2 = vnez %v8957_v57  ;;  %v9014_v28 = vld [vmem:[#allocation18_spill] sm:$0xff] }
  0x9b   : > { %6528 = vmatmul.mubr.msk.f32.gmra.mrb[2].mxu1 %vm927_vm1, %v1873_v3  ;;  %6754 = vmatprep.mubr.msk.f32.mxu0 %vm927_vm1, %v3814_v12  ;;  %v8953_v12 = vld [vmem:[#allocation14_spill] sm:$0xff]  ;;  %v8954_v3 = vld [vmem:[#allocation16_spill] sm:$0xff]  ;;  %v3818_v59 = vsel %vm8958_vm2, %v7717_v14, 0.0 }
  0x9c   : > { %6530 = vmatprep.mubr.msk.f32.mxu1 %vm927_vm1, %v8946_v25  ;;  %v8955_v25 = vld [vmem:[#allocation21_spill] sm:$0xff] }
  0x9d   : > { %vm8956_vm12 = vnez %v8955_v25  ;;  %v8164_v14 = vld [vmem:[%s7288_s30 + $0x1ef] sm:$0xff] }
  0x9e   : > { %6755 = vmatmul.mubr.msk.f32.gmra.mrb[20].mxu0 %vm927_vm1, %v8952_v17  ;;  %v1877_v58 = vsel %vm8956_vm12, %v8954_v3, 0.0  ;;  %v8962_v17 = vld [vmem:[#allocation27_spill] sm:$0xff]  ;;  %vm8965_vm12 = vnez %v8964_v50  ;;  %8966 = vst [vmem:[#allocation4_spill] sm:$0xff] %v8164_v14 }
  0x9f   : > { %6531 = vmatmul.mubr.msk.f32.gmra.mrb[4].mxu1 %vm927_vm1, %v1875_v47  ;;  %6757 = vmatprep.mubr.msk.f32.mxu0 %vm927_vm1, %v3816_v20  ;;  %v8960_v20 = vld [vmem:[#allocation20_spill] sm:$0xff]  ;;  %v8961_v47 = vld [vmem:[#allocation22_spill] sm:$0xff]  ;;  %vm8963_vm14 = vnez %v8962_v17  ;;  %v3820_v57 = vsel %vm8965_vm12, %v7750_v29, 0.0  ;;  %v8967_v3 = vld [vmem:[#allocation43_spill] sm:$0xff] }
  0xa0   : > { %6533 = vmatprep.mubr.msk.f32.mxu1 %vm927_vm1, %v8953_v12  ;;  %v1879_v25 = vsel %vm8963_vm14, %v8961_v47, 0.0  ;;  %v8972_v50 = vld [vmem:[#allocation35_spill] sm:$0xff] }
  0xa1   : > { %vm8973_vm12 = vnez %v8972_v50  ;;  %v5954_v47 = vld [vmem:[%s7288_s30 + $0x1ff] sm:$0xff]  ;;  %v8982_v50 = vld [vmem:[#allocation45_spill] sm:$0xff] }
  0xa2   : > { %6758 = vmatmul.mubr.msk.f32.gmra.mrb[22].mxu0 %vm927_vm1, %v8959_v51  ;;  %v8970_v51 = vld [vmem:[#allocation33_spill] sm:$0xff]  ;;  %v3822_v29 = vsel %vm8973_vm12, %v8164_v14, 0.0  ;;  %vm8983_vm12 = vnez %v8982_v50 }
  0xa3   : > { %6534 = vmatmul.mubr.msk.f32.gmra.mrb[6].mxu1 %vm927_vm1, %v1877_v58  ;;  %6760 = vmatprep.mubr.msk.f32.mxu0 %vm927_vm1, %v3818_v59  ;;  %v8968_v59 = vld [vmem:[#allocation26_spill] sm:$0xff]  ;;  %v8969_v58 = vld [vmem:[#allocation28_spill] sm:$0xff]  ;;  %vm8971_vm14 = vnez %v8970_v51  ;;  %v8976_v51 = vld [vmem:[#allocation39_spill] sm:$0xff] }
  0xa4   : > { %6536 = vmatprep.mubr.msk.f32.mxu1 %vm927_vm1, %v8960_v20  ;;  %v1881_v17 = vsel %vm8971_vm14, %v8969_v58, 0.0  ;;  %vm8977_vm14 = vnez %v8976_v51 }
  0xa6   : > { %6761 = vmatmul.mubr.msk.f32.gmra.mrb[24].mxu0 %vm927_vm1, %v8967_v3  ;;  %v8975_v3 = vld [vmem:[#allocation34_spill] sm:$0xff] }
  0xa7   : > { %6537 = vmatmul.mubr.msk.f32.gmra.mrb[8].mxu1 %vm927_vm1, %v1879_v25  ;;  %6763 = vmatprep.mubr.msk.f32.mxu0 %vm927_vm1, %v3820_v57  ;;  %v8184_v57 = vld [vmem:[%s7288_s30 + $0x1f7] sm:$0xff]  ;;  %v8974_v25 = vld [vmem:[#allocation32_spill] sm:$0xff]  ;;  %v1883_v58 = vsel %vm8977_vm14, %v8975_v3, 0.0  ;;  %vm8990_vm14 = vnez %v8907_v4 }
  0xa8   : > { %6539 = vmatprep.mubr.msk.f32.mxu1 %vm927_vm1, %v8968_v59  ;;  %v8978_v59 = vld [vmem:[#allocation41_spill] sm:$0xff] }
  0xa9   : > { %vm8979_vm2 = vnez %v8978_v59 }
  0xaa   : > { %6764 = vmatmul.mubr.msk.f32.gmra.mrb[26].mxu0 %vm927_vm1, %v7787_v55  ;;  %v3824_v14 = vsel %vm8979_vm2, %v5954_v47, 0.0  ;;  %v8981_v55 = vld [vmem:[#allocation40_spill] sm:$0xff]  ;;  %vm8986_vm2 = vnez %v8903_v6 }
  0xab   : > { %6540 = vmatmul.mubr.msk.f32.gmra.mrb[10].mxu1 %vm927_vm1, %v1881_v17  ;;  %6766 = vmatprep.mubr.msk.f32.mxu0 %vm927_vm1, %v3822_v29  ;;  %v5955_v29 = vld [vmem:[%s7288_s30 + $0x207] sm:$0xff]  ;;  %v8980_v17 = vld [vmem:[#allocation38_spill] sm:$0xff] }
  0xac   : > { %6542 = vmatprep.mubr.msk.f32.mxu1 %vm927_vm1, %v8974_v25  ;;  %v1885_v25 = vsel %vm8983_vm12, %v8981_v55, 0.0  ;;  %v8984_v47 = vld [vmem:[#allocation44_spill] sm:$0xff]  ;;  %vm8987_vm12 = vcmask 1043456  }
  0xae   : > { %6767 = vmatmul.mubr.msk.f32.gmra.mrb[28].mxu0 %vm927_vm1, %v8184_v57 }
  0xaf   : > { %6543 = vmatmul.mubr.msk.f32.gmra.mrb[12].mxu1 %vm927_vm1, %v1883_v58  ;;  %6769 = vmatprep.mubr.msk.f32.mxu0 %vm927_vm1, %v3824_v14  ;;  %v8985_v58 = vld [vmem:[#allocation46_spill] sm:$0xff] }
  0xb0   : > { %6545 = vmatprep.mubr.msk.f32.mxu1 %vm927_vm1, %v8980_v17  ;;  %v1887_v14 = vsel %vm8986_vm2, %v8985_v58, 0.0 }
  0xb2   : > { %6770 = vmatmul.mubr.msk.f32.gmra.mrb[30].mxu0 %vm927_vm1, %v5955_v29 }
  0xb3   : > { %6546 = vmatmul.mubr.msk.f32.gmra.mrb[14].mxu1 %vm927_vm1, %v1885_v25  ;;  %6774 = vmatprep.mubr.msk.f32.mxu0 %vm927_vm1, %v7307_v18  ;;  %v8988_v25 = vld [vmem:[#allocation48_spill] sm:$0xff]  ;;  %v8989_v18 = vld [vmem:[#allocation49_spill] sm:$0xff] }
  0xb4   : > { %6548 = vmatprep.mubr.msk.f32.mxu1 %vm927_vm1, %v8984_v47  ;;  %v1889_v29 = vsel %vm8990_vm14, %v8989_v18, 0.0 }
  0xb6   : > { %6775 = vmatmul.mubr.msk.f32.vlgmr.msra.gmra.mrb[0].mxu0 %vm927_vm1, %v7333_v26  ;;  %v8991_v26 = vld [vmem:[#allocation50_spill] sm:$0xff] }
  0xb7   : > { %6549 = vmatmul.mubr.msk.f32.gmra.mrb[16].mxu1 %vm927_vm1, %v1887_v14  ;;  %6777 = vmatprep.mubr.msk.f32.mxu0 %vm927_vm1, %v7347_v30  ;;  %v8992_v30 = vld [vmem:[#allocation52_spill] sm:$0xff]  ;;  %v8994_v14 = vld [vmem:[#allocation53_spill] sm:$0xff] }
  0xb8   : > { %6823 = vmatpush3.msk.msra.mxu0 %vm8987_vm12, %v7985_v27  ;;  %6551 = vmatprep.mubr.msk.f32.mxu1 %vm927_vm1, %v8988_v25  ;;  %v1891_v27 = vsel %vm7841_vm0, %v7819_v11, 0.0  ;;  %vm8999_vm0 = vnez %v8921_v63  ;;  %v9054_v63 = vld [vmem:[#allocation60_spill] sm:$0xff] }
  0xba   : > { %6778 = vmatmul.mubr.msk.f32.gmra.mrb[2].mxu0 %vm927_vm1, %v7371_v36  ;;  %v8993_v36 = vld [vmem:[#allocation51_spill] sm:$0xff] }
  0xbb   : > { %6552 = vmatmul.mubr.msk.f32.gmra.mrb[18].mxu1 %vm927_vm1, %v1889_v29  ;;  %6780 = vmatprep.mubr.msk.f32.mxu0 %vm927_vm1, %v7378_v38  ;;  %v8995_v38 = vld [vmem:[#allocation55_spill] sm:$0xff] }
  0xbc   : > { %6554 = vmatprep.mubr.msk.f32.mxu1 %vm927_vm1, %v8991_v26  ;;  %vm8996_vm12 = vnez %v8995_v38 }
  0xbd   : > { %v1893_v29 = vsel %vm8996_vm12, %v8994_v14, 0.0  ;;  %vm9001_vm12 = vnez %v8924_v0 }
  0xbe   : > { %6781 = vmatmul.mubr.msk.f32.gmra.mrb[4].mxu0 %vm927_vm1, %v7398_v44  ;;  %v8997_v44 = vld [vmem:[#allocation54_spill] sm:$0xff] }
  0xbf   : > { %6555 = vmatmul.mubr.msk.f32.gmra.mrb[20].mxu1 %vm927_vm1, %v1891_v27  ;;  %6783 = vmatprep.mubr.msk.f32.mxu0 %vm927_vm1, %v7405_v46  ;;  %v8998_v46 = vld [vmem:[#allocation56_spill] sm:$0xff] }
  0xc0   : > { %6557 = vmatprep.mubr.msk.f32.mxu1 %vm927_vm1, %v8993_v36  ;;  %v1895_v27 = vsel %vm8999_vm0, %v8998_v46, 0.0 }
  0xc2   : > { %6784 = vmatmul.mubr.msk.f32.gmra.mrb[6].mxu0 %vm927_vm1, %v7425_v52  ;;  %v9000_v52 = vld [vmem:[#allocation57_spill] sm:$0xff] }
  0xc3   : > { %6558 = vmatmul.mubr.msk.f32.gmra.mrb[22].mxu1 %vm927_vm1, %v1893_v29  ;;  %6786 = vmatprep.mubr.msk.f32.mxu0 %vm927_vm1, %v7432_v54  ;;  %v1897_v54 = vsel %vm9001_vm12, %v9000_v52, 0.0  ;;  %v5726_v29 = vld [vmem:[%s7288_s30 + $0xff] sm:$0xff]  ;;  %vm9005_vm12 = vnez %v8812_v19 }
  0xc4   : > { %6560 = vmatprep.mubr.msk.f32.mxu1 %vm927_vm1, %v8997_v44 }
  0xc6   : > { %6787 = vmatmul.mubr.msk.f32.gmra.mrb[8].mxu0 %vm927_vm1, %v7452_v60  ;;  %v9002_v60 = vld [vmem:[#allocation58_spill] sm:$0xff] }
  0xc7   : > { %6561 = vmatmul.mubr.msk.f32.gmra.mrb[24].mxu1 %vm927_vm1, %v1895_v27  ;;  %6789 = vmatprep.mubr.msk.f32.mxu0 %vm927_vm1, %v7459_v62  ;;  %v1899_v62 = vsel %vm7927_vm15, %v9002_v60, 0.0  ;;  %vm9004_vm15 = vnez %v8810_v10  ;;  %v5730_v10 = vld [vmem:[%s7288_s30 + $0x11f] sm:$0xff] }
  0xc8   : > { %6563 = vmatprep.mubr.msk.f32.mxu1 %vm927_vm1, %v7883_v34  ;;  %v2360_v27 = vsel %vm9004_vm15, %v5726_v29, 0.0  ;;  %vm9006_vm15 = vcmask 1043456   ;;  %v5729_v29 = vld [vmem:[%s7288_s30 + $0x117] sm:$0xff]  ;;  %v2364_v19 = vsel %vm7319_vm4, %v5730_v10, 0.0  ;;  %v2370_v10 = vsel %vm7412_vm7, %v5736_v32, 0.0 }
  0xc9   : > { %v5741_v32 = vld [vmem:[%s7288_s30 + $0x177] sm:$0xff] }
  0xca   : > { %6790 = vmatmul.mubr.msk.f32.gmra.mrb[10].mxu0 %vm927_vm1, %v7480_v7  ;;  %v9003_v7 = vld [vmem:[#allocation59_spill] sm:$0xff] }
  0xcb   : > { %6564 = vmatmul.mubr.msk.f32.gmra.mrb[26].mxu1 %vm927_vm1, %v1897_v54  ;;  %6792 = vmatprep.mubr.msk.f32.mxu0 %vm927_vm1, %v7487_v9  ;;  %v1901_v9 = vsel %vm7947_vm13, %v9003_v7, 0.0  ;;  %v5727_v54 = vld [vmem:[%s7288_s30 + $0x107] sm:$0xff] }
  0xcc   : > { %6566 = vmatprep.mubr.msk.f32.mxu1 %vm927_vm1, %v7904_v43 }
  0xce   : > { %6793 = vmatmul.mubr.msk.f32.gmra.mrb[12].mxu0 %vm927_vm1, %v7508_v23  ;;  %v5728_v23 = vld [vmem:[%s7288_s30 + $0x10f] sm:$0xff] }
  0xcf   : > { %6567 = vmatmul.mubr.msk.f32.gmra.mrb[28].mxu1 %vm927_vm1, %v1899_v62  ;;  %6795 = vmatprep.mubr.msk.f32.mxu0 %vm927_vm1, %v7978_v42  ;;  %v2362_v62 = vsel %vm9005_vm12, %v5728_v23, 0.0  ;;  %v5733_v23 = vld [vmem:[%s7288_s30 + $0x137] sm:$0xff] }
  0xd0   : > { %6569 = vmatprep.mubr.msk.f32.mxu1 %vm927_vm1, %v7925_v1 }
  0xd2   : > { %6796 = vmatmul.mubr.msk.f32.gmra.mrb[14].mxu0 %vm927_vm1, %v7995_v33 }
  0xd3   : > { %6570 = vmatmul.mubr.msk.f32.gmra.mrb[30].mxu1 %vm927_vm1, %v1901_v9  ;;  %6798 = vmatprep.mubr.msk.f32.mxu0 %vm927_vm1, %v8001_v15  ;;  %v5732_v9 = vld [vmem:[%s7288_s30 + $0x12f] sm:$0xff] }
  0xd4   : > { %6574 = vmatprep.mubr.msk.f32.mxu1 %vm927_vm1, %v2360_v27  ;;  %v2366_v27 = vsel %vm7357_vm5, %v5732_v9, 0.0  ;;  %v5740_v9 = vld [vmem:[%s7288_s30 + $0x16f] sm:$0xff] }
  0xd5   : > { %v2374_v56 = vsel %vm7467_vm9, %v5740_v9, 0.0 }
  0xd6   : > { %6799 = vmatmul.mubr.msk.f32.gmra.mrb[16].mxu0 %vm927_vm1, %v8013_v39 }
  0xd7   : > { %6575 = vmatmul.mubr.msk.f32.vlgmr.msra.gmra.mrb[0].mxu1 %vm927_vm1, %v5727_v54  ;;  %6801 = vmatprep.mubr.msk.f32.mxu0 %vm927_vm1, %v8019_v13  ;;  %v2368_v54 = vsel %vm7385_vm6, %v5734_v22, 0.0  ;;  %v6020_v22 = vld [vmem:[%s7288_s30 + $0x200] sm:$0xff] }
  0xd8   : > { %6873 = vmatpush3.msk.msra.mxu1 %vm9006_vm15, %v8943_v31  ;;  %6577 = vmatprep.mubr.msk.f32.mxu1 %vm927_vm1, %v2362_v62  ;;  %v5731_v31 = vld [vmem:[%s7288_s30 + $0x127] sm:$0xff]  ;;  %vm9046_vm15 = vnez %v8976_v51  ;;  %v4754_v51 = vsel %vm8986_vm2, %v7819_v11, 0.0  ;;  %vm9051_vm2 = vnez %v8992_v30  ;;  %v4762_v11 = vsel %vm8999_vm0, %v9002_v60, 0.0 }
  0xd9   : > { %v5735_v62 = vld [vmem:[%s7288_s30 + $0x147] sm:$0xff]  ;;  %v4758_v6 = vsel %vm9051_vm2, %v8998_v46, 0.0  ;;  %vm9056_vm0 = vnez %v8927_v5 }
  0xda   : > { %6802 = vmatmul.mubr.msk.f32.gmra.mrb[18].mxu0 %vm927_vm1, %v8029_v45 }
  0xdb   : > { %6578 = vmatmul.mubr.msk.f32.gmra.mrb[2].mxu1 %vm927_vm1, %v5729_v29  ;;  %6804 = vmatprep.mubr.msk.f32.mxu0 %vm927_vm1, %v8035_v35  ;;  %v5737_v29 = vld [vmem:[%s7288_s30 + $0x157] sm:$0xff] }
  0xdc   : > { %6580 = vmatprep.mubr.msk.f32.mxu1 %vm927_vm1, %v2364_v19  ;;  %v8348_v19 = vld [vmem:[%s7288_s30 + $0x1f0] sm:$0xff] }
  0xde   : > { %6805 = vmatmul.mubr.msk.f32.gmra.mrb[20].mxu0 %vm927_vm1, %v8045_v53 }
  0xdf   : > { %6581 = vmatmul.mubr.msk.f32.gmra.mrb[4].mxu1 %vm927_vm1, %v5731_v31  ;;  %6807 = vmatprep.mubr.msk.f32.mxu0 %vm927_vm1, %v8051_v37  ;;  %v8359_v31 = vld [vmem:[%s7288_s30 + $0x1f8] sm:$0xff] }
  0xe0   : > { %6583 = vmatprep.mubr.msk.f32.mxu1 %vm927_vm1, %v2366_v27  ;;  %v5739_v27 = vld [vmem:[%s7288_s30 + $0x167] sm:$0xff] }
  0xe2   : > { %6808 = vmatmul.mubr.msk.f32.gmra.mrb[22].mxu0 %vm927_vm1, %v8061_v61 }
  0xe3   : > { %6584 = vmatmul.mubr.msk.f32.gmra.mrb[6].mxu1 %vm927_vm1, %v5733_v23  ;;  %6810 = vmatprep.mubr.msk.f32.mxu0 %vm927_vm1, %v8067_v41  ;;  %v5742_v23 = vld [vmem:[%s7288_s30 + $0x17f] sm:$0xff] }
  0xe4   : > { %6586 = vmatprep.mubr.msk.f32.mxu1 %vm927_vm1, %v2368_v54  ;;  %v6021_v54 = vld [vmem:[%s7288_s30 + $0x208] sm:$0xff] }
  0xe6   : > { %6811 = vmatmul.mubr.msk.f32.gmra.mrb[24].mxu0 %vm927_vm1, %v8077_v8 }
  0xe7   : > { %6587 = vmatmul.mubr.msk.f32.gmra.mrb[8].mxu1 %vm927_vm1, %v5735_v62  ;;  %6813 = vmatprep.mubr.msk.f32.mxu0 %vm927_vm1, %v8083_v49  ;;  %v6056_v62 = vld [vmem:[%s7288_s30 + $0x111] sm:$0xff] }
  0xe8   : > { %6589 = vmatprep.mubr.msk.f32.mxu1 %vm927_vm1, %v2370_v10  ;;  %v2376_v10 = vsel %vm7495_vm10, %v5742_v23, 0.0  ;;  %v9015_v23 = vld [vmem:[#allocation11_spill] sm:$0xff] }
  0xe9   : > { %vm9016_vm5 = vnez %v9015_v23  ;;  %v9032_v23 = vld [vmem:[#allocation31_spill] sm:$0xff] }
  0xea   : > { %6814 = vmatmul.mubr.msk.f32.gmra.mrb[26].mxu0 %vm927_vm1, %v8093_v24 }
  0xeb   : > { %6590 = vmatmul.mubr.msk.f32.gmra.mrb[10].mxu1 %vm927_vm1, %v5737_v29  ;;  %6816 = vmatprep.mubr.msk.f32.mxu0 %vm927_vm1, %v8348_v19  ;;  %v9008_v29 = vld [vmem:[#allocation12_spill] sm:$0xff] }
  0xec   : > { %6592 = vmatprep.mubr.msk.f32.mxu1 %vm927_vm1, %v2372_v48  ;;  %v9009_v48 = vld [vmem:[#allocation7_spill] sm:$0xff] }
  0xed   : > { %vm9010_vm4 = vnez %v9009_v48  ;;  %v9024_v48 = vld [vmem:[#allocation25_spill] sm:$0xff] }
  0xee   : > { %6817 = vmatmul.mubr.msk.f32.gmra.mrb[28].mxu0 %vm927_vm1, %v8359_v31  ;;  %v2378_v9 = vsel %vm9010_vm4, %v9008_v29, 0.0  ;;  %vm9048_vm4 = vnez %v8978_v59  ;;  %v8562_v59 = vld [vmem:[%s8659_s2] ss:$0 sm:$0xff] }
  0xef   : > { %6593 = vmatmul.mubr.msk.f32.gmra.mrb[12].mxu1 %vm927_vm1, %v5739_v27  ;;  %6819 = vmatprep.mubr.msk.f32.mxu0 %vm927_vm1, %v6020_v22  ;;  %v9012_v27 = vld [vmem:[#allocation16_spill] sm:$0xff]  ;;  %v9029_v22 = vld [vmem:[#allocation30_spill] sm:$0xff] }
  0xf0   : > { %6595 = vmatprep.mubr.msk.f32.mxu1 %vm927_vm1, %v2374_v56  ;;  %v4740_v56 = vsel %vm8941_vm3, %v9012_v27, 0.0 }
  0xf2   : > { %6820 = vmatmul.mubr.msk.f32.gmra.mrb[30].mxu0 %vm927_vm1, %v6021_v54  ;;  %v2380_v54 = vsel %vm9016_vm5, %v9014_v28, 0.0  ;;  %vm9050_vm5 = vnez %v8982_v50  ;;  %v4756_v50 = vsel %vm8990_vm14, %v8994_v14, 0.0  ;;  %vm9052_vm14 = vnez %v8995_v38 }
  0xf3   : > { %6596 = vmatmul.mubr.msk.f32.gmra.mrb[14].mxu1 %vm927_vm1, %v5741_v32  ;;  %6824 = vmatprep.mubr.msk.f32.mxu0 %vm927_vm1, %v6056_v62  ;;  %v9017_v32 = vld [vmem:[#allocation19_spill] sm:$0xff]  ;;  %v9018_v62 = vld [vmem:[#allocation22_spill] sm:$0xff]  ;;  %v4760_v4 = vsel %vm9052_vm14, %v9000_v52, 0.0 }
  0xf4   : > { %6598 = vmatprep.mubr.msk.f32.mxu1 %vm927_vm1, %v2376_v10 }
  0xf6   : > { %6825 = vmatmul.mubr.msk.f32.vlgmr.msra.gmra.mrb[0].mxu0 %vm927_vm1, %v4738_v40  ;;  %v9022_v40 = vld [vmem:[#allocation17_spill] sm:$0xff] }
  0xf7   : > { %6599 = vmatmul.mubr.msk.f32.gmra.mrb[16].mxu1 %vm927_vm1, %v9011_v16  ;;  %6827 = vmatprep.mubr.msk.f32.mxu0 %vm927_vm1, %v8953_v12  ;;  %v9019_v12 = vld [vmem:[#allocation15_spill] sm:$0xff]  ;;  %vm9023_vm7 = vnez %v9022_v40  ;;  %v9026_v16 = vld [vmem:[#allocation28_spill] sm:$0xff]  ;;  %v9039_v40 = vld [vmem:[#allocation37_spill] sm:$0xff] }
  0xf8   : > { %6601 = vmatprep.mubr.msk.f32.mxu1 %vm927_vm1, %v2378_v9  ;;  %vm9020_vm6 = vnez %v9019_v12  ;;  %v2382_v29 = vsel %vm9023_vm7, %v9021_v2, 0.0  ;;  %v9025_v9 = vld [vmem:[#allocation26_spill] sm:$0xff]  ;;  %v9036_v12 = vld [vmem:[#allocation36_spill] sm:$0xff] }
  0xf9   : > { %v4742_v10 = vsel %vm9020_vm6, %v9018_v62, 0.0  ;;  %vm9053_vm6 = vnez %v8924_v0  ;;  %v6086_v0 = vld [vmem:[%s7288_s30 + $0x201] sm:$0xff] }
  0xfa   : > { %6828 = vmatmul.mubr.msk.f32.gmra.mrb[2].mxu0 %vm927_vm1, %v4740_v56  ;;  %v9030_v56 = vld [vmem:[#allocation23_spill] sm:$0xff] }
  0xfb   : > { %6602 = vmatmul.mubr.msk.f32.gmra.mrb[18].mxu1 %vm927_vm1, %v9017_v32  ;;  %6830 = vmatprep.mubr.msk.f32.mxu0 %vm927_vm1, %v8960_v20  ;;  %v9027_v20 = vld [vmem:[#allocation21_spill] sm:$0xff]  ;;  %vm9031_vm9 = vnez %v9030_v56  ;;  %v9034_v32 = vld [vmem:[#allocation27_spill] sm:$0xff] }
  0xfc   : > { %6604 = vmatprep.mubr.msk.f32.mxu1 %vm927_vm1, %v2380_v54  ;;  %vm9028_vm8 = vnez %v9027_v20  ;;  %v2384_v28 = vsel %vm9031_vm9, %v9029_v22, 0.0  ;;  %v9033_v54 = vld [vmem:[#allocation32_spill] sm:$0xff]  ;;  %vm9035_vm10 = vnez %v9034_v32  ;;  %v9045_v20 = vld [vmem:[#allocation43_spill] sm:$0xff] }
  0xfd   : > { %v4744_v27 = vsel %vm9028_vm8, %v9026_v16, 0.0  ;;  %v4746_v62 = vsel %vm9035_vm10, %v8975_v3, 0.0  ;;  %v9042_v3 = vld [vmem:[#allocation42_spill] sm:$0xff]  ;;  %v9049_v22 = vld [vmem:[#allocation47_spill] sm:$0xff] }
  0xfe   : > { %6831 = vmatmul.mubr.msk.f32.gmra.mrb[4].mxu0 %vm927_vm1, %v4742_v10  ;;  %v9037_v10 = vld [vmem:[#allocation29_spill] sm:$0xff] }
  0xff   : > { %6605 = vmatmul.mubr.msk.f32.gmra.mrb[20].mxu1 %vm927_vm1, %v9024_v48  ;;  %6833 = vmatprep.mubr.msk.f32.mxu0 %vm927_vm1, %v9025_v9  ;;  %vm9038_vm11 = vnez %v9037_v10  ;;  %v9043_v9 = vld [vmem:[#allocation35_spill] sm:$0xff] }
 0x100   : > { %6607 = vmatprep.mubr.msk.f32.mxu1 %vm927_vm1, %v2382_v29  ;;  %v2386_v2 = vsel %vm9038_vm11, %v9036_v12, 0.0  ;;  %v9040_v29 = vld [vmem:[#allocation33_spill] sm:$0xff]  ;;  %vm9044_vm12 = vnez %v9043_v9 }
 0x101   : > { %vm9041_vm3 = vnez %v9040_v29  ;;  %v2388_v16 = vsel %vm9044_vm12, %v9042_v3, 0.0 }
 0x102   : > { %6834 = vmatmul.mubr.msk.f32.gmra.mrb[6].mxu0 %vm927_vm1, %v4744_v27  ;;  %v4748_v48 = vsel %vm9041_vm3, %v8981_v55, 0.0  ;;  %v9047_v55 = vld [vmem:[#allocation4_spill] sm:$0xff] }
 0x103   : > { %6608 = vmatmul.mubr.msk.f32.gmra.mrb[22].mxu1 %vm927_vm1, %v9032_v23  ;;  %6836 = vmatprep.mubr.msk.f32.mxu0 %vm927_vm1, %v9033_v54  ;;  %v2390_v27 = vsel %vm9048_vm4, %v9047_v55, 0.0 }
 0x104   : > { %6610 = vmatprep.mubr.msk.f32.mxu1 %vm927_vm1, %v2384_v28 }
 0x106   : > { %6837 = vmatmul.mubr.msk.f32.gmra.mrb[8].mxu0 %vm927_vm1, %v4746_v62 }
 0x107   : > { %6611 = vmatmul.mubr.msk.f32.gmra.mrb[24].mxu1 %vm927_vm1, %v9039_v40  ;;  %6839 = vmatprep.mubr.msk.f32.mxu0 %vm927_vm1, %v8980_v17  ;;  %v4750_v17 = vsel %vm9046_vm15, %v8985_v58, 0.0 }
 0x108   : > { %6613 = vmatprep.mubr.msk.f32.mxu1 %vm927_vm1, %v2386_v2 }
 0x10a   : > { %6840 = vmatmul.mubr.msk.f32.gmra.mrb[10].mxu0 %vm927_vm1, %v4748_v48 }
 0x10b   : > { %6614 = vmatmul.mubr.msk.f32.gmra.mrb[26].mxu1 %vm927_vm1, %v9045_v20  ;;  %6842 = vmatprep.mubr.msk.f32.mxu0 %vm927_vm1, %v8984_v47  ;;  %v4752_v47 = vsel %vm9050_vm5, %v8989_v18, 0.0 }
 0x10c   : > { %6616 = vmatprep.mubr.msk.f32.mxu1 %vm927_vm1, %v2388_v16 }
 0x10e   : > { %6843 = vmatmul.mubr.msk.f32.gmra.mrb[12].mxu0 %vm927_vm1, %v4750_v17 }
 0x10f   : > { %6617 = vmatmul.mubr.msk.f32.gmra.mrb[28].mxu1 %vm927_vm1, %v9049_v22  ;;  %6845 = vmatprep.mubr.msk.f32.mxu0 %vm927_vm1, %v8988_v25 }
 0x110   : > { %6619 = vmatprep.mubr.msk.f32.mxu1 %vm927_vm1, %v2390_v27 }
 0x112   : > { %6846 = vmatmul.mubr.msk.f32.gmra.mrb[14].mxu0 %vm927_vm1, %v4752_v47 }
 0x113   : > { %6620 = vmatmul.mubr.msk.f32.gmra.mrb[30].mxu1 %vm927_vm1, %v8184_v57  ;;  %6848 = vmatprep.mubr.msk.f32.mxu0 %vm927_vm1, %v8991_v26 }
 0x114   : > { %6648 = vmatprep.mubr.msk.f32.mxu1 %vm927_vm1, %v7978_v42 }
 0x116   : > { %6849 = vmatmul.mubr.msk.f32.gmra.mrb[16].mxu0 %vm927_vm1, %v4754_v51 }
 0x117   : > { %6649 = vmatmul.mubr.msk.f32.vlgmr.msra.gmra.mrb[16].mxu1 %vm927_vm1, %v7995_v33  ;;  %6851 = vmatprep.mubr.msk.f32.mxu0 %vm927_vm1, %v8993_v36 }
 0x118   : > { %6651 = vmatprep.mubr.msk.f32.mxu1 %vm927_vm1, %v8001_v15 }
 0x11a   : > { %6852 = vmatmul.mubr.msk.f32.gmra.mrb[18].mxu0 %vm927_vm1, %v4756_v50 }
 0x11b   : > { %6652 = vmatmul.mubr.msk.f32.gmra.mrb[18].mxu1 %vm927_vm1, %v8013_v39  ;;  %6854 = vmatprep.mubr.msk.f32.mxu0 %vm927_vm1, %v8997_v44 }
 0x11c   : > { %6654 = vmatprep.mubr.msk.f32.mxu1 %vm927_vm1, %v8019_v13 }
 0x11e   : > { %6855 = vmatmul.mubr.msk.f32.gmra.mrb[20].mxu0 %vm927_vm1, %v4758_v6 }
 0x11f   : > { %6655 = vmatmul.mubr.msk.f32.gmra.mrb[20].mxu1 %vm927_vm1, %v8029_v45  ;;  %6857 = vmatprep.mubr.msk.f32.mxu0 %vm927_vm1, %v7883_v34  ;;  %v4764_v34 = vsel %vm9053_vm6, %v9003_v7, 0.0 }
 0x120   : > { %6657 = vmatprep.mubr.msk.f32.mxu1 %vm927_vm1, %v8035_v35 }
 0x122   : > { %6858 = vmatmul.mubr.msk.f32.gmra.mrb[22].mxu0 %vm927_vm1, %v4760_v4 }
 0x123   : > { %6658 = vmatmul.mubr.msk.f32.gmra.mrb[22].mxu1 %vm927_vm1, %v8045_v53  ;;  %6860 = vmatprep.mubr.msk.f32.mxu0 %vm927_vm1, %v7904_v43  ;;  %v9055_v43 = vld [vmem:[#allocation61_spill] sm:$0xff] }
 0x124   : > { %6660 = vmatprep.mubr.msk.f32.mxu1 %vm927_vm1, %v8051_v37  ;;  %v4766_v42 = vsel %vm9056_vm0, %v9055_v43, 0.0 }
 0x126   : > { %6861 = vmatmul.mubr.msk.f32.gmra.mrb[24].mxu0 %vm927_vm1, %v4762_v11 }
 0x127   : > { %6661 = vmatmul.mubr.msk.f32.gmra.mrb[24].mxu1 %vm927_vm1, %v8061_v61  ;;  %6863 = vmatprep.mubr.msk.f32.mxu0 %vm927_vm1, %v7925_v1  ;;  %v6087_v1 = vld [vmem:[%s7288_s30 + $0x209] sm:$0xff] }
 0x128   : > { %6663 = vmatprep.mubr.msk.f32.mxu1 %vm927_vm1, %v8067_v41  ;;  %v4768_v33 = vsel %vm7947_vm13, %v6087_v1, 0.0 }
 0x12a   : > { %6864 = vmatmul.mubr.msk.f32.gmra.mrb[26].mxu0 %vm927_vm1, %v4764_v34 }
 0x12b   : > { %6664 = vmatmul.mubr.msk.f32.gmra.mrb[26].mxu1 %vm927_vm1, %v8077_v8  ;;  %6866 = vmatprep.mubr.msk.f32.mxu0 %vm927_vm1, %v9054_v63 }
 0x12c   : > { %6666 = vmatprep.mubr.msk.f32.mxu1 %vm927_vm1, %v8083_v49 }
 0x12e   : > { %6867 = vmatmul.mubr.msk.f32.gmra.mrb[28].mxu0 %vm927_vm1, %v4766_v42 }
 0x12f   : > { %6667 = vmatmul.mubr.msk.f32.gmra.mrb[28].mxu1 %vm927_vm1, %v8093_v24  ;;  %6869 = vmatprep.mubr.msk.f32.mxu0 %vm927_vm1, %v6086_v0 }
 0x130   : > { %6669 = vmatprep.mubr.msk.f32.mxu1 %vm927_vm1, %v8348_v19 }
 0x132   : > { %6870 = vmatmul.mubr.msk.f32.gmra.mrb[30].mxu0 %vm927_vm1, %v4768_v33 }
 0x133   : > { %6670 = vmatmul.mubr.msk.f32.gmra.mrb[30].mxu1 %vm927_vm1, %v8359_v31  ;;  %vm5361_vm1 = vcmask 1040384  }
 0x1aa   : > { %v6576_v5 = vpop.f32.mrb[0].mxu1 }
 0x1ab   : > { %v2591_v15 = vpop.f32.mrb[1].mxu1  ;;  %v6874_v25 = vadd.f32 %v6576_v5, %v8562_v59 }
 0x1ac   : > { %v6876_v18 = vadd.f32 %v8562_v59, %v2591_v15 }
 0x1ae   : > { %v6579_v39 = vpop.f32.mrb[2].mxu1 }
 0x1af   : > { %v2601_v13 = vpop.f32.mrb[3].mxu1  ;;  %v6878_v38 = vadd.f32 %v6579_v39, %v8562_v59 }
 0x1b0   : > { %v6880_v46 = vadd.f32 %v8562_v59, %v2601_v13 }
 0x1b2   : > { %v6582_v45 = vpop.f32.mrb[4].mxu1 }
 0x1b3   : > { %v2611_v35 = vpop.f32.mrb[5].mxu1  ;;  %v6882_v23 = vadd.f32 %v6582_v45, %v8562_v59 }
 0x1b4   : > { %v6884_v54 = vadd.f32 %v8562_v59, %v2611_v35 }
 0x1b6   : > { %v6585_v53 = vpop.f32.mrb[6].mxu1 }
 0x1b7   : > { %v2621_v37 = vpop.f32.mrb[7].mxu1  ;;  %v6886_v9 = vadd.f32 %v6585_v53, %v8562_v59 }
 0x1b8   : > { %v6888_v16 = vadd.f32 %v8562_v59, %v2621_v37 }
 0x1ba   : > { %v6588_v61 = vpop.f32.mrb[8].mxu1 }
 0x1bb   : > { %v2631_v21 = vpop.f32.mrb[9].mxu1  ;;  %v6890_v11 = vadd.f32 %v6588_v61, %v8562_v59 }
 0x1bc   : > { %v6892_v34 = vadd.f32 %v8562_v59, %v2631_v21 }
 0x1be   : > { %v8551_v41 = vpop.f32.mrb[10].mxu1 }
 0x1bf   : > { %v8553_v8 = vpop.f32.mrb[11].mxu1  ;;  %v6894_v45 = vadd.f32 %v8551_v41, %v8562_v59 }
 0x1c0   : > { %v6896_v35 = vadd.f32 %v8562_v59, %v8553_v8 }
 0x1c2   : > { %v8555_v49 = vpop.f32.mrb[12].mxu1 }
 0x1c3   : > { %v8557_v24 = vpop.f32.mrb[13].mxu1  ;;  %v6898_v41 = vadd.f32 %v8555_v49, %v8562_v59 }
 0x1c4   : > { %v6900_v8 = vadd.f32 %v8562_v59, %v8557_v24 }
 0x1c6   : > { %v8564_v57 = vpop.f32.mrb[14].mxu1 }
 0x1c7   : > { %v8567_v58 = vpop.f32.mrb[15].mxu1  ;;  %v6902_v49 = vadd.f32 %v8564_v57, %v8562_v59 }
 0x1c8   : > { %v6904_v24 = vadd.f32 %v8562_v59, %v8567_v58 }
 0x1c9   : > { %v6826_v26 = vpop.f32.mrb[0].mxu0 }
 0x1ca   : > { %v6875_v30 = vadd.f32 %v6874_v25, %v6826_v26  ;;  %v4968_v36 = vpop.f32.mrb[1].mxu0 }
 0x1cb   : > { %v6877_v14 = vadd.f32 %v6876_v18, %v4968_v36 }
 0x1cc   : > { %5224 = vst [vmem:[%s8574_s24 + $0x8] sm:$0xff] %v6875_v30  ;;  %v5293_v44 = vmul.f32 %v6875_v30, %v6875_v30 }
 0x1cd   : > { %5223 = vst [vmem:[%s8574_s24] sm:$0xff] %v6877_v14  ;;  %v5255_v52 = vadd.f32 %v6877_v14, %v6875_v30  ;;  %v5292_v60 = vmul.f32 %v6877_v14, %v6877_v14  ;;  %v6829_v7 = vpop.f32.mrb[2].mxu0 }
 0x1ce   : > { %v6879_v19 = vadd.f32 %v6878_v38, %v6829_v7  ;;  %v4978_v31 = vpop.f32.mrb[3].mxu0 }
 0x1cf   : > { %v5324_v56 = vadd.f32 %v5293_v44, %v5292_v60  ;;  %v6881_v28 = vadd.f32 %v6880_v46, %v4978_v31 }
 0x1d0   : > { %5226 = vst [vmem:[%s8574_s24 + $0x18] sm:$0xff] %v6879_v19  ;;  %v5295_v40 = vmul.f32 %v6879_v19, %v6879_v19 }
 0x1d1   : > { %5225 = vst [vmem:[%s8574_s24 + $0x10] sm:$0xff] %v6881_v28  ;;  %v5256_v32 = vadd.f32 %v6881_v28, %v5255_v52  ;;  %v5294_v62 = vmul.f32 %v6881_v28, %v6881_v28  ;;  %v6832_v12 = vpop.f32.mrb[4].mxu0 }
 0x1d2   : > { %v6883_v10 = vadd.f32 %v6882_v23, %v6832_v12  ;;  %v4988_v2 = vpop.f32.mrb[5].mxu0 }
 0x1d3   : > { %v5325_v29 = vadd.f32 %v5324_v56, %v5294_v62  ;;  %v6885_v48 = vadd.f32 %v6884_v54, %v4988_v2  ;;  %v5257_v3 = vadd.f32 %v6879_v19, %v5256_v32 }
 0x1d4   : > { %5228 = vst [vmem:[%s8574_s24 + $0x28] sm:$0xff] %v6883_v10  ;;  %v5297_v51 = vmul.f32 %v6883_v10, %v6883_v10 }
 0x1d5   : > { %5227 = vst [vmem:[%s8574_s24 + $0x20] sm:$0xff] %v6885_v48  ;;  %v5258_v20 = vadd.f32 %v6885_v48, %v5257_v3  ;;  %v5296_v17 = vmul.f32 %v6885_v48, %v6885_v48  ;;  %v5326_v55 = vadd.f32 %v5325_v29, %v5295_v40  ;;  %v6835_v27 = vpop.f32.mrb[6].mxu0 }
 0x1d6   : > { %v6887_v22 = vadd.f32 %v6886_v9, %v6835_v27  ;;  %v4998_v47 = vpop.f32.mrb[7].mxu0 }
 0x1d7   : > { %v5327_v50 = vadd.f32 %v5326_v55, %v5296_v17  ;;  %v6889_v6 = vadd.f32 %v6888_v16, %v4998_v47  ;;  %v5259_v4 = vadd.f32 %v6883_v10, %v5258_v20 }
 0x1d8   : > { %5230 = vst [vmem:[%s8574_s24 + $0x38] sm:$0xff] %v6887_v22  ;;  %v5299_v5 = vmul.f32 %v6887_v22, %v6887_v22 }
 0x1d9   : > { %5229 = vst [vmem:[%s8574_s24 + $0x30] sm:$0xff] %v6889_v6  ;;  %v5260_v63 = vadd.f32 %v6889_v6, %v5259_v4  ;;  %v5298_v43 = vmul.f32 %v6889_v6, %v6889_v6  ;;  %v5328_v42 = vadd.f32 %v5327_v50, %v5297_v51  ;;  %v6838_v0 = vpop.f32.mrb[8].mxu0 }
 0x1da   : > { %v6891_v1 = vadd.f32 %v6890_v11, %v6838_v0  ;;  %v5008_v33 = vpop.f32.mrb[9].mxu0 }
 0x1db   : > { %v5329_v15 = vadd.f32 %v5328_v42, %v5298_v43  ;;  %v6893_v39 = vadd.f32 %v6892_v34, %v5008_v33  ;;  %v5261_v13 = vadd.f32 %v6887_v22, %v5260_v63 }
 0x1dc   : > { %5232 = vst [vmem:[%s8574_s24 + $0x48] sm:$0xff] %v6891_v1  ;;  %v5301_v26 = vmul.f32 %v6891_v1, %v6891_v1 }
 0x1dd   : > { %5231 = vst [vmem:[%s8574_s24 + $0x40] sm:$0xff] %v6893_v39  ;;  %v5262_v53 = vadd.f32 %v6893_v39, %v5261_v13  ;;  %v5300_v37 = vmul.f32 %v6893_v39, %v6893_v39  ;;  %v5330_v61 = vadd.f32 %v5329_v15, %v5299_v5  ;;  %v6841_v21 = vpop.f32.mrb[10].mxu0 }
 0x1de   : > { %v6895_v25 = vadd.f32 %v6894_v45, %v6841_v21  ;;  %v5018_v18 = vpop.f32.mrb[11].mxu0 }
 0x1df   : > { %v5331_v30 = vadd.f32 %v5330_v61, %v5300_v37  ;;  %v6897_v36 = vadd.f32 %v6896_v35, %v5018_v18  ;;  %v5263_v14 = vadd.f32 %v6891_v1, %v5262_v53 }
 0x1e0   : > { %5234 = vst [vmem:[%s8574_s24 + $0x58] sm:$0xff] %v6895_v25  ;;  %v5303_v19 = vmul.f32 %v6895_v25, %v6895_v25 }
 0x1e1   : > { %5233 = vst [vmem:[%s8574_s24 + $0x50] sm:$0xff] %v6897_v36  ;;  %v5264_v38 = vadd.f32 %v6897_v36, %v5263_v14  ;;  %v5302_v44 = vmul.f32 %v6897_v36, %v6897_v36  ;;  %v5332_v46 = vadd.f32 %v5331_v30, %v5301_v26  ;;  %v6844_v52 = vpop.f32.mrb[12].mxu0 }
 0x1e2   : > { %v6899_v60 = vadd.f32 %v6898_v41, %v6844_v52  ;;  %v5028_v7 = vpop.f32.mrb[13].mxu0 }
 0x1e3   : > { %v5333_v31 = vadd.f32 %v5332_v46, %v5302_v44  ;;  %v6901_v56 = vadd.f32 %v6900_v8, %v5028_v7  ;;  %v5265_v28 = vadd.f32 %v6895_v25, %v5264_v38 }
 0x1e4   : > { %5236 = vst [vmem:[%s8574_s24 + $0x68] sm:$0xff] %v6899_v60  ;;  %v5305_v2 = vmul.f32 %v6899_v60, %v6899_v60 }
 0x1e5   : > { %5235 = vst [vmem:[%s8574_s24 + $0x60] sm:$0xff] %v6901_v56  ;;  %v5266_v23 = vadd.f32 %v6901_v56, %v5265_v28  ;;  %v5304_v54 = vmul.f32 %v6901_v56, %v6901_v56  ;;  %v5334_v32 = vadd.f32 %v5333_v31, %v5303_v19  ;;  %v6847_v62 = vpop.f32.mrb[14].mxu0 }
 0x1e6   : > { %v6903_v12 = vadd.f32 %v6902_v49, %v6847_v62  ;;  %v5038_v10 = vpop.f32.mrb[15].mxu0 }
 0x1e7   : > { %v5335_v40 = vadd.f32 %v5334_v32, %v5304_v54  ;;  %v6905_v29 = vadd.f32 %v6904_v24, %v5038_v10  ;;  %v5267_v48 = vadd.f32 %v6899_v60, %v5266_v23 }
 0x1e8   : > { %5238 = vst [vmem:[%s8574_s24 + $0x78] sm:$0xff] %v6903_v12  ;;  %v5307_v17 = vmul.f32 %v6903_v12, %v6903_v12 }
 0x1e9   : > { %5237 = vst [vmem:[%s8574_s24 + $0x70] sm:$0xff] %v6905_v29  ;;  %v5268_v3 = vadd.f32 %v6905_v29, %v5267_v48  ;;  %v5306_v9 = vmul.f32 %v6905_v29, %v6905_v29  ;;  %v5336_v57 = vadd.f32 %v5335_v40, %v5305_v2  ;;  %v6850_v16 = vpop.f32.mrb[16].mxu0 }
 0x1ea   : > { %v6650_v20 = vpop.f32.mrb[16].mxu1  ;;  %v5048_v58 = vpop.f32.mrb[17].mxu0 }
 0x1eb   : > { %v5269_v55 = vadd.f32 %v6903_v12, %v5268_v3  ;;  %v5337_v27 = vadd.f32 %v5336_v57, %v5306_v9  ;;  %v6906_v22 = vadd.f32 %v6650_v20, %v8562_v59  ;;  %v3126_v47 = vpop.f32.mrb[17].mxu1 }
 0x1ec   : > { %v6908_v51 = vadd.f32 %v8562_v59, %v3126_v47 }
 0x1ed   : > { %v5338_v50 = vadd.f32 %v5337_v27, %v5307_v17  ;;  %v6907_v6 = vadd.f32 %v6906_v22, %v6850_v16  ;;  %v6853_v4 = vpop.f32.mrb[18].mxu0 }
 0x1ee   : > { %v6909_v11 = vadd.f32 %v6908_v51, %v5048_v58  ;;  %v6653_v34 = vpop.f32.mrb[18].mxu1  ;;  %v5058_v63 = vpop.f32.mrb[19].mxu0 }
 0x1ef   : > { %5240 = vst [vmem:[%s8574_s24 + $0x88] sm:$0xff] %v6907_v6  ;;  %v6910_v43 = vadd.f32 %v6653_v34, %v8562_v59  ;;  %v3136_v42 = vpop.f32.mrb[19].mxu1  ;;  %v5309_v39 = vmul.f32 %v6907_v6, %v6907_v6 }
 0x1f0   : > { %5239 = vst [vmem:[%s8574_s24 + $0x80] sm:$0xff] %v6909_v11  ;;  %v5270_v0 = vadd.f32 %v6909_v11, %v5269_v55  ;;  %v5308_v1 = vmul.f32 %v6909_v11, %v6909_v11  ;;  %v6912_v33 = vadd.f32 %v8562_v59, %v3136_v42 }
 0x1f1   : > { %v6911_v5 = vadd.f32 %v6910_v43, %v6853_v4  ;;  %v6856_v15 = vpop.f32.mrb[20].mxu0 }
 0x1f2   : > { %v5339_v13 = vadd.f32 %v5338_v50, %v5308_v1  ;;  %v6913_v45 = vadd.f32 %v6912_v33, %v5058_v63  ;;  %v5271_v35 = vadd.f32 %v6907_v6, %v5270_v0  ;;  %v6656_v53 = vpop.f32.mrb[20].mxu1  ;;  %v5068_v37 = vpop.f32.mrb[21].mxu0 }
 0x1f3   : > { %5242 = vst [vmem:[%s8574_s24 + $0x98] sm:$0xff] %v6911_v5  ;;  %v6914_v61 = vadd.f32 %v6656_v53, %v8562_v59  ;;  %v3146_v21 = vpop.f32.mrb[21].mxu1  ;;  %v5311_v41 = vmul.f32 %v6911_v5, %v6911_v5 }
 0x1f4   : > { %5241 = vst [vmem:[%s8574_s24 + $0x90] sm:$0xff] %v6913_v45  ;;  %v5272_v25 = vadd.f32 %v6913_v45, %v5271_v35  ;;  %v5310_v18 = vmul.f32 %v6913_v45, %v6913_v45  ;;  %v5340_v26 = vadd.f32 %v5339_v13, %v5309_v39  ;;  %v6916_v30 = vadd.f32 %v8562_v59, %v3146_v21 }
 0x1f5   : > { %v6915_v36 = vadd.f32 %v6914_v61, %v6856_v15  ;;  %v6859_v14 = vpop.f32.mrb[22].mxu0 }
 0x1f6   : > { %v5341_v8 = vadd.f32 %v5340_v26, %v5310_v18  ;;  %v6917_v38 = vadd.f32 %v6916_v30, %v5068_v37  ;;  %v5273_v44 = vadd.f32 %v6911_v5, %v5272_v25  ;;  %v6659_v46 = vpop.f32.mrb[22].mxu1  ;;  %v5078_v52 = vpop.f32.mrb[23].mxu0 }
 0x1f7   : > { %5244 = vst [vmem:[%s8574_s24 + $0xa8] sm:$0xff] %v6915_v36  ;;  %v6918_v60 = vadd.f32 %v6659_v46, %v8562_v59  ;;  %v3156_v7 = vpop.f32.mrb[23].mxu1  ;;  %v5313_v23 = vmul.f32 %v6915_v36, %v6915_v36 }
 0x1f8   : > { %5243 = vst [vmem:[%s8574_s24 + $0xa0] sm:$0xff] %v6917_v38  ;;  %v5274_v19 = vadd.f32 %v6917_v38, %v5273_v44  ;;  %v5312_v31 = vmul.f32 %v6917_v38, %v6917_v38  ;;  %v5342_v56 = vadd.f32 %v5341_v8, %v5311_v41  ;;  %v6920_v28 = vadd.f32 %v8562_v59, %v3156_v7 }
 0x1f9   : > { %v6919_v49 = vadd.f32 %v6918_v60, %v6859_v14  ;;  %v6862_v24 = vpop.f32.mrb[24].mxu0 }
 0x1fa   : > { %v5343_v54 = vadd.f32 %v5342_v56, %v5312_v31  ;;  %v6921_v32 = vadd.f32 %v6920_v28, %v5078_v52  ;;  %v5275_v62 = vadd.f32 %v6915_v36, %v5274_v19  ;;  %v6662_v12 = vpop.f32.mrb[24].mxu1  ;;  %v5088_v10 = vpop.f32.mrb[25].mxu0 }
 0x1fb   : > { %5246 = vst [vmem:[%s8574_s24 + $0xb8] sm:$0xff] %v6919_v49  ;;  %v6922_v2 = vadd.f32 %v6662_v12, %v8562_v59  ;;  %v3166_v40 = vpop.f32.mrb[25].mxu1  ;;  %v5315_v20 = vmul.f32 %v6919_v49, %v6919_v49 }
 0x1fc   : > { %5245 = vst [vmem:[%s8574_s24 + $0xb0] sm:$0xff] %v6921_v32  ;;  %v5276_v29 = vadd.f32 %v6921_v32, %v5275_v62  ;;  %v5314_v48 = vmul.f32 %v6921_v32, %v6921_v32  ;;  %v5344_v3 = vadd.f32 %v5343_v54, %v5313_v23  ;;  %v6924_v9 = vadd.f32 %v8562_v59, %v3166_v40 }
 0x1fd   : > { %v6923_v57 = vadd.f32 %v6922_v2, %v6862_v24  ;;  %v6865_v16 = vpop.f32.mrb[26].mxu0 }
 0x1fe   : > { %v5345_v58 = vadd.f32 %v5344_v3, %v5314_v48  ;;  %v6925_v17 = vadd.f32 %v6924_v9, %v5088_v10  ;;  %v5277_v55 = vadd.f32 %v6919_v49, %v5276_v29  ;;  %v6665_v27 = vpop.f32.mrb[26].mxu1  ;;  %v5098_v22 = vpop.f32.mrb[27].mxu0 }
 0x1ff   : > { %5248 = vst [vmem:[%s8574_s24 + $0xc8] sm:$0xff] %v6923_v57  ;;  %v6926_v47 = vadd.f32 %v6665_v27, %v8562_v59  ;;  %v3176_v51 = vpop.f32.mrb[27].mxu1  ;;  %v5317_v43 = vmul.f32 %v6923_v57, %v6923_v57 }
 0x200   : > { %5247 = vst [vmem:[%s8574_s24 + $0xc0] sm:$0xff] %v6925_v17  ;;  %v5278_v50 = vadd.f32 %v6925_v17, %v5277_v55  ;;  %v5316_v6 = vmul.f32 %v6925_v17, %v6925_v17  ;;  %v5346_v4 = vadd.f32 %v5345_v58, %v5315_v20  ;;  %v6928_v11 = vadd.f32 %v8562_v59, %v3176_v51 }
 0x201   : > { %v6927_v34 = vadd.f32 %v6926_v47, %v6865_v16  ;;  %v6868_v63 = vpop.f32.mrb[28].mxu0 }
 0x202   : > { %v5347_v42 = vadd.f32 %v5346_v4, %v5316_v6  ;;  %v6929_v0 = vadd.f32 %v6928_v11, %v5098_v22  ;;  %v5279_v1 = vadd.f32 %v6923_v57, %v5278_v50  ;;  %v6668_v33 = vpop.f32.mrb[28].mxu1  ;;  %v5108_v5 = vpop.f32.mrb[29].mxu0 }
 0x203   : > { %5250 = vst [vmem:[%s8574_s24 + $0xd8] sm:$0xff] %v6927_v34  ;;  %v6930_v15 = vadd.f32 %v6668_v33, %v8562_v59  ;;  %v3186_v39 = vpop.f32.mrb[29].mxu1  ;;  %v5319_v21 = vmul.f32 %v6927_v34, %v6927_v34 }
 0x204   : > { %5249 = vst [vmem:[%s8574_s24 + $0xd0] sm:$0xff] %v6929_v0  ;;  %v5280_v13 = vadd.f32 %v6929_v0, %v5279_v1  ;;  %v5318_v45 = vmul.f32 %v6929_v0, %v6929_v0  ;;  %v5348_v35 = vadd.f32 %v5347_v42, %v5317_v43  ;;  %v6932_v53 = vadd.f32 %v8562_v59, %v3186_v39 }
 0x205   : > { %v6931_v37 = vadd.f32 %v6930_v15, %v6868_v63  ;;  %v6871_v61 = vpop.f32.mrb[30].mxu0 }
 0x206   : > { %v5349_v25 = vadd.f32 %v5348_v35, %v5318_v45  ;;  %v6933_v18 = vadd.f32 %v6932_v53, %v5108_v5  ;;  %v5281_v26 = vadd.f32 %v6927_v34, %v5280_v13  ;;  %v6671_v30 = vpop.f32.mrb[30].mxu1  ;;  %v5118_v36 = vpop.f32.mrb[31].mxu0 }
 0x207   : > { %5252 = vst [vmem:[%s8574_s24 + $0xe8] sm:$0xff] %v6931_v37  ;;  %v6934_v14 = vadd.f32 %v6671_v30, %v8562_v59  ;;  %v3196_v41 = vpop.f32.mrb[31].mxu1  ;;  %v5321_v60 = vmul.f32 %v6931_v37, %v6931_v37 }
 0x208   : > { %5251 = vst [vmem:[%s8574_s24 + $0xe0] sm:$0xff] %v6933_v18  ;;  %v5282_v8 = vadd.f32 %v6933_v18, %v5281_v26  ;;  %v5320_v38 = vmul.f32 %v6933_v18, %v6933_v18  ;;  %v5350_v44 = vadd.f32 %v5349_v25, %v5319_v21  ;;  %v6936_v46 = vadd.f32 %v8562_v59, %v3196_v41 }
 0x209   : > { %v6935_v52 = vadd.f32 %v6934_v14, %v6871_v61 }
 0x20a   : > { %v5351_v7 = vadd.f32 %v5350_v44, %v5320_v38  ;;  %v6937_v19 = vadd.f32 %v6936_v46, %v5118_v36  ;;  %v5283_v31 = vadd.f32 %v6931_v37, %v5282_v8 }
 0x20b   : > { %5254 = vst [vmem:[%s8574_s24 + $0xf8] sm:$0xff] %v6935_v52  ;;  %v5323_v24 = vmul.f32 %v6935_v52, %v6935_v52 }
 0x20c   : > { %5253 = vst [vmem:[%s8574_s24 + $0xf0] sm:$0xff] %v6937_v19  ;;  %v5284_v56 = vadd.f32 %v6937_v19, %v5283_v31  ;;  %v5322_v28 = vmul.f32 %v6937_v19, %v6937_v19  ;;  %v5352_v49 = vadd.f32 %v5351_v7, %v5321_v60 }
 0x20e   : > { %v5285_v23 = vadd.f32 %v6935_v52, %v5284_v56  ;;  %v5353_v54 = vadd.f32 %v5352_v49, %v5322_v28 }
 0x210   : > { %v5286_v32 = vrot.slane %v5285_v23, 4  ;;  %v5354_v62 = vadd.f32 %v5353_v54, %v5323_v24 }
 0x212   : > { %v5287_v12 = vadd.f32 %v5286_v32, %v5285_v23  ;;  %v5355_v10 = vrot.slane %v5354_v62, 4 }
 0x214   : > { %v5288_v2 = vrot.slane %v5287_v12, 2  ;;  %v5356_v59 = vadd.f32 %v5355_v10, %v5354_v62 }
 0x216   : > { %v5289_v40 = vadd.f32 %v5288_v2, %v5287_v12  ;;  %v5357_v29 = vrot.slane %v5356_v59, 2 }
 0x218   : > { %v5290_v48 = vrot.slane %v5289_v40, 1  ;;  %v5358_v3 = vadd.f32 %v5357_v29, %v5356_v59 }
 0x21a   : > { %v5359_v9 = vrot.slane %v5358_v3, 1  ;;  %v5291_v57 = vadd.f32 %v5290_v48, %v5289_v40 }
 0x21c   : > { %v5360_v16 = vadd.f32 %v5359_v9, %v5358_v3 }
 0x21e   : > { %v5362_v20 = vsel %vm5361_vm1, %v5291_v57, %v5360_v16 }
 0x21f   : > { %5363 = vst [vmem:[%s239_s28] sm:$0x3] %v5362_v20 }
 0x220 PF: > { %s15_s17 = sadd.s32 1, %s7209_s17   ;;  %s9057_s15 = smov %s7205_s16 }
 0x221   : > { %p12_p5 = scmp.ge.s32.totalorder %s15_s17, 4   ;;  %s9058_s16 = smov %s9060_s18 }
 0x223   :  { %14 = sbr.rel (!%p12_p5) target bundleno = 2 (0x2), region = 91 }

</bundles_post_ra>
